<compile_context>
chip_gen: v7x
topology: tpu7x:2x2x1
jax: 0.10.0
libtpu: 0.0.40
codegen_flags: <defaults>
</compile_context>

<pallas_src>
import math

import jax
import jax.numpy as jnp
from jax import lax
from jax.experimental import pallas as pl
from jax.experimental.pallas import tpu as pltpu

NEG_SLOPE = 0.8  # LeakyReLU negative slope from the PyTorch module


# ---------------------------------------------------------------------------
# Fused kernel: conv1 + LReLU -> conv2 + LReLU -> MaxPool (one H-tile)
# ---------------------------------------------------------------------------
def _down_fused_kernel(x_ref, xh_ref, w1_ref, b1_ref, w2_ref, b2_ref, o_ref,
                       xp_sc, y1p_sc):
    # x_ref  : (1, TH, W, Cin)        main input rows   [t0, t0+TH)
    # xh_ref : (1, 1, 4, W, Cin)      halo rows {t0-2, t0-1, t0+TH, t0+TH+1},
    #                                  pre-zeroed on host where out of range
    # w1_ref : (9*Cin, Cout)          conv1 weight, im2col-flattened (dy,dx,ci)
    # b1_ref : (1, Cout)              f32
    # w2_ref : (9*Cout, Cout)
    # b2_ref : (1, Cout)              f32
    # o_ref  : (1, 1, TH//f, Wo*Cout) pooled, lane-flattened output tile
    # xp_sc  : VMEM (TH+4, W+2, Cin)  compute-dtype, col-padded conv1 input
    # y1p_sc : VMEM (TH+2, W+2, Cout) compute-dtype, col-padded conv2 input
    TH, W, Cin = x_ref.shape[1], x_ref.shape[2], x_ref.shape[3]
    Cout = w1_ref.shape[1]
    THo = o_ref.shape[2]
    f = TH // THo
    Wo = W // f
    cdt = xp_sc.dtype

    t = pl.program_id(1)
    n_t = pl.num_programs(1)

    # Re-zero only the 1-wide column halo ring each step (cheap; interior is
    # fully overwritten below).  Done every step (not hoisted to program 0)
    # so it stays correct when the grid is sharded across TensorCores.
    xp_sc[:, pl.ds(0, 1), :] = jnp.zeros((TH + 4, 1, Cin), cdt)
    xp_sc[:, pl.ds(W + 1, 1), :] = jnp.zeros((TH + 4, 1, Cin), cdt)
    y1p_sc[:, pl.ds(0, 1), :] = jnp.zeros((TH + 2, 1, Cout), cdt)
    y1p_sc[:, pl.ds(W + 1, 1), :] = jnp.zeros((TH + 2, 1, Cout), cdt)

    # Fill conv1's padded input (row halos come pre-zeroed from the host pad).
    xh = xh_ref[0, 0]                                             # (4, W, Cin)
    xp_sc[pl.ds(0, 2), pl.ds(1, W), :] = xh[0:2].astype(cdt)      # t0-2, t0-1
    xp_sc[pl.ds(2, TH), pl.ds(1, W), :] = x_ref[0].astype(cdt)    # t0..t0+TH-1
    xp_sc[pl.ds(TH + 2, 2), pl.ds(1, W), :] = xh[2:4].astype(cdt)  # t0+TH, +1

    def conv3x3_lrelu(padded, n_out, w, b):
        # padded: (n_out+2, W+2, C).  Materialize the 3 dx-shifted views once,
        # reuse them across dy via leading-axis slices; one K=9*C MXU call.
        cols = [padded[:, dx:dx + W, :] for dx in range(3)]       # (n_out+2,W,C)
        taps = [cols[dx][dy:dy + n_out] for dy in range(3) for dx in range(3)]
        patches = jnp.concatenate(taps, axis=-1)                  # (n_out,W,9C)
        y = jnp.einsum("hwk,ko->hwo", patches, w,
                       preferred_element_type=jnp.float32)        # f32 acc
        y = y + b.reshape(1, 1, -1)                               # f32 epilogue
        return jnp.maximum(y, NEG_SLOPE * y)                      # LeakyReLU

    # ---- conv1 over TH+2 rows (tile + recomputed 1-row halo for conv2) ----
    y1 = conv3x3_lrelu(xp_sc[...], TH + 2, w1_ref[...], b1_ref[...])
    y1p_sc[:, pl.ds(1, W), :] = y1.astype(cdt)

    # conv1 halo rows that fall outside the image are conv2 *padding* -> zero
    # them (conv1 of zeros is lrelu(bias), not zero).
    @pl.when(t == 0)
    def _():
        y1p_sc[pl.ds(0, 1), :, :] = jnp.zeros((1, W + 2, Cout), cdt)

    @pl.when(t == n_t - 1)
    def _():
        y1p_sc[pl.ds(TH + 1, 1), :, :] = jnp.zeros((1, W + 2, Cout), cdt)

    # ---- conv2 over the TH tile rows (intermediate stays in VMEM) ---------
    y2 = conv3x3_lrelu(y1p_sc[...], TH, w2_ref[...], b2_ref[...])

    # ---- fused MaxPool2d(f); lane-dense (Wo*Cout) store --------------------
    p = jnp.max(y2.reshape(THo, f, W, Cout), axis=1)
    p = jnp.max(p.reshape(THo, Wo, f, Cout), axis=2)
    o_ref[0, 0] = p.reshape(THo, Wo * Cout).astype(o_ref.dtype)


# ---------------------------------------------------------------------------
# VMEM budgeting (tile-padded sizes, generation-aware cap)
# ---------------------------------------------------------------------------
def _padded_bytes(shape, dtype):
    itemsize = jnp.dtype(dtype).itemsize
    shape = tuple(int(s) for s in shape)
    if len(shape) < 2:
        shape = (1,) * (2 - len(shape)) + shape
    *lead, s, l = shape
    sub = 8 if itemsize >= 4 else (16 if itemsize == 2 else 32)
    s_p = math.ceil(s / sub) * sub
    l_p = math.ceil(l / 128) * 128
    lead_prod = 1
    for d in lead:
        lead_prod *= d
    return lead_prod * s_p * l_p * itemsize


def _vmem_cap_bytes():
    # ~0.75 * physical VMEM (v5e/v6e: 128 MiB -> 96 MiB, v7x: 64 MiB -> 48 MiB).
    try:
        phys = int(pltpu.get_tpu_info().vmem_capacity_bytes)
    except Exception:
        phys = 64 << 20  # v7x-safe fallback
    return (phys * 3) // 4


def _kernel_vmem_bytes(TH, W, Cin, Cout, f, in_dtype, compute_dtype):
    THo, Wo = TH // f, W // f
    cd = compute_dtype
    f32 = jnp.float32
    pipelined = (  # double-buffered by the BlockSpec pipeline
        _padded_bytes((1, TH, W, Cin), in_dtype)
        + _padded_bytes((1, 1, 4, W, Cin), in_dtype)
        + _padded_bytes((1, 1, THo, Wo * Cout), in_dtype)
        + _padded_bytes((9 * Cin, Cout), cd)
        + _padded_bytes((9 * Cout, Cout), cd)
        + 2 * _padded_bytes((1, Cout), f32)
    )
    scratch = (_padded_bytes((TH + 4, W + 2, Cin), cd)
               + _padded_bytes((TH + 2, W + 2, Cout), cd))
    temps = (
        3 * _padded_bytes((TH + 4, W, Cin), cd)        # conv1 dx-views
        + _padded_bytes((TH + 2, W, 9 * Cin), cd)      # conv1 patches
        + _padded_bytes((TH + 2, W, Cout), f32)        # conv1 f32 output
        + 3 * _padded_bytes((TH + 2, W, Cout), cd)     # conv2 dx-views
        + _padded_bytes((TH, W, 9 * Cout), cd)         # conv2 patches
        + _padded_bytes((TH, W, Cout), f32)            # conv2 f32 output
    )
    return 2 * pipelined + scratch + temps


def _pick_tile_h(H, W, Cin, Cout, f, in_dtype, compute_dtype, vmem_cap):
    # Largest multiple of the pool factor that divides H and whose per-step
    # footprint fits ~1/3 of the VMEM cap (keeps double-buffering alive and
    # leaves headroom for megacore shards on v7x).
    target = vmem_cap // 3
    best = f
    th = f
    while th <= H:
        if H % th == 0 and _kernel_vmem_bytes(
                th, W, Cin, Cout, f, in_dtype, compute_dtype) <= target:
            best = th
        th += f
    return best


# ---------------------------------------------------------------------------
# Down.forward
# ---------------------------------------------------------------------------
def down_forward(x_nchw, params, downsample_factor=8,
                 compute_dtype=jnp.bfloat16, tile_h=None):
    N, Cin, H, W = x_nchw.shape
    Cout = params["w1"].shape[-1]
    f = downsample_factor
    # PyTorch MaxPool2d silently truncates non-divisible trailing rows/cols.
    # TODO(synk): support the truncating (non-divisible) MaxPool2d case.
    assert H % f == 0 and W % f == 0, (H, W, f)
    Ho, Wo = H // f, W // f

    vmem_cap = _vmem_cap_bytes()
    if tile_h is None:
        tile_h = _pick_tile_h(H, W, Cin, Cout, f, x_nchw.dtype, compute_dtype,
                              vmem_cap)
    assert tile_h % f == 0 and H % tile_h == 0, (tile_h, f, H)
    T = H // tile_h
    THo = tile_h // f

    x = jnp.transpose(x_nchw, (0, 2, 3, 1))                     # NCHW -> NHWC

    # Per-tile 2-row top/bottom halos, gathered from a zero-padded copy so the
    # boundary tiles get the conv zero-padding for free.
    xpad = jnp.pad(x, ((0, 0), (2, 2), (0, 0), (0, 0)))         # (N, H+4, W, C)
    halo_idx = (jnp.arange(T) * tile_h)[:, None] + jnp.asarray(
        [0, 1, tile_h + 2, tile_h + 3])[None, :]                # (T, 4)
    x_halo = jnp.take(xpad, halo_idx.reshape(-1), axis=1
                      ).reshape(N, T, 4, W, Cin)

    # im2col-ready weights (dy,dx,cin flattened to K); bf16 operands by default.
    w1 = params["w1"].reshape(9 * Cin, Cout).astype(compute_dtype)
    w2 = params["w2"].reshape(9 * Cout, Cout).astype(compute_dtype)
    b1 = params["b1"].reshape(1, Cout).astype(jnp.float32)
    b2 = params["b2"].reshape(1, Cout).astype(jnp.float32)

    vmem_need = _kernel_vmem_bytes(tile_h, W, Cin, Cout, f, x.dtype,
                                   compute_dtype)
    vmem_limit = int(min(max(vmem_need + (4 << 20), 16 << 20), vmem_cap))

    out = pl.pallas_call(
        _down_fused_kernel,
        out_shape=jax.ShapeDtypeStruct((N, T, THo, Wo * Cout), x.dtype),
        grid_spec=pltpu.PrefetchScalarGridSpec(
            num_scalar_prefetch=0,
            grid=(N, T),
            in_specs=[
                pl.BlockSpec((1, tile_h, W, Cin), lambda n, t: (n, t, 0, 0)),
                pl.BlockSpec((1, 1, 4, W, Cin), lambda n, t: (n, t, 0, 0, 0)),
                pl.BlockSpec((9 * Cin, Cout), lambda n, t: (0, 0)),
                pl.BlockSpec((1, Cout), lambda n, t: (0, 0)),
                pl.BlockSpec((9 * Cout, Cout), lambda n, t: (0, 0)),
                pl.BlockSpec((1, Cout), lambda n, t: (0, 0)),
            ],
            out_specs=pl.BlockSpec((1, 1, THo, Wo * Cout),
                                   lambda n, t: (n, t, 0, 0)),
            scratch_shapes=[
                pltpu.VMEM((tile_h + 4, W + 2, Cin), compute_dtype),
                pltpu.VMEM((tile_h + 2, W + 2, Cout), compute_dtype),
            ],
        ),
        compiler_params=pltpu.CompilerParams(
            dimension_semantics=("parallel", "parallel"),
            vmem_limit_bytes=vmem_limit,
        ),
    )(x, x_halo, w1, b1, w2, b2)

    out = out.reshape(N, Ho, Wo, Cout)                          # un-tile H
    return jnp.transpose(out, (0, 3, 1, 2))                     # NHWC -> NCHW


# ---------------------------------------------------------------------------
# Pure-JAX reference (for correctness check)
# ---------------------------------------------------------------------------
def down_reference(x_nchw, params, downsample_factor=8):
    def conv(x, w_hwio, b):
        w_oihw = jnp.transpose(w_hwio, (3, 2, 0, 1))
        y = lax.conv_general_dilated(
            x, w_oihw, window_strides=(1, 1), padding=((1, 1), (1, 1)),
            dimension_numbers=("NCHW", "OIHW", "NCHW"))
        y = y + b[None, :, None, None]
        return jnp.where(y >= 0, y, NEG_SLOPE * y)

    y = conv(x_nchw, params["w1"], params["b1"])
    y = conv(y, params["w2"], params["b2"])
    f = downsample_factor
    return lax.reduce_window(y, -jnp.inf, lax.max,
                             (1, 1, f, f), (1, 1, f, f), "VALID")


if __name__ == "__main__":
    # Small deterministic shapes consistent with the module.
    N, Cin, Cout, H, W = 2, 4, 8, 16, 16
    factor = 8

    key = jax.random.PRNGKey(0)
    k_x, k_w1, k_b1, k_w2, k_b2 = jax.random.split(key, 5)

    x = jax.random.normal(k_x, (N, Cin, H, W), dtype=jnp.float32)
    params = {
        "w1": 0.1 * jax.random.normal(k_w1, (3, 3, Cin, Cout), jnp.float32),
        "b1": 0.1 * jax.random.normal(k_b1, (Cout,), jnp.float32),
        "w2": 0.1 * jax.random.normal(k_w2, (3, 3, Cout, Cout), jnp.float32),
        "b2": 0.1 * jax.random.normal(k_b2, (Cout,), jnp.float32),
    }

    ref = jax.block_until_ready(down_reference(x, params, factor))

    # f32 path, auto tile (single H-tile): strict check.
    out = jax.block_until_ready(
        down_forward(x, params, factor, compute_dtype=jnp.float32))
    assert out.shape == (N, Cout, H // factor, W // factor), out.shape
    assert jnp.allclose(out, ref, rtol=1e-5, atol=1e-5), \
        float(jnp.max(jnp.abs(out - ref)))

    # f32 path, forced 2 H-tiles: exercises the halo / boundary-zero logic.
    out_t = jax.block_until_ready(
        down_forward(x, params, factor, compute_dtype=jnp.float32, tile_h=8))
    assert jnp.allclose(out_t, ref, rtol=1e-5, atol=1e-5), \
        float(jnp.max(jnp.abs(out_t - ref)))

    # Default bf16-operand path (f32 accumulation + f32 epilogue): tightened,
    # scale-relative tolerance.
    out_bf16 = jax.block_until_ready(down_forward(x, params, factor))
    rel_err = float(jnp.max(jnp.abs(out_bf16 - ref)) /
                    (jnp.max(jnp.abs(ref)) + 1e-6))
    assert rel_err < 5e-2, rel_err

    print("KERNEL_OK")
</pallas_src>

<mosaic_0001>
module attributes {stable_mosaic.version = 11 : i64} {
  func.func @_down_fused_kernel(%arg0: i32, %arg1: i32, %arg2: memref<1x16x16x4xf32, #tpu.memory_space<vmem>>, %arg3: memref<1x1x4x16x4xf32, #tpu.memory_space<vmem>>, %arg4: memref<36x8xf32, #tpu.memory_space<vmem>>, %arg5: memref<1x8xf32, #tpu.memory_space<vmem>>, %arg6: memref<72x8xf32, #tpu.memory_space<vmem>>, %arg7: memref<1x8xf32, #tpu.memory_space<vmem>>, %arg8: memref<1x1x2x16xf32, #tpu.memory_space<vmem>>, %arg9: memref<20x18x4xf32, #tpu.memory_space<vmem>>, %arg10: memref<18x18x8xf32, #tpu.memory_space<vmem>>) attributes {dimension_semantics = [#tpu.dimension_semantics<parallel>, #tpu.dimension_semantics<parallel>], iteration_bounds = array<i64: 2, 1>, scalar_prefetch = 0 : i64, scratch_operands = 2 : i64, tpu.core_type = #tpu.core_type<tc>, window_params = [{transform_indices = @transform_0, window_bounds = array<i64: 1, 16, 16, 4>}, {transform_indices = @transform_1, window_bounds = array<i64: 1, 1, 4, 16, 4>}, {pipeline_mode = #tpu.pipeline_mode<synchronous>, transform_indices = @transform_2, window_bounds = array<i64: 36, 8>}, {pipeline_mode = #tpu.pipeline_mode<synchronous>, transform_indices = @transform_3, window_bounds = array<i64: 1, 8>}, {pipeline_mode = #tpu.pipeline_mode<synchronous>, transform_indices = @transform_4, window_bounds = array<i64: 72, 8>}, {pipeline_mode = #tpu.pipeline_mode<synchronous>, transform_indices = @transform_5, window_bounds = array<i64: 1, 8>}, {transform_indices = @transform_6, window_bounds = array<i64: 1, 1, 2, 16>}]} {
    %cst = arith.constant 0.000000e+00 : f32
    %0 = vector.broadcast %cst : f32 to vector<20x1x4xf32>
    %c0 = arith.constant 0 : index
    %c0_0 = arith.constant 0 : index
    %c0_1 = arith.constant 0 : index
    %1 = vector.load %arg9[%c0, %c0_0, %c0_1] : memref<20x18x4xf32, #tpu.memory_space<vmem>>, vector<20x1x4xf32>
    tpu.vector_store %arg9[%c0, %c0_0, %c0_1], %0 {strides = array<i32>} : memref<20x18x4xf32, #tpu.memory_space<vmem>>, vector<20x1x4xf32>,
    %cst_2 = arith.constant 0.000000e+00 : f32
    %2 = vector.broadcast %cst_2 : f32 to vector<20x1x4xf32>
    %c0_3 = arith.constant 0 : index
    %c17 = arith.constant 17 : index
    %c0_4 = arith.constant 0 : index
    %3 = vector.load %arg9[%c0_3, %c17, %c0_4] : memref<20x18x4xf32, #tpu.memory_space<vmem>>, vector<20x1x4xf32>
    tpu.vector_store %arg9[%c0_3, %c17, %c0_4], %2 {strides = array<i32>} : memref<20x18x4xf32, #tpu.memory_space<vmem>>, vector<20x1x4xf32>,
    %cst_5 = arith.constant 0.000000e+00 : f32
    %4 = vector.broadcast %cst_5 : f32 to vector<18x1x8xf32>
    %c0_6 = arith.constant 0 : index
    %c0_7 = arith.constant 0 : index
    %c0_8 = arith.constant 0 : index
    %5 = vector.load %arg10[%c0_6, %c0_7, %c0_8] : memref<18x18x8xf32, #tpu.memory_space<vmem>>, vector<18x1x8xf32>
    tpu.vector_store %arg10[%c0_6, %c0_7, %c0_8], %4 {strides = array<i32>} : memref<18x18x8xf32, #tpu.memory_space<vmem>>, vector<18x1x8xf32>,
    %cst_9 = arith.constant 0.000000e+00 : f32
    %6 = vector.broadcast %cst_9 : f32 to vector<18x1x8xf32>
    %c0_10 = arith.constant 0 : index
    %c17_11 = arith.constant 17 : index
    %c0_12 = arith.constant 0 : index
    %7 = vector.load %arg10[%c0_10, %c17_11, %c0_12] : memref<18x18x8xf32, #tpu.memory_space<vmem>>, vector<18x1x8xf32>
    tpu.vector_store %arg10[%c0_10, %c17_11, %c0_12], %6 {strides = array<i32>} : memref<18x18x8xf32, #tpu.memory_space<vmem>>, vector<18x1x8xf32>,
    %c0_13 = arith.constant 0 : index
    %c0_14 = arith.constant 0 : index
    %c0_15 = arith.constant 0 : index
    %c0_16 = arith.constant 0 : index
    %c0_17 = arith.constant 0 : index
    %8 = vector.load %arg3[%c0_13, %c0_14, %c0_15, %c0_16, %c0_17] : memref<1x1x4x16x4xf32, #tpu.memory_space<vmem>>, vector<1x1x4x16x4xf32>
    %9 = vector.shape_cast %8 : vector<1x1x4x16x4xf32> to vector<4x16x4xf32>
    %10 = vector.extract_strided_slice %9 {offsets = [0, 0, 0], sizes = [2, 16, 4], strides = [1, 1, 1]} : vector<4x16x4xf32> to vector<2x16x4xf32>
    %c0_18 = arith.constant 0 : index
    %c1 = arith.constant 1 : index
    %c0_19 = arith.constant 0 : index
    %11 = vector.load %arg9[%c0_18, %c1, %c0_19] : memref<20x18x4xf32, #tpu.memory_space<vmem>>, vector<2x16x4xf32>
    tpu.vector_store %arg9[%c0_18, %c1, %c0_19], %10 {strides = array<i32>} : memref<20x18x4xf32, #tpu.memory_space<vmem>>, vector<2x16x4xf32>,
    %c0_20 = arith.constant 0 : index
    %c0_21 = arith.constant 0 : index
    %c0_22 = arith.constant 0 : index
    %c0_23 = arith.constant 0 : index
    %12 = vector.load %arg2[%c0_20, %c0_21, %c0_22, %c0_23] : memref<1x16x16x4xf32, #tpu.memory_space<vmem>>, vector<1x16x16x4xf32>
    %13 = vector.shape_cast %12 : vector<1x16x16x4xf32> to vector<16x16x4xf32>
    %c2 = arith.constant 2 : index
    %c1_24 = arith.constant 1 : index
    %c0_25 = arith.constant 0 : index
    %14 = vector.load %arg9[%c2, %c1_24, %c0_25] : memref<20x18x4xf32, #tpu.memory_space<vmem>>, vector<16x16x4xf32>
    tpu.vector_store %arg9[%c2, %c1_24, %c0_25], %13 {strides = array<i32>} : memref<20x18x4xf32, #tpu.memory_space<vmem>>, vector<16x16x4xf32>,
    %15 = vector.extract_strided_slice %9 {offsets = [2, 0, 0], sizes = [2, 16, 4], strides = [1, 1, 1]} : vector<4x16x4xf32> to vector<2x16x4xf32>
    %c18 = arith.constant 18 : index
    %c1_26 = arith.constant 1 : index
    %c0_27 = arith.constant 0 : index
    %16 = vector.load %arg9[%c18, %c1_26, %c0_27] : memref<20x18x4xf32, #tpu.memory_space<vmem>>, vector<2x16x4xf32>
    tpu.vector_store %arg9[%c18, %c1_26, %c0_27], %15 {strides = array<i32>} : memref<20x18x4xf32, #tpu.memory_space<vmem>>, vector<2x16x4xf32>,
    %c0_28 = arith.constant 0 : index
    %c0_29 = arith.constant 0 : index
    %c0_30 = arith.constant 0 : index
    %17 = vector.load %arg9[%c0_28, %c0_29, %c0_30] : memref<20x18x4xf32, #tpu.memory_space<vmem>>, vector<20x18x4xf32>
    %c0_31 = arith.constant 0 : index
    %c0_32 = arith.constant 0 : index
    %18 = vector.load %arg4[%c0_31, %c0_32] : memref<36x8xf32, #tpu.memory_space<vmem>>, vector<36x8xf32>
    %c0_33 = arith.constant 0 : index
    %c0_34 = arith.constant 0 : index
    %19 = vector.load %arg5[%c0_33, %c0_34] : memref<1x8xf32, #tpu.memory_space<vmem>>, vector<1x8xf32>
    %20 = vector.extract_strided_slice %17 {offsets = [0, 0, 0], sizes = [20, 16, 4], strides = [1, 1, 1]} : vector<20x18x4xf32> to vector<20x16x4xf32>
    %21 = vector.extract_strided_slice %17 {offsets = [0, 1, 0], sizes = [20, 16, 4], strides = [1, 1, 1]} : vector<20x18x4xf32> to vector<20x16x4xf32>
    %22 = vector.extract_strided_slice %17 {offsets = [0, 2, 0], sizes = [20, 16, 4], strides = [1, 1, 1]} : vector<20x18x4xf32> to vector<20x16x4xf32>
    %23 = vector.extract_strided_slice %20 {offsets = [0, 0, 0], sizes = [18, 16, 4], strides = [1, 1, 1]} : vector<20x16x4xf32> to vector<18x16x4xf32>
    %24 = vector.extract_strided_slice %21 {offsets = [0, 0, 0], sizes = [18, 16, 4], strides = [1, 1, 1]} : vector<20x16x4xf32> to vector<18x16x4xf32>
    %25 = vector.extract_strided_slice %22 {offsets = [0, 0, 0], sizes = [18, 16, 4], strides = [1, 1, 1]} : vector<20x16x4xf32> to vector<18x16x4xf32>
    %26 = vector.extract_strided_slice %20 {offsets = [1, 0, 0], sizes = [18, 16, 4], strides = [1, 1, 1]} : vector<20x16x4xf32> to vector<18x16x4xf32>
    %27 = vector.extract_strided_slice %21 {offsets = [1, 0, 0], sizes = [18, 16, 4], strides = [1, 1, 1]} : vector<20x16x4xf32> to vector<18x16x4xf32>
    %28 = vector.extract_strided_slice %22 {offsets = [1, 0, 0], sizes = [18, 16, 4], strides = [1, 1, 1]} : vector<20x16x4xf32> to vector<18x16x4xf32>
    %29 = vector.extract_strided_slice %20 {offsets = [2, 0, 0], sizes = [18, 16, 4], strides = [1, 1, 1]} : vector<20x16x4xf32> to vector<18x16x4xf32>
    %30 = vector.extract_strided_slice %21 {offsets = [2, 0, 0], sizes = [18, 16, 4], strides = [1, 1, 1]} : vector<20x16x4xf32> to vector<18x16x4xf32>
    %31 = vector.extract_strided_slice %22 {offsets = [2, 0, 0], sizes = [18, 16, 4], strides = [1, 1, 1]} : vector<20x16x4xf32> to vector<18x16x4xf32>
    %32 = tpu.concatenate %23, %24, %25, %26, %27, %28, %29, %30, %31 in 2 : vector<18x16x4xf32>, vector<18x16x4xf32>, vector<18x16x4xf32>, vector<18x16x4xf32>, vector<18x16x4xf32>, vector<18x16x4xf32>, vector<18x16x4xf32>, vector<18x16x4xf32>, vector<18x16x4xf32> -> vector<18x16x36xf32>
    "tpu.trace_start"() <{level = 10 : i32, message = "hwk,ko->hwo"}> : () -> ()
    %cst_35 = arith.constant dense<0.000000e+00> : vector<18x16x8xf32>
    %33 = tpu.matmul %32, %18, %cst_35 {dimension_numbers = #tpu.dot_dimension_numbers<[2], [0], [0, 1], [1], [0, 0, 0, 1, 1, 1], [], []>} : vector<18x16x36xf32>, vector<36x8xf32>, vector<18x16x8xf32> -> vector<18x16x8xf32>
    "tpu.trace_stop"() : () -> ()
    %34 = vector.shape_cast %19 : vector<1x8xf32> to vector<1x1x8xf32>
    %35 = vector.broadcast %34 : vector<1x1x8xf32> to vector<18x16x8xf32>
    %36 = arith.addf %33, %35 : vector<18x16x8xf32>
    %cst_36 = arith.constant 8.000000e-01 : f32
    %37 = vector.broadcast %cst_36 : f32 to vector<18x16x8xf32>
    %38 = arith.mulf %37, %36 : vector<18x16x8xf32>
    %39 = arith.maximumf %36, %38 : vector<18x16x8xf32>
    %c0_37 = arith.constant 0 : index
    %c1_38 = arith.constant 1 : index
    %c0_39 = arith.constant 0 : index
    %40 = vector.load %arg10[%c0_37, %c1_38, %c0_39] : memref<18x18x8xf32, #tpu.memory_space<vmem>>, vector<18x16x8xf32>
    tpu.vector_store %arg10[%c0_37, %c1_38, %c0_39], %39 {strides = array<i32>} : memref<18x18x8xf32, #tpu.memory_space<vmem>>, vector<18x16x8xf32>,
    %c0_i32 = arith.constant 0 : i32
    %41 = arith.cmpi eq, %arg1, %c0_i32 : i32
    %42 = arith.extui %41 : i1 to i32
    %c0_i32_40 = arith.constant 0 : i32
    %43 = arith.cmpi ne, %42, %c0_i32_40 : i32
    scf.if %43 {
      %cst_58 = arith.constant 0.000000e+00 : f32
      %78 = vector.broadcast %cst_58 : f32 to vector<1x18x8xf32>
      %c0_59 = arith.constant 0 : index
      %c0_60 = arith.constant 0 : index
      %c0_61 = arith.constant 0 : index
      %79 = vector.load %arg10[%c0_59, %c0_60, %c0_61] : memref<18x18x8xf32, #tpu.memory_space<vmem>>, vector<1x18x8xf32>
      tpu.vector_store %arg10[%c0_59, %c0_60, %c0_61], %78 {strides = array<i32>} : memref<18x18x8xf32, #tpu.memory_space<vmem>>, vector<1x18x8xf32>,
    } else {
    }
    %c0_i32_41 = arith.constant 0 : i32
    %44 = arith.cmpi eq, %arg1, %c0_i32_41 : i32
    %45 = arith.extui %44 : i1 to i32
    %c0_i32_42 = arith.constant 0 : i32
    %46 = arith.cmpi ne, %45, %c0_i32_42 : i32
    scf.if %46 {
      %cst_58 = arith.constant 0.000000e+00 : f32
      %78 = vector.broadcast %cst_58 : f32 to vector<1x18x8xf32>
      %c17_59 = arith.constant 17 : index
      %c0_60 = arith.constant 0 : index
      %c0_61 = arith.constant 0 : index
      %79 = vector.load %arg10[%c17_59, %c0_60, %c0_61] : memref<18x18x8xf32, #tpu.memory_space<vmem>>, vector<1x18x8xf32>
      tpu.vector_store %arg10[%c17_59, %c0_60, %c0_61], %78 {strides = array<i32>} : memref<18x18x8xf32, #tpu.memory_space<vmem>>, vector<1x18x8xf32>,
    } else {
    }
    %c0_43 = arith.constant 0 : index
    %c0_44 = arith.constant 0 : index
    %c0_45 = arith.constant 0 : index
    %47 = vector.load %arg10[%c0_43, %c0_44, %c0_45] : memref<18x18x8xf32, #tpu.memory_space<vmem>>, vector<18x18x8xf32>
    %c0_46 = arith.constant 0 : index
    %c0_47 = arith.constant 0 : index
    %48 = vector.load %arg6[%c0_46, %c0_47] : memref<72x8xf32, #tpu.memory_space<vmem>>, vector<72x8xf32>
    %c0_48 = arith.constant 0 : index
    %c0_49 = arith.constant 0 : index
    %49 = vector.load %arg7[%c0_48, %c0_49] : memref<1x8xf32, #tpu.memory_space<vmem>>, vector<1x8xf32>
    %50 = vector.extract_strided_slice %47 {offsets = [0, 0, 0], sizes = [18, 16, 8], strides = [1, 1, 1]} : vector<18x18x8xf32> to vector<18x16x8xf32>
    %51 = vector.extract_strided_slice %47 {offsets = [0, 1, 0], sizes = [18, 16, 8], strides = [1, 1, 1]} : vector<18x18x8xf32> to vector<18x16x8xf32>
    %52 = vector.extract_strided_slice %47 {offsets = [0, 2, 0], sizes = [18, 16, 8], strides = [1, 1, 1]} : vector<18x18x8xf32> to vector<18x16x8xf32>
    %53 = vector.extract_strided_slice %50 {offsets = [0, 0, 0], sizes = [16, 16, 8], strides = [1, 1, 1]} : vector<18x16x8xf32> to vector<16x16x8xf32>
    %54 = vector.extract_strided_slice %51 {offsets = [0, 0, 0], sizes = [16, 16, 8], strides = [1, 1, 1]} : vector<18x16x8xf32> to vector<16x16x8xf32>
    %55 = vector.extract_strided_slice %52 {offsets = [0, 0, 0], sizes = [16, 16, 8], strides = [1, 1, 1]} : vector<18x16x8xf32> to vector<16x16x8xf32>
    %56 = vector.extract_strided_slice %50 {offsets = [1, 0, 0], sizes = [16, 16, 8], strides = [1, 1, 1]} : vector<18x16x8xf32> to vector<16x16x8xf32>
    %57 = vector.extract_strided_slice %51 {offsets = [1, 0, 0], sizes = [16, 16, 8], strides = [1, 1, 1]} : vector<18x16x8xf32> to vector<16x16x8xf32>
    %58 = vector.extract_strided_slice %52 {offsets = [1, 0, 0], sizes = [16, 16, 8], strides = [1, 1, 1]} : vector<18x16x8xf32> to vector<16x16x8xf32>
    %59 = vector.extract_strided_slice %50 {offsets = [2, 0, 0], sizes = [16, 16, 8], strides = [1, 1, 1]} : vector<18x16x8xf32> to vector<16x16x8xf32>
    %60 = vector.extract_strided_slice %51 {offsets = [2, 0, 0], sizes = [16, 16, 8], strides = [1, 1, 1]} : vector<18x16x8xf32> to vector<16x16x8xf32>
    %61 = vector.extract_strided_slice %52 {offsets = [2, 0, 0], sizes = [16, 16, 8], strides = [1, 1, 1]} : vector<18x16x8xf32> to vector<16x16x8xf32>
    %62 = tpu.concatenate %53, %54, %55, %56, %57, %58, %59, %60, %61 in 2 : vector<16x16x8xf32>, vector<16x16x8xf32>, vector<16x16x8xf32>, vector<16x16x8xf32>, vector<16x16x8xf32>, vector<16x16x8xf32>, vector<16x16x8xf32>, vector<16x16x8xf32>, vector<16x16x8xf32> -> vector<16x16x72xf32>
    "tpu.trace_start"() <{level = 10 : i32, message = "hwk,ko->hwo"}> : () -> ()
    %cst_50 = arith.constant dense<0.000000e+00> : vector<16x16x8xf32>
    %63 = tpu.matmul %62, %48, %cst_50 {dimension_numbers = #tpu.dot_dimension_numbers<[2], [0], [0, 1], [1], [0, 0, 0, 1, 1, 1], [], []>} : vector<16x16x72xf32>, vector<72x8xf32>, vector<16x16x8xf32> -> vector<16x16x8xf32>
    "tpu.trace_stop"() : () -> ()
    %64 = vector.shape_cast %49 : vector<1x8xf32> to vector<1x1x8xf32>
    %65 = vector.broadcast %64 : vector<1x1x8xf32> to vector<16x16x8xf32>
    %66 = arith.addf %63, %65 : vector<16x16x8xf32>
    %cst_51 = arith.constant 8.000000e-01 : f32
    %67 = vector.broadcast %cst_51 : f32 to vector<16x16x8xf32>
    %68 = arith.mulf %67, %66 : vector<16x16x8xf32>
    %69 = arith.maximumf %66, %68 : vector<16x16x8xf32>
    %70 = vector.shape_cast %69 : vector<16x16x8xf32> to vector<2x8x16x8xf32>
    %cst_52 = arith.constant dense<0xFF800000> : vector<2x16x8xf32>
    %71 = vector.multi_reduction <maximumf>, %70, %cst_52 [1] : vector<2x8x16x8xf32> to vector<2x16x8xf32>
    %72 = vector.shape_cast %71 : vector<2x16x8xf32> to vector<2x2x8x8xf32>
    %cst_53 = arith.constant dense<0xFF800000> : vector<2x2x8xf32>
    %73 = vector.multi_reduction <maximumf>, %72, %cst_53 [2] : vector<2x2x8x8xf32> to vector<2x2x8xf32>
    %74 = vector.shape_cast %73 : vector<2x2x8xf32> to vector<2x16xf32>
    %c0_54 = arith.constant 0 : index
    %c0_55 = arith.constant 0 : index
    %c0_56 = arith.constant 0 : index
    %c0_57 = arith.constant 0 : index
    %75 = vector.load %arg8[%c0_54, %c0_55, %c0_56, %c0_57] : memref<1x1x2x16xf32, #tpu.memory_space<vmem>>, vector<1x1x2x16xf32>
    %76 = vector.shape_cast %75 : vector<1x1x2x16xf32> to vector<2x16xf32>
    %77 = vector.shape_cast %74 : vector<2x16xf32> to vector<1x1x2x16xf32>
    tpu.vector_store %arg8[%c0_54, %c0_55, %c0_56, %c0_57], %77 {strides = array<i32>} : memref<1x1x2x16xf32, #tpu.memory_space<vmem>>, vector<1x1x2x16xf32>,
    return
  }
  func.func @transform_0(%arg0: i32, %arg1: i32) -> (i32, i32, i32, i32) {
    %c0_i32 = arith.constant 0 : i32
    %c0_i32_0 = arith.constant 0 : i32
    %c0_i32_1 = arith.constant 0 : i32
    return %arg0, %arg1, %c0_i32, %c0_i32_0 : i32, i32, i32, i32
  }
  func.func @transform_1(%arg0: i32, %arg1: i32) -> (i32, i32, i32, i32, i32) {
    %c0_i32 = arith.constant 0 : i32
    %c0_i32_0 = arith.constant 0 : i32
    %c0_i32_1 = arith.constant 0 : i32
    %c0_i32_2 = arith.constant 0 : i32
    return %arg0, %arg1, %c0_i32, %c0_i32_0, %c0_i32_1 : i32, i32, i32, i32, i32
  }
  func.func @transform_2(%arg0: i32, %arg1: i32) -> (i32, i32) {
    %c0_i32 = arith.constant 0 : i32
    %c0_i32_0 = arith.constant 0 : i32
    %c0_i32_1 = arith.constant 0 : i32
    return %c0_i32, %c0_i32_0 : i32, i32
  }
  func.func @transform_3(%arg0: i32, %arg1: i32) -> (i32, i32) {
    %c0_i32 = arith.constant 0 : i32
    %c0_i32_0 = arith.constant 0 : i32
    %c0_i32_1 = arith.constant 0 : i32
    return %c0_i32, %c0_i32_0 : i32, i32
  }
  func.func @transform_4(%arg0: i32, %arg1: i32) -> (i32, i32) {
    %c0_i32 = arith.constant 0 : i32
    %c0_i32_0 = arith.constant 0 : i32
    %c0_i32_1 = arith.constant 0 : i32
    return %c0_i32, %c0_i32_0 : i32, i32
  }
  func.func @transform_5(%arg0: i32, %arg1: i32) -> (i32, i32) {
    %c0_i32 = arith.constant 0 : i32
    %c0_i32_0 = arith.constant 0 : i32
    %c0_i32_1 = arith.constant 0 : i32
    return %c0_i32, %c0_i32_0 : i32, i32
  }
  func.func @transform_6(%arg0: i32, %arg1: i32) -> (i32, i32, i32, i32) {
    %c0_i32 = arith.constant 0 : i32
    %c0_i32_0 = arith.constant 0 : i32
    %c0_i32_1 = arith.constant 0 : i32
    return %arg0, %arg1, %c0_i32, %c0_i32_0 : i32, i32, i32, i32
  }
}

</mosaic_0001>

<bundles_post_ra>
// kernel: tpu_custom_call.1
= control target key start
LH: loop header
LB: loop body
LE: loop exit
PB: predicated region body
PF: predicated region fallthrough
CT: control target
= control target key end

     0   :  { %11 = vsyncpa [#allocation5], 0  ;;  %s8879_s0 = inlined_call_operand.vmem [shape: f32[2,16,16,4], index: 0, kind: input, shape index: {}]   ;;  %s8880_s1 = inlined_call_operand.vmem [shape: f32[2,1,4,16,4], index: 1, kind: input, shape index: {}]   ;;  %s8881_s2 = inlined_call_operand.vmem [shape: f32[36,8], index: 2, kind: input, shape index: {}]   ;;  %s8882_s3 = inlined_call_operand.vmem [shape: f32[1,8], index: 3, kind: input, shape index: {}]   ;;  %s8883_s4 = inlined_call_operand.vmem [shape: f32[72,8], index: 4, kind: input, shape index: {}]   ;;  %s8884_s5 = inlined_call_operand.vmem [shape: f32[1,8], index: 5, kind: input, shape index: {}]   ;;  %s8885_s6 = inlined_call_operand.hbm [shape: f32[2,1,2,16], index: 6, kind: output, shape index: {}]  }
   0x1   :  { %13 = vsyncpa [#allocation5 + $0x1], 0  ;;  %s4989_s21 = smov 0   ;;  %s4991_s22 = smov 0  }
   0x2   :  { %s4993_s23 = smov 0   ;;  %s4995_s24 = smov 0  }
   0x3   :  { %s4997_s25 = smov 0   ;;  %s4999_s26 = smov 0  }
   0x4 LB: > { %s4393_s27 = sadd.s32 4294967295, %s4937_s26   ;;  %s4394_s28 = sadd.s32 4294967294, %s4937_s26   ;;  %s4937_s26 = sphi %s4999_s26, %s19_s26   ;;  %s4933_s25 = sphi %s4997_s25, %s9535_s25   ;;  %s4929_s24 = sphi %s4995_s24, %s9534_s24   ;;  %s4925_s23 = sphi %s4993_s23, %s9533_s23   ;;  %s4921_s22 = sphi %s4991_s22, %s9532_s22   ;;  %s4917_s21 = sphi %s4989_s21, %s9531_s21  }
   0x5   : > { %s31_s29 = sadd.s32 1, %s4933_s25  ;;  %s180_s30 = sadd.s32 1, %s4925_s23 }
   0x6   : > { %p33_p0 = scmp.ge.s32.totalorder %s31_s29, 2  ;;  %p190_p1 = scmp.ne.s32.totalorder %s4925_s23, %s4921_s22 }
   0x7   : > { %p191_p2 = scmp.eq.s32.totalorder %s4393_s27, 1  ;;  %p196_p3 = scmp.ne.s32.totalorder %s4921_s22, %s4917_s21 }
   0x8   : > { %s9537_s29 = smov (%p33_p0, %s31_s29), 0  ;;  %p197_p5 = scmp.eq.s32.totalorder %s4394_s28, 1 }
   0x9   : > { %p5029_p4 = por %p191_p2, %p190_p1  ;;  %s175_s8 = ssub.s32 %s4933_s25, %s9537_s29 }
   0xa   : > { %p4397_p6 = scmp.ge.s32.totalorder %s4937_s26, 1  ;;  %p178_p7 = scmp.eq.s32.totalorder %s175_s8, 0 }
   0xb   : > { %p5036_p8 = por %p197_p5, %p196_p3  ;;  %p253_p9 = scmp.lt.s32.totalorder %s4937_s26, 3 }
   0xc   : > { %s5042_s10 = scalar_select %p178_p7, %s4925_s23, %s180_s30  }
   0xd   : > { %p254_p10 = pnand %p4397_p6, %p253_p9 }
   0xf   : > { %257 = sbr.rel (%p254_p10) target bundleno = 1887 (0x75f), region = 44 }
  0x16   : > { %p298_p11 = scmp.lt.s32.totalorder %s4929_s24, 1  ;;  %vm317_vm0 = vcmask 24576   ;;  %v8886_v0 = vmov 0.0   ;;  %vm403_vm1 = vcmask 31744   ;;  %vm598_vm2 = vcmask 1046528   ;;  %s4940_s20 = smov 4  }
  0x17   : > { %319 = vst.msk [vmem:[#allocation2 + $0x18] sm:$0x1] %vm317_vm0, %v8886_v0  ;;  %318 = vst.msk [vmem:[#allocation2] sm:$0x1] %vm317_vm0, %v8886_v0  ;;  %vm797_vm3 = vcmask 1045504   ;;  %s4941_s27 = smov 8  }
  0x18   : > { %320 = vst.msk [vmem:[#allocation2 + $0x30] sm:$0x1] %vm317_vm0, %v8886_v0  ;;  %321 = vst.msk [vmem:[#allocation2 + $0x48] sm:$0x1] %vm317_vm0, %v8886_v0  ;;  %s299_s11 = scalar_select %p298_p11, %s4929_s24, 1  ;;  %vm2080_vm4 = vcmask 1043456  }
  0x19   : > { %322 = vst.msk [vmem:[#allocation2 + $0x60] sm:$0x1] %vm317_vm0, %v8886_v0  ;;  %323 = vst.msk [vmem:[#allocation2 + $0x78] sm:$0x1] %vm317_vm0, %v8886_v0  ;;  %s4942_s28 = smov 12   ;;  %s4943_s30 = smov 16  }
  0x1a   : > { %324 = vst.msk [vmem:[#allocation2 + $0x90] sm:$0x1] %vm317_vm0, %v8886_v0  ;;  %325 = vst.msk [vmem:[#allocation2 + $0xa8] sm:$0x1] %vm317_vm0, %v8886_v0  ;;  %s4479_s12 = sshll.u32 %s299_s11, 6  ;;  %s4478_s13 = sshll.u32 %s299_s11, 8 }
  0x1b   : > { %326 = vst.msk [vmem:[#allocation2 + $0xc0] sm:$0x1] %vm317_vm0, %v8886_v0  ;;  %327 = vst.msk [vmem:[#allocation2 + $0xd8] sm:$0x1] %vm317_vm0, %v8886_v0  ;;  %s5131_s16 = scalar_lea.vmem %s8880_s1, %s4479_s12  ;;  %s5136_s19 = scalar_lea.vmem %s8879_s0, %s4478_s13  ;;  %vm1706_vm5 = vcmask 64512   ;;  %vm1743_vm6 = vcmask 97280  }
  0x1c   : > { %328 = vst.msk [vmem:[#allocation2 + $0xf0] sm:$0x1] %vm317_vm0, %v8886_v0  ;;  %329 = vst.msk [vmem:[#allocation2 + $0x108] sm:$0x1] %vm317_vm0, %v8886_v0  ;;  %v397_v1 = vld [vmem:[%s5131_s16 + $0x10] sm:$0xff]  ;;  %v398_v2 = vld [vmem:[%s5131_s16 + $0x18] sm:$0xff] }
  0x1d   : > { %330 = vst.msk [vmem:[#allocation2 + $0x120] sm:$0x1] %vm317_vm0, %v8886_v0  ;;  %331 = vst.msk [vmem:[#allocation2 + $0x138] sm:$0x1] %vm317_vm0, %v8886_v0  ;;  %v395_v3 = vld [vmem:[%s5131_s16] sm:$0xff]  ;;  %v396_v4 = vld [vmem:[%s5131_s16 + $0x8] sm:$0xff] }
  0x1e   : > { %332 = vst.msk [vmem:[#allocation2 + $0x150] sm:$0x1] %vm317_vm0, %v8886_v0  ;;  %333 = vst.msk [vmem:[#allocation2 + $0x168] sm:$0x1] %vm317_vm0, %v8886_v0  ;;  %v408_v5 = vld [vmem:[%s5136_s19] sm:$0xff]  ;;  %v409_v6 = vld [vmem:[%s5136_s19 + $0x8] sm:$0xff] }
  0x1f   : > { %334 = vst.msk [vmem:[#allocation2 + $0x180] sm:$0x1] %vm317_vm0, %v8886_v0  ;;  %335 = vst.msk [vmem:[#allocation2 + $0x198] sm:$0x1] %vm317_vm0, %v8886_v0  ;;  %v410_v7 = vld [vmem:[%s5136_s19 + $0x10] sm:$0xff]  ;;  %v411_v8 = vld [vmem:[%s5136_s19 + $0x18] sm:$0xff] }
  0x20   : > { %336 = vst.msk [vmem:[#allocation2 + $0x1b0] sm:$0x1] %vm317_vm0, %v8886_v0  ;;  %337 = vst.msk [vmem:[#allocation2 + $0x1c8] sm:$0x1] %vm317_vm0, %v8886_v0  ;;  %v412_v9 = vld [vmem:[%s5136_s19 + $0x20] sm:$0xff]  ;;  %v413_v10 = vld [vmem:[%s5136_s19 + $0x28] sm:$0xff] }
  0x21   : > { %338 = vst.msk [vmem:[#allocation2 + $0x11] sm:$0x1] %vm317_vm0, %v8886_v0  ;;  %339 = vst.msk [vmem:[#allocation2 + $0x29] sm:$0x1] %vm317_vm0, %v8886_v0  ;;  %v414_v11 = vld [vmem:[%s5136_s19 + $0x30] sm:$0xff]  ;;  %v415_v12 = vld [vmem:[%s5136_s19 + $0x38] sm:$0xff] }
  0x22   : > { %340 = vst.msk [vmem:[#allocation2 + $0x41] sm:$0x1] %vm317_vm0, %v8886_v0  ;;  %341 = vst.msk [vmem:[#allocation2 + $0x59] sm:$0x1] %vm317_vm0, %v8886_v0  ;;  %v416_v13 = vld [vmem:[%s5136_s19 + $0x40] sm:$0xff]  ;;  %v417_v14 = vld [vmem:[%s5136_s19 + $0x48] sm:$0xff] }
  0x23   : > { %342 = vst.msk [vmem:[#allocation2 + $0x71] sm:$0x1] %vm317_vm0, %v8886_v0  ;;  %343 = vst.msk [vmem:[#allocation2 + $0x89] sm:$0x1] %vm317_vm0, %v8886_v0  ;;  %v418_v15 = vld [vmem:[%s5136_s19 + $0x50] sm:$0xff]  ;;  %v419_v16 = vld [vmem:[%s5136_s19 + $0x58] sm:$0xff] }
  0x24   : > { %344 = vst.msk [vmem:[#allocation2 + $0xa1] sm:$0x1] %vm317_vm0, %v8886_v0  ;;  %345 = vst.msk [vmem:[#allocation2 + $0xb9] sm:$0x1] %vm317_vm0, %v8886_v0  ;;  %v420_v17 = vld [vmem:[%s5136_s19 + $0x60] sm:$0xff]  ;;  %v421_v18 = vld [vmem:[%s5136_s19 + $0x68] sm:$0xff] }
  0x25   : > { %346 = vst.msk [vmem:[#allocation2 + $0xd1] sm:$0x1] %vm317_vm0, %v8886_v0  ;;  %347 = vst.msk [vmem:[#allocation2 + $0xe9] sm:$0x1] %vm317_vm0, %v8886_v0  ;;  %v422_v19 = vld [vmem:[%s5136_s19 + $0x70] sm:$0xff]  ;;  %v423_v20 = vld [vmem:[%s5136_s19 + $0x78] sm:$0xff] }
  0x26   : > { %348 = vst.msk [vmem:[#allocation2 + $0x101] sm:$0x1] %vm317_vm0, %v8886_v0  ;;  %349 = vst.msk [vmem:[#allocation2 + $0x119] sm:$0x1] %vm317_vm0, %v8886_v0  ;;  %v424_v21 = vld [vmem:[%s5136_s19 + $0x80] sm:$0xff]  ;;  %v425_v22 = vld [vmem:[%s5136_s19 + $0x88] sm:$0xff] }
  0x27   : > { %350 = vst.msk [vmem:[#allocation2 + $0x131] sm:$0x1] %vm317_vm0, %v8886_v0  ;;  %351 = vst.msk [vmem:[#allocation2 + $0x149] sm:$0x1] %vm317_vm0, %v8886_v0  ;;  %v426_v23 = vld [vmem:[%s5136_s19 + $0x90] sm:$0xff]  ;;  %v427_v24 = vld [vmem:[%s5136_s19 + $0x98] sm:$0xff] }
  0x28   : > { %352 = vst.msk [vmem:[#allocation2 + $0x161] sm:$0x1] %vm317_vm0, %v8886_v0  ;;  %353 = vst.msk [vmem:[#allocation2 + $0x179] sm:$0x1] %vm317_vm0, %v8886_v0  ;;  %s4944_s8 = smov 20   ;;  %s4945_s11 = smov 24  }
  0x29   : > { %354 = vst.msk [vmem:[#allocation2 + $0x191] sm:$0x1] %vm317_vm0, %v8886_v0  ;;  %355 = vst.msk [vmem:[#allocation2 + $0x1a9] sm:$0x1] %vm317_vm0, %v8886_v0  ;;  %s4947_s12 = smov 32   ;;  %vm1780_vm7 = vcmask 130048  }
  0x2a   : > { %356 = vst.msk [vmem:[#allocation2 + $0x1c1] sm:$0x1] %vm317_vm0, %v8886_v0  ;;  %357 = vst.msk [vmem:[#allocation2 + $0x1d9] sm:$0x1] %vm317_vm0, %v8886_v0  ;;  %vm1817_vm8 = vcmask 162816   ;;  %vm1854_vm9 = vcmask 195584  }
  0x2b   : > { %406 = vst.msk [vmem:[#allocation2 + $0x19] sm:$0xff] %vm403_vm1, %v397_v1  ;;  %407 = vst.msk [vmem:[#allocation2 + $0x21] sm:$0xff] %vm403_vm1, %v398_v2  ;;  %v428_v1 = vld [vmem:[%s5136_s19 + $0xa0] sm:$0xff]  ;;  %v429_v2 = vld [vmem:[%s5136_s19 + $0xa8] sm:$0xff]  ;;  %vm1891_vm10 = vcmask 228352   ;;  %vm1928_vm11 = vcmask 261120  }
  0x2c   : > { %404 = vst.msk [vmem:[#allocation2 + $0x1] sm:$0xff] %vm403_vm1, %v395_v3  ;;  %405 = vst.msk [vmem:[#allocation2 + $0x9] sm:$0xff] %vm403_vm1, %v396_v4  ;;  %vm1971_vm12 = vcmask 293888   ;;  %vm358_vm13 = vcmask 57344   ;;  %vm2443_vm14 = vcmask 58368   ;;  %s4949_s18 = smov 48  }
  0x2d   : > { %441 = vst.msk [vmem:[#allocation2 + $0x31] sm:$0xff] %vm403_vm1, %v408_v5  ;;  %442 = vst.msk [vmem:[#allocation2 + $0x39] sm:$0xff] %vm403_vm1, %v409_v6  ;;  %v430_v5 = vld [vmem:[%s5136_s19 + $0xb0] sm:$0xff]  ;;  %v431_v6 = vld [vmem:[%s5136_s19 + $0xb8] sm:$0xff]  ;;  %s4950_s13 = smov 56   ;;  %s4951_s17 = smov 64  }
  0x2e   : > { %443 = vst.msk [vmem:[#allocation2 + $0x49] sm:$0xff] %vm403_vm1, %v410_v7  ;;  %444 = vst.msk [vmem:[#allocation2 + $0x51] sm:$0xff] %vm403_vm1, %v411_v8  ;;  %v432_v7 = vld [vmem:[%s5136_s19 + $0xc0] sm:$0xff]  ;;  %v433_v8 = vld [vmem:[%s5136_s19 + $0xc8] sm:$0xff]  ;;  %vm3643_vm15 = vcmask 326656   ;;  %vm3676_vm0 = vcmask 392192  }
  0x2f   : > { %445 = vst.msk [vmem:[#allocation2 + $0x61] sm:$0xff] %vm403_vm1, %v412_v9  ;;  %446 = vst.msk [vmem:[#allocation2 + $0x69] sm:$0xff] %vm403_vm1, %v413_v10  ;;  %v434_v9 = vld [vmem:[%s5136_s19 + $0xd0] sm:$0xff]  ;;  %v435_v10 = vld [vmem:[%s5136_s19 + $0xd8] sm:$0xff] }
  0x30   : > { %447 = vst.msk [vmem:[#allocation2 + $0x79] sm:$0xff] %vm403_vm1, %v414_v11  ;;  %448 = vst.msk [vmem:[#allocation2 + $0x81] sm:$0xff] %vm403_vm1, %v415_v12  ;;  %v436_v11 = vld [vmem:[%s5136_s19 + $0xe0] sm:$0xff]  ;;  %v437_v12 = vld [vmem:[%s5136_s19 + $0xe8] sm:$0xff] }
  0x31   : > { %449 = vst.msk [vmem:[#allocation2 + $0x91] sm:$0xff] %vm403_vm1, %v416_v13  ;;  %450 = vst.msk [vmem:[#allocation2 + $0x99] sm:$0xff] %vm403_vm1, %v417_v14  ;;  %v438_v13 = vld [vmem:[%s5136_s19 + $0xf0] sm:$0xff] }
  0x32   : > { %451 = vst.msk [vmem:[#allocation2 + $0xa9] sm:$0xff] %vm403_vm1, %v418_v15  ;;  %452 = vst.msk [vmem:[#allocation2 + $0xb1] sm:$0xff] %vm403_vm1, %v419_v16  ;;  %v5183_v25 = vld [vmem:[#allocation2 + $0x18] sm:$0xff]  ;;  %v5185_v26 = vld [vmem:[#allocation2 + $0x20] sm:$0xff] }
  0x33   : > { %453 = vst.msk [vmem:[#allocation2 + $0xc1] sm:$0xff] %vm403_vm1, %v420_v17  ;;  %454 = vst.msk [vmem:[#allocation2 + $0xc9] sm:$0xff] %vm403_vm1, %v421_v18  ;;  %v5187_v27 = vld [vmem:[#allocation2] sm:$0xff]  ;;  %v604_v28 = vrot.slane %v5183_v25, 1  ;;  %v605_v29 = vrot.slane %v5185_v26, 1  ;;  %v5194_v30 = vld [vmem:[#allocation2 + $0x8] sm:$0xff] }
  0x34   : > { %455 = vst.msk [vmem:[#allocation2 + $0xd9] sm:$0xff] %vm403_vm1, %v422_v19  ;;  %456 = vst.msk [vmem:[#allocation2 + $0xe1] sm:$0xff] %vm403_vm1, %v423_v20  ;;  %v599_v31 = vrot.slane %v5187_v27, 1  ;;  %v5197_v32 = vld [vmem:[#allocation2 + $0x28] sm:$0x3]  ;;  %v600_v33 = vrot.slane %v5194_v30, 1 }
  0x35   : > { %457 = vst.msk [vmem:[#allocation2 + $0xf1] sm:$0xff] %vm403_vm1, %v424_v21  ;;  %458 = vst.msk [vmem:[#allocation2 + $0xf9] sm:$0xff] %vm403_vm1, %v425_v22  ;;  %v607_v34 = vrot.slane %v5197_v32, 1  ;;  %v5201_v35 = vld [vmem:[#allocation2 + $0x10] sm:$0x3]  ;;  %v5203_v36 = vld [vmem:[#allocation2 + $0x38] sm:$0xff]  ;;  %v5206_v37 = vsel %vm598_vm2, %v604_v28, %v605_v29 }
  0x36   : > { %459 = vst.msk [vmem:[#allocation2 + $0x109] sm:$0xff] %vm403_vm1, %v426_v23  ;;  %460 = vst.msk [vmem:[#allocation2 + $0x111] sm:$0xff] %vm403_vm1, %v427_v24  ;;  %v602_v38 = vrot.slane %v5201_v35, 1  ;;  %v5209_v39 = vld [vmem:[#allocation2 + $0x40] sm:$0x3]  ;;  %v5211_v40 = vld [vmem:[#allocation2 + $0x30] sm:$0xff]  ;;  %693 = vrot.lane.b32.xlu1 %v5206_v37, %s4940_s20  ;;  %v601_v41 = vsel %vm598_vm2, %v599_v31, %v600_v33 }
  0x37   : > { %9029 = vst [vmem:[#allocation7_spill] sm:$0xff] %v5206_v37  ;;  %689 = vrot.lane.b32.xlu0 %v601_v41, %s4940_s20  ;;  %v5218_v42 = vsel %vm598_vm2, %v605_v29, %v607_v34  ;;  %v610_v43 = vrot.slane %v5203_v36, 1  ;;  %v612_v44 = vrot.slane %v5209_v39, 1  ;;  %v609_v46 = vrot.slane %v5211_v40, 1  ;;  %v5224_v47 = vld [vmem:[#allocation2 + $0x50] sm:$0xff]  ;;  %v5228_v49 = vld [vmem:[#allocation2 + $0x48] sm:$0xff] }
  0x38   : > { %9030 = vst [vmem:[#allocation8_spill] sm:$0xff] %v5218_v42  ;;  %v603_v45 = vsel %vm598_vm2, %v600_v33, %v602_v38  ;;  %v5226_v48 = vld [vmem:[#allocation2 + $0x58] sm:$0x3]  ;;  %v615_v51 = vrot.slane %v5224_v47, 1  ;;  %v614_v54 = vrot.slane %v5228_v49, 1  ;;  %v5242_v55 = vld [vmem:[#allocation2 + $0x68] sm:$0xff] }
  0x39   : > { %v5234_v50 = vsel %vm598_vm2, %v610_v43, %v612_v44  ;;  %v617_v52 = vrot.slane %v5226_v48, 1  ;;  %v5239_v53 = vsel %vm598_vm2, %v609_v46, %v610_v43  ;;  %v5244_v56 = vld [vmem:[#allocation2 + $0x70] sm:$0x3]  ;;  %v5246_v57 = vld [vmem:[#allocation2 + $0x60] sm:$0xff]  ;;  %v5252_v59 = vld [vmem:[#allocation2 + $0x88] sm:$0x3] }
  0x3a   : > { %695 = vrot.lane.b32.xlu1 %v5218_v42, %s4940_s20  ;;  %9031 = vst [vmem:[#allocation9_spill] sm:$0xff] %v5234_v50  ;;  %9032 = vst [vmem:[#allocation10_spill] sm:$0xff] %v5239_v53  ;;  %v5250_v58 = vld [vmem:[#allocation2 + $0x80] sm:$0xff]  ;;  %v620_v61 = vrot.slane %v5242_v55, 1  ;;  %v622_v62 = vrot.slane %v5244_v56, 1  ;;  %v5261_v63 = vld [vmem:[#allocation2 + $0x78] sm:$0xff]  ;;  %v5266_v3 = vsel %vm598_vm2, %v614_v54, %v615_v51 }
  0x3b   : > { %691 = vrot.lane.b32.xlu0 %v603_v45, %s4940_s20  ;;  %v5257_v60 = vsel %vm598_vm2, %v615_v51, %v617_v52  ;;  %9034 = vst [vmem:[#allocation12_spill] sm:$0xff] %v5266_v3  ;;  %v619_v4 = vrot.slane %v5246_v57, 1  ;;  %461 = vst.msk [vmem:[#allocation2 + $0x121] sm:$0xff] %vm403_vm1, %v428_v1  ;;  %v625_v15 = vrot.slane %v5250_v58, 1  ;;  %v627_v16 = vrot.slane %v5252_v59, 1  ;;  %v439_v17 = vld [vmem:[%s5136_s19 + $0xf8] sm:$0xff] }
  0x3c   : > { %9033 = vst [vmem:[#allocation11_spill] sm:$0xff] %v5257_v60  ;;  %462 = vst.msk [vmem:[#allocation2 + $0x129] sm:$0xff] %vm403_vm1, %v429_v2  ;;  %v5291_v14 = vsel %vm598_vm2, %v620_v61, %v622_v62  ;;  %v624_v19 = vrot.slane %v5261_v63, 1  ;;  %v5303_v20 = vld [vmem:[#allocation2 + $0x98] sm:$0xff]  ;;  %v5305_v21 = vld [vmem:[#allocation2 + $0xa0] sm:$0x3] }
  0x3d   : > { %463 = vst.msk [vmem:[#allocation2 + $0x139] sm:$0xff] %vm403_vm1, %v430_v5  ;;  %464 = vst.msk [vmem:[#allocation2 + $0x141] sm:$0xff] %vm403_vm1, %v431_v6  ;;  %v5300_v18 = vsel %vm598_vm2, %v619_v4, %v620_v61  ;;  %v5308_v22 = vld [vmem:[#allocation2 + $0x90] sm:$0xff]  ;;  %v5315_v23 = vsel %vm598_vm2, %v625_v15, %v627_v16  ;;  %v630_v24 = vrot.slane %v5303_v20, 1  ;;  %v632_v28 = vrot.slane %v5305_v21, 1  ;;  %v5327_v38 = vld [vmem:[#allocation2 + $0xa8] sm:$0xff] }
  0x3e   : > { %699 = vrot.lane.b32.xlu1 %v5234_v50, %s4940_s20  ;;  %465 = vst.msk [vmem:[#allocation2 + $0x151] sm:$0xff] %vm403_vm1, %v432_v7  ;;  %466 = vst.msk [vmem:[#allocation2 + $0x159] sm:$0xff] %vm403_vm1, %v433_v8  ;;  %v5320_v29 = vsel %vm598_vm2, %v624_v19, %v625_v15  ;;  %v629_v31 = vrot.slane %v5308_v22, 1  ;;  %v5323_v33 = vld [vmem:[#allocation2 + $0xb0] sm:$0xff]  ;;  %v5325_v34 = vld [vmem:[#allocation2 + $0xb8] sm:$0x3] }
  0x3f   : > { %697 = vrot.lane.b32.xlu0 %v5239_v53, %s4940_s20  ;;  %467 = vst.msk [vmem:[#allocation2 + $0x169] sm:$0xff] %vm403_vm1, %v434_v9  ;;  %468 = vst.msk [vmem:[#allocation2 + $0x171] sm:$0xff] %vm403_vm1, %v435_v10  ;;  %v5334_v41 = vsel %vm598_vm2, %v630_v24, %v632_v28  ;;  %v635_v43 = vrot.slane %v5323_v33, 1  ;;  %v637_v44 = vrot.slane %v5325_v34, 1  ;;  %v634_v46 = vrot.slane %v5327_v38, 1  ;;  %v5342_v51 = vld [vmem:[#allocation2 + $0xc8] sm:$0xff] }
  0x40   : > { %9035 = vst [vmem:[#allocation13_spill] sm:$0xff] %v5291_v14  ;;  %469 = vst.msk [vmem:[#allocation2 + $0x181] sm:$0xff] %vm403_vm1, %v436_v11  ;;  %v5339_v45 = vsel %vm598_vm2, %v629_v31, %v630_v24  ;;  %v5344_v52 = vld [vmem:[#allocation2 + $0xd0] sm:$0x3]  ;;  %v5346_v54 = vld [vmem:[#allocation2 + $0xc0] sm:$0xff]  ;;  %v640_v62 = vrot.slane %v5342_v51, 1 }
  0x41   : > { %470 = vst.msk [vmem:[#allocation2 + $0x189] sm:$0xff] %vm403_vm1, %v437_v12  ;;  %471 = vst.msk [vmem:[#allocation2 + $0x199] sm:$0xff] %vm403_vm1, %v438_v13  ;;  %v5353_v61 = vsel %vm598_vm2, %v635_v43, %v637_v44  ;;  %v642_v1 = vrot.slane %v5344_v52, 1  ;;  %v5358_v2 = vsel %vm598_vm2, %v634_v46, %v635_v43  ;;  %v639_v4 = vrot.slane %v5346_v54, 1  ;;  %v5361_v5 = vld [vmem:[#allocation2 + $0xe0] sm:$0xff]  ;;  %v5365_v7 = vld [vmem:[#allocation2 + $0xd8] sm:$0xff] }
  0x42   : > { %703 = vrot.lane.b32.xlu1 %v5257_v60, %s4940_s20  ;;  %9036 = vst [vmem:[#allocation14_spill] sm:$0xff] %v5300_v18  ;;  %472 = vst.msk [vmem:[#allocation2 + $0x1a1] sm:$0xff] %vm403_vm1, %v439_v17  ;;  %v5363_v6 = vld [vmem:[#allocation2 + $0xe8] sm:$0x3]  ;;  %v645_v9 = vrot.slane %v5361_v5, 1  ;;  %v644_v12 = vrot.slane %v5365_v7, 1 }
  0x43   : > { %701 = vrot.lane.b32.xlu0 %v5266_v3, %s4940_s20  ;;  %9037 = vst [vmem:[#allocation15_spill] sm:$0xff] %v5315_v23  ;;  %9038 = vst [vmem:[#allocation16_spill] sm:$0xff] %v5320_v29  ;;  %v5372_v8 = vsel %vm598_vm2, %v640_v62, %v642_v1  ;;  %v647_v10 = vrot.slane %v5363_v6, 1  ;;  %v5377_v11 = vsel %vm598_vm2, %v639_v4, %v640_v62  ;;  %v5380_v13 = vld [vmem:[#allocation2 + $0xf8] sm:$0xff]  ;;  %v5382_v15 = vld [vmem:[#allocation2 + $0x100] sm:$0x3] }
  0x44   : > { %9039 = vst [vmem:[#allocation17_spill] sm:$0xff] %v5334_v41  ;;  %9040 = vst [vmem:[#allocation18_spill] sm:$0xff] %v5339_v45  ;;  %v5384_v16 = vld [vmem:[#allocation2 + $0xf0] sm:$0xff]  ;;  %v650_v19 = vrot.slane %v5380_v13, 1  ;;  %v652_v24 = vrot.slane %v5382_v15, 1  ;;  %v5396_v28 = vsel %vm598_vm2, %v644_v12, %v645_v9  ;;  %v5403_v46 = vld [vmem:[#allocation2 + $0x108] sm:$0xff] }
  0x45   : > { %9041 = vst [vmem:[#allocation19_spill] sm:$0xff] %v5353_v61  ;;  %9042 = vst [vmem:[#allocation20_spill] sm:$0xff] %v5358_v2  ;;  %v5391_v17 = vsel %vm598_vm2, %v645_v9, %v647_v10  ;;  %v649_v31 = vrot.slane %v5384_v16, 1  ;;  %v5399_v43 = vld [vmem:[#allocation2 + $0x110] sm:$0xff]  ;;  %v5401_v44 = vld [vmem:[#allocation2 + $0x118] sm:$0x3] }
  0x46   : > { %707 = vrot.lane.b32.xlu1 %v5291_v14, %s4940_s20  ;;  %9043 = vst [vmem:[#allocation21_spill] sm:$0xff] %v5372_v8  ;;  %9044 = vst [vmem:[#allocation22_spill] sm:$0xff] %v5377_v11  ;;  %v5410_v62 = vsel %vm598_vm2, %v650_v19, %v652_v24  ;;  %v655_v1 = vrot.slane %v5399_v43, 1  ;;  %v657_v4 = vrot.slane %v5401_v44, 1  ;;  %v654_v10 = vrot.slane %v5403_v46, 1  ;;  %v5418_v12 = vld [vmem:[#allocation2 + $0x128] sm:$0xff] }
  0x47   : > { %705 = vrot.lane.b32.xlu0 %v5300_v18, %s4940_s20  ;;  %9045 = vst [vmem:[#allocation23_spill] sm:$0xff] %v5391_v17  ;;  %9046 = vst [vmem:[#allocation24_spill] sm:$0xff] %v5396_v28  ;;  %v5415_v9 = vsel %vm598_vm2, %v649_v31, %v650_v19  ;;  %v5420_v0 = vld [vmem:[#allocation2 + $0x130] sm:$0x3]  ;;  %v660_v19 = vrot.slane %v5418_v12, 1 }
  0x48   : > { %9047 = vst [vmem:[#allocation25_spill] sm:$0xff] %v5410_v62  ;;  %9048 = vst [vmem:[#allocation26_spill] sm:$0xff] %v5415_v9  ;;  %v5429_v24 = vsel %vm598_vm2, %v655_v1, %v657_v4  ;;  %v662_v31 = vrot.slane %v5420_v0, 1  ;;  %v5477_v18 = vld [vmem:[#allocation2 + $0x178] sm:$0x3]  ;;  %v5494_v3 = vld [vmem:[#allocation2 + $0x188] sm:$0xff] }
  0x49   : > { %9049 = vst [vmem:[#allocation27_spill] sm:$0xff] %v5429_v24  ;;  %v5496_v60 = vld [vmem:[#allocation2 + $0x190] sm:$0x3]  ;;  %v5513_v50 = vld [vmem:[#allocation2 + $0x1a0] sm:$0xff]  ;;  %v5515_v37 = vld [vmem:[#allocation2 + $0x1a8] sm:$0x3] }
  0x4a   : > { %711 = vrot.lane.b32.xlu1 %v5315_v23, %s4940_s20  ;;  %v5448_v4 = vsel %vm598_vm2, %v660_v19, %v662_v31  ;;  %v5475_v23 = vld [vmem:[#allocation2 + $0x170] sm:$0xff]  ;;  %9059 = vst [vmem:[#allocation37_spill] sm:$0xff] %v5515_v37 }
  0x4b   : > { %709 = vrot.lane.b32.xlu0 %v5320_v29, %s4940_s20  ;;  %9051 = vst [vmem:[#allocation29_spill] sm:$0xff] %v5448_v4 }
  0x4e   : > { %715 = vrot.lane.b32.xlu1 %v5334_v41, %s4940_s20  ;;  %v5458_v41 = vld [vmem:[#allocation2 + $0x160] sm:$0x3] }
  0x4f   : > { %713 = vrot.lane.b32.xlu0 %v5339_v45, %s4940_s20  ;;  %v5456_v45 = vld [vmem:[#allocation2 + $0x158] sm:$0xff] }
  0x52   : > { %719 = vrot.lane.b32.xlu1 %v5353_v61, %s4940_s20 }
  0x53   : > { %717 = vrot.lane.b32.xlu0 %v5358_v2, %s4940_s20  ;;  %v5439_v2 = vld [vmem:[#allocation2 + $0x148] sm:$0x3] }
  0x56   : > { %723 = vrot.lane.b32.xlu1 %v5372_v8, %s4940_s20  ;;  %v5437_v8 = vld [vmem:[#allocation2 + $0x140] sm:$0xff] }
  0x57   : > { %721 = vrot.lane.b32.xlu0 %v5377_v11, %s4940_s20 }
  0x5a   : > { %727 = vrot.lane.b32.xlu1 %v5391_v17, %s4940_s20  ;;  %v5422_v17 = vld [vmem:[#allocation2 + $0x120] sm:$0xff] }
  0x5b   : > { %725 = vrot.lane.b32.xlu0 %v5396_v28, %s4940_s20  ;;  %v5434_v28 = vsel %vm598_vm2, %v654_v10, %v655_v1  ;;  %v659_v11 = vrot.slane %v5422_v17, 1  ;;  %v665_v1 = vrot.slane %v5437_v8, 1  ;;  %v667_v10 = vrot.slane %v5439_v2, 1 }
  0x5c   : > { %9050 = vst [vmem:[#allocation28_spill] sm:$0xff] %v5434_v28 }
  0x5d   : > { %v5467_v31 = vsel %vm598_vm2, %v665_v1, %v667_v10 }
  0x5e   : > { %731 = vrot.lane.b32.xlu1 %v5410_v62, %s4940_s20  ;;  %v5441_v62 = vld [vmem:[#allocation2 + $0x138] sm:$0xff]  ;;  %9053 = vst [vmem:[#allocation31_spill] sm:$0xff] %v5467_v31 }
  0x5f   : > { %729 = vrot.lane.b32.xlu0 %v5415_v9, %s4940_s20  ;;  %v5453_v9 = vsel %vm598_vm2, %v659_v11, %v660_v19  ;;  %v664_v61 = vrot.slane %v5441_v62, 1  ;;  %v670_v11 = vrot.slane %v5456_v45, 1  ;;  %v672_v19 = vrot.slane %v5458_v41, 1 }
  0x60   : > { %9052 = vst [vmem:[#allocation30_spill] sm:$0xff] %v5453_v9 }
  0x61   : > { %v5486_v10 = vsel %vm598_vm2, %v670_v11, %v672_v19 }
  0x62   : > { %735 = vrot.lane.b32.xlu1 %v5429_v24, %s4940_s20  ;;  %v5460_v24 = vld [vmem:[#allocation2 + $0x150] sm:$0xff]  ;;  %9055 = vst [vmem:[#allocation33_spill] sm:$0xff] %v5486_v10 }
  0x63   : > { %733 = vrot.lane.b32.xlu0 %v5434_v28, %s4940_s20  ;;  %v5472_v28 = vsel %vm598_vm2, %v664_v61, %v665_v1  ;;  %v669_v29 = vrot.slane %v5460_v24, 1  ;;  %v675_v61 = vrot.slane %v5475_v23, 1  ;;  %v677_v1 = vrot.slane %v5477_v18, 1 }
  0x64   : > { %9054 = vst [vmem:[#allocation32_spill] sm:$0xff] %v5472_v28 }
  0x65   : > { %v5505_v19 = vsel %vm598_vm2, %v675_v61, %v677_v1 }
  0x66   : > { %739 = vrot.lane.b32.xlu1 %v5448_v4, %s4940_s20  ;;  %v5479_v4 = vld [vmem:[#allocation2 + $0x168] sm:$0xff]  ;;  %9057 = vst [vmem:[#allocation35_spill] sm:$0xff] %v5505_v19 }
  0x67   : > { %737 = vrot.lane.b32.xlu0 %v5453_v9, %s4940_s20  ;;  %v5491_v9 = vsel %vm598_vm2, %v669_v29, %v670_v11  ;;  %v674_v14 = vrot.slane %v5479_v4, 1  ;;  %v680_v29 = vrot.slane %v5494_v3, 1  ;;  %v682_v11 = vrot.slane %v5496_v60, 1 }
  0x68   : > { %9056 = vst [vmem:[#allocation34_spill] sm:$0xff] %v5491_v9 }
  0x69   : > { %v5524_v1 = vsel %vm598_vm2, %v680_v29, %v682_v11  ;;  %v799_v11 = vrot.slane %v5194_v30, 2  ;;  %v804_v30 = vrot.slane %v5185_v26, 2 }
  0x6a   : > { %743 = vrot.lane.b32.xlu1 %v5467_v31, %s4940_s20  ;;  %v5498_v31 = vld [vmem:[#allocation2 + $0x180] sm:$0xff]  ;;  %9060 = vst [vmem:[#allocation38_spill] sm:$0xff] %v5524_v1 }
  0x6b   : > { %741 = vrot.lane.b32.xlu0 %v5472_v28, %s4940_s20  ;;  %v5510_v28 = vsel %vm598_vm2, %v674_v14, %v675_v61  ;;  %v679_v53 = vrot.slane %v5498_v31, 1  ;;  %v685_v14 = vrot.slane %v5513_v50, 1  ;;  %v687_v61 = vrot.slane %v5515_v37, 1 }
  0x6c   : > { %9058 = vst [vmem:[#allocation36_spill] sm:$0xff] %v5510_v28 }
  0x6e   : > { %747 = vrot.lane.b32.xlu1 %v5486_v10, %s4940_s20  ;;  %v5517_v10 = vld [vmem:[#allocation2 + $0x198] sm:$0xff] }
  0x6f   : > { %745 = vrot.lane.b32.xlu0 %v5491_v9, %s4940_s20  ;;  %v5529_v9 = vsel %vm598_vm2, %v679_v53, %v680_v29  ;;  %v684_v42 = vrot.slane %v5517_v10, 1  ;;  %v798_v53 = vrot.slane %v5187_v27, 2 }
  0x70   : > { %9061 = vst [vmem:[#allocation39_spill] sm:$0xff] %v5529_v9 }
  0x71   : > { %v5542_v37 = vsel %vm598_vm2, %v684_v42, %v685_v14  ;;  %v800_v42 = vsel %vm797_vm3, %v798_v53, %v799_v11  ;;  %v400_v53 = vld [vmem:[%s5131_s16 + $0x28] sm:$0xff] }
  0x72   : > { %751 = vrot.lane.b32.xlu1 %v5505_v19, %s4940_s20  ;;  %v801_v19 = vrot.slane %v5201_v35, 2  ;;  %9063 = vst [vmem:[#allocation41_spill] sm:$0xff] %v5542_v37  ;;  %v806_v35 = vrot.slane %v5197_v32, 2  ;;  %v808_v32 = vrot.slane %v5211_v40, 2  ;;  %475 = vst.msk [vmem:[#allocation2 + $0x1b9] sm:$0xff] %vm403_vm1, %v400_v53  ;;  %v824_v53 = vrot.slane %v5250_v58, 2 }
  0x73   : > { %749 = vrot.lane.b32.xlu0 %v5510_v28, %s4940_s20  ;;  %v5537_v28 = vsel %vm598_vm2, %v685_v14, %v687_v61  ;;  %v803_v14 = vrot.slane %v5183_v25, 2  ;;  %v809_v61 = vrot.slane %v5203_v36, 2 }
  0x74   : > { %9062 = vst [vmem:[#allocation40_spill] sm:$0xff] %v5537_v28  ;;  %v802_v29 = vsel %vm797_vm3, %v799_v11, %v801_v19  ;;  %v5557_v27 = vsel %vm797_vm3, %v804_v30, %v806_v35  ;;  %v811_v19 = vrot.slane %v5209_v39, 2  ;;  %v399_v11 = vld [vmem:[%s5131_s16 + $0x20] sm:$0xff]  ;;  %v814_v35 = vrot.slane %v5224_v47, 2 }
  0x75   : > { %v816_v39 = vrot.slane %v5226_v48, 2  ;;  %474 = vst.msk [vmem:[#allocation2 + $0x1b1] sm:$0xff] %vm403_vm1, %v399_v11  ;;  %v819_v48 = vrot.slane %v5242_v55, 2 }
  0x76   : > { %755 = vrot.lane.b32.xlu1 %v5524_v1, %s4940_s20 }
  0x77   : > { %753 = vrot.lane.b32.xlu0 %v5529_v9, %s4940_s20 }
  0x7a   : > { %759 = vrot.lane.b32.xlu1 %v5537_v28, %s4940_s20 }
  0x7b   : > { %757 = vrot.lane.b32.xlu0 %v5542_v37, %s4940_s20  ;;  %v5562_v37 = vsel %vm797_vm3, %v803_v14, %v804_v30  ;;  %v5579_v30 = vsel %vm797_vm3, %v808_v32, %v809_v61  ;;  %v5587_v14 = vsel %vm797_vm3, %v814_v35, %v816_v39  ;;  %v826_v39 = vrot.slane %v5252_v59, 2 }
  0x7e   : > { %890 = vrot.lane.b32.xlu1 %v802_v29, %s4941_s27  ;;  %v5572_v29 = vsel %vm797_vm3, %v809_v61, %v811_v19  ;;  %v821_v19 = vrot.slane %v5244_v56, 2  ;;  %v818_v61 = vrot.slane %v5246_v57, 2 }
  0x7f   : > { %888 = vrot.lane.b32.xlu0 %v800_v42, %s4941_s27  ;;  %v813_v42 = vrot.slane %v5228_v49, 2 }
  0x80   : > { %v5600_v32 = vsel %vm797_vm3, %v819_v48, %v821_v19  ;;  %v5605_v56 = vsel %vm797_vm3, %v818_v61, %v819_v48  ;;  %v829_v19 = vrot.slane %v5303_v20, 2  ;;  %v828_v48 = vrot.slane %v5308_v22, 2 }
  0x81   : > { %v5592_v11 = vsel %vm797_vm3, %v813_v42, %v814_v35  ;;  %9065 = vst [vmem:[#allocation43_spill] sm:$0xff] %v5605_v56  ;;  %v823_v35 = vrot.slane %v5261_v63, 2  ;;  %v5613_v42 = vsel %vm797_vm3, %v824_v53, %v826_v39  ;;  %v834_v39 = vrot.slane %v5323_v33, 2 }
  0x82   : > { %894 = vrot.lane.b32.xlu1 %v5557_v27, %s4941_s27  ;;  %9064 = vst [vmem:[#allocation42_spill] sm:$0xff] %v5592_v11 }
  0x83   : > { %892 = vrot.lane.b32.xlu0 %v5562_v37, %s4941_s27  ;;  %v5618_v59 = vsel %vm797_vm3, %v823_v35, %v824_v53  ;;  %v833_v53 = vrot.slane %v5327_v38, 2 }
  0x84   : > { %9066 = vst [vmem:[#allocation44_spill] sm:$0xff] %v5618_v59 }
  0x86   : > { %898 = vrot.lane.b32.xlu1 %v5572_v29, %s4941_s27 }
  0x87   : > { %896 = vrot.lane.b32.xlu0 %v5579_v30, %s4941_s27 }
  0x8a   : > { %902 = vrot.lane.b32.xlu1 %v5587_v14, %s4941_s27 }
  0x8b   : > { %900 = vrot.lane.b32.xlu0 %v5592_v11, %s4941_s27  ;;  %v831_v11 = vrot.slane %v5305_v21, 2  ;;  %v5631_v21 = vsel %vm797_vm3, %v828_v48, %v829_v19 }
  0x8c   : > { %9067 = vst [vmem:[#allocation45_spill] sm:$0xff] %v5631_v21 }
  0x8d   : > { %v5626_v61 = vsel %vm797_vm3, %v829_v19, %v831_v11  ;;  %v839_v11 = vrot.slane %v5342_v51, 2  ;;  %v838_v19 = vrot.slane %v5346_v54, 2 }
  0x8e   : > { %906 = vrot.lane.b32.xlu1 %v5600_v32, %s4941_s27 }
  0x8f   : > { %904 = vrot.lane.b32.xlu0 %v5605_v56, %s4941_s27  ;;  %v836_v56 = vrot.slane %v5325_v34, 2  ;;  %v5644_v34 = vsel %vm797_vm3, %v833_v53, %v834_v39 }
  0x90   : > { %9068 = vst [vmem:[#allocation46_spill] sm:$0xff] %v5644_v34 }
  0x91   : > { %v5639_v35 = vsel %vm797_vm3, %v834_v39, %v836_v56  ;;  %v844_v56 = vrot.slane %v5361_v5, 2  ;;  %v843_v39 = vrot.slane %v5365_v7, 2 }
  0x92   : > { %910 = vrot.lane.b32.xlu1 %v5613_v42, %s4941_s27 }
  0x93   : > { %908 = vrot.lane.b32.xlu0 %v5618_v59, %s4941_s27  ;;  %v841_v59 = vrot.slane %v5344_v52, 2  ;;  %v5657_v52 = vsel %vm797_vm3, %v838_v19, %v839_v11 }
  0x94   : > { %9069 = vst [vmem:[#allocation47_spill] sm:$0xff] %v5657_v52 }
  0x95   : > { %v5652_v48 = vsel %vm797_vm3, %v839_v11, %v841_v59  ;;  %v849_v59 = vrot.slane %v5380_v13, 2  ;;  %v848_v11 = vrot.slane %v5384_v16, 2 }
  0x96   : > { %914 = vrot.lane.b32.xlu1 %v5626_v61, %s4941_s27 }
  0x97   : > { %912 = vrot.lane.b32.xlu0 %v5631_v21, %s4941_s27  ;;  %v846_v21 = vrot.slane %v5363_v6, 2  ;;  %v5670_v6 = vsel %vm797_vm3, %v843_v39, %v844_v56 }
  0x98   : > { %9071 = vst [vmem:[#allocation49_spill] sm:$0xff] %v5670_v6 }
  0x99   : > { %v5665_v53 = vsel %vm797_vm3, %v844_v56, %v846_v21  ;;  %v854_v21 = vrot.slane %v5399_v43, 2  ;;  %v853_v56 = vrot.slane %v5403_v46, 2 }
  0x9a   : > { %918 = vrot.lane.b32.xlu1 %v5639_v35, %s4941_s27  ;;  %9070 = vst [vmem:[#allocation48_spill] sm:$0xff] %v5665_v53 }
  0x9b   : > { %916 = vrot.lane.b32.xlu0 %v5644_v34, %s4941_s27  ;;  %v851_v34 = vrot.slane %v5382_v15, 2  ;;  %v5683_v15 = vsel %vm797_vm3, %v848_v11, %v849_v59 }
  0x9c   : > { %9072 = vst [vmem:[#allocation50_spill] sm:$0xff] %v5683_v15 }
  0x9d   : > { %v5678_v19 = vsel %vm797_vm3, %v849_v59, %v851_v34  ;;  %v859_v34 = vrot.slane %v5418_v12, 2  ;;  %v858_v59 = vrot.slane %v5422_v17, 2 }
  0x9e   : > { %922 = vrot.lane.b32.xlu1 %v5652_v48, %s4941_s27 }
  0x9f   : > { %920 = vrot.lane.b32.xlu0 %v5657_v52, %s4941_s27  ;;  %v856_v52 = vrot.slane %v5401_v44, 2  ;;  %v5698_v44 = vsel %vm797_vm3, %v853_v56, %v854_v21  ;;  %v863_v56 = vrot.slane %v5441_v62, 2 }
  0xa0   : > { %9074 = vst [vmem:[#allocation52_spill] sm:$0xff] %v5698_v44 }
  0xa1   : > { %v5691_v39 = vsel %vm797_vm3, %v854_v21, %v856_v52  ;;  %v5715_v21 = vsel %vm797_vm3, %v858_v59, %v859_v34  ;;  %v868_v59 = vrot.slane %v5460_v24, 2 }
  0xa2   : > { %926 = vrot.lane.b32.xlu1 %v5665_v53, %s4941_s27  ;;  %9078 = vst [vmem:[#allocation56_spill] sm:$0xff] %v5715_v21 }
  0xa3   : > { %924 = vrot.lane.b32.xlu0 %v5670_v6, %s4941_s27  ;;  %v861_v6 = vrot.slane %v5420_v0, 2  ;;  %v864_v0 = vrot.slane %v5437_v8, 2 }
  0xa5   : > { %v5708_v52 = vsel %vm797_vm3, %v859_v34, %v861_v6  ;;  %v5732_v34 = vsel %vm797_vm3, %v863_v56, %v864_v0  ;;  %v873_v56 = vrot.slane %v5479_v4, 2 }
  0xa6   : > { %930 = vrot.lane.b32.xlu1 %v5678_v19, %s4941_s27  ;;  %9076 = vst [vmem:[#allocation54_spill] sm:$0xff] %v5708_v52  ;;  %9082 = vst [vmem:[#allocation60_spill] sm:$0xff] %v5732_v34 }
  0xa7   : > { %928 = vrot.lane.b32.xlu0 %v5683_v15, %s4941_s27 }
  0xa8   : > { %v5695_v53 = vpop.permute.xlu1 %693 }
  0xa9   : > { %9073 = vst [vmem:[#allocation51_spill] sm:$0xff] %v5695_v53  ;;  %v5701_v11 = vpop.permute.xlu0 %689  ;;  %v866_v53 = vrot.slane %v5439_v2, 2  ;;  %v869_v2 = vrot.slane %v5456_v45, 2 }
  0xaa   : > { %9075 = vst [vmem:[#allocation53_spill] sm:$0xff] %v5701_v11  ;;  %934 = vrot.lane.b32.xlu1 %v5691_v39, %s4941_s27 }
  0xab   : > { %932 = vrot.lane.b32.xlu0 %v5698_v44, %s4941_s27  ;;  %v5725_v6 = vsel %vm797_vm3, %v864_v0, %v866_v53  ;;  %v5749_v0 = vsel %vm797_vm3, %v868_v59, %v869_v2  ;;  %v878_v59 = vrot.slane %v5498_v31, 2 }
  0xac   : > { %v5712_v15 = vpop.permute.xlu1 %695  ;;  %9080 = vst [vmem:[#allocation58_spill] sm:$0xff] %v5725_v6  ;;  %9086 = vst [vmem:[#allocation64_spill] sm:$0xff] %v5749_v0 }
  0xad   : > { %9077 = vst [vmem:[#allocation55_spill] sm:$0xff] %v5712_v15  ;;  %v5718_v11 = vpop.permute.xlu0 %691  ;;  %v871_v15 = vrot.slane %v5458_v41, 2  ;;  %v874_v41 = vrot.slane %v5475_v23, 2 }
  0xae   : > { %9079 = vst [vmem:[#allocation57_spill] sm:$0xff] %v5718_v11  ;;  %938 = vrot.lane.b32.xlu1 %v5708_v52, %s4941_s27 }
  0xaf   : > { %936 = vrot.lane.b32.xlu0 %v5715_v21, %s4941_s27  ;;  %v5742_v53 = vsel %vm797_vm3, %v869_v2, %v871_v15  ;;  %v5766_v2 = vsel %vm797_vm3, %v873_v56, %v874_v41  ;;  %v883_v56 = vrot.slane %v5517_v10, 2 }
  0xb0   : > { %v5729_v44 = vpop.permute.xlu1 %699  ;;  %9084 = vst [vmem:[#allocation62_spill] sm:$0xff] %v5742_v53  ;;  %9090 = vst [vmem:[#allocation68_spill] sm:$0xff] %v5766_v2 }
  0xb1   : > { %9081 = vst [vmem:[#allocation59_spill] sm:$0xff] %v5729_v44  ;;  %v5735_v11 = vpop.permute.xlu0 %697  ;;  %v876_v44 = vrot.slane %v5477_v18, 2  ;;  %v879_v18 = vrot.slane %v5494_v3, 2 }
  0xb2   : > { %9083 = vst [vmem:[#allocation61_spill] sm:$0xff] %v5735_v11  ;;  %942 = vrot.lane.b32.xlu1 %v5725_v6, %s4941_s27 }
  0xb3   : > { %940 = vrot.lane.b32.xlu0 %v5732_v34, %s4941_s27  ;;  %v5759_v15 = vsel %vm797_vm3, %v874_v41, %v876_v44  ;;  %v5783_v41 = vsel %vm797_vm3, %v878_v59, %v879_v18 }
  0xb4   : > { %v5746_v21 = vpop.permute.xlu1 %703  ;;  %9088 = vst [vmem:[#allocation66_spill] sm:$0xff] %v5759_v15 }
  0xb5   : > { %9085 = vst [vmem:[#allocation63_spill] sm:$0xff] %v5746_v21  ;;  %v5752_v11 = vpop.permute.xlu0 %701  ;;  %v881_v21 = vrot.slane %v5496_v60, 2  ;;  %v884_v60 = vrot.slane %v5513_v50, 2 }
  0xb6   : > { %9087 = vst [vmem:[#allocation65_spill] sm:$0xff] %v5752_v11  ;;  %946 = vrot.lane.b32.xlu1 %v5742_v53, %s4941_s27 }
  0xb7   : > { %944 = vrot.lane.b32.xlu0 %v5749_v0, %s4941_s27  ;;  %v5776_v44 = vsel %vm797_vm3, %v879_v18, %v881_v21  ;;  %v9093_v0 = vld [vmem:[#allocation37_spill] sm:$0xff] }
  0xb8   : > { %v5763_v34 = vpop.permute.xlu1 %707  ;;  %9092 = vst [vmem:[#allocation70_spill] sm:$0xff] %v5776_v44 }
  0xb9   : > { %9089 = vst [vmem:[#allocation67_spill] sm:$0xff] %v5763_v34  ;;  %v5769_v11 = vpop.permute.xlu0 %705  ;;  %v886_v34 = vrot.slane %v9093_v0, 2  ;;  %v5798_v0 = vsel %vm797_vm3, %v883_v56, %v884_v60 }
  0xba   : > { %9091 = vst [vmem:[#allocation69_spill] sm:$0xff] %v5769_v11  ;;  %950 = vrot.lane.b32.xlu1 %v5759_v15, %s4941_s27 }
  0xbb   : > { %948 = vrot.lane.b32.xlu0 %v5766_v2, %s4941_s27  ;;  %v5793_v21 = vsel %vm797_vm3, %v884_v60, %v886_v34 }
  0xbc   : > { %v5780_v53 = vpop.permute.xlu1 %711  ;;  %9096 = vst [vmem:[#allocation72_spill] sm:$0xff] %v5793_v21 }
  0xbd   : > { %9094 = vst [vmem:[#allocation37_spill] sm:$0xff] %v5780_v53  ;;  %v5786_v11 = vpop.permute.xlu0 %709 }
  0xbe   : > { %9095 = vst [vmem:[#allocation71_spill] sm:$0xff] %v5786_v11  ;;  %954 = vrot.lane.b32.xlu1 %v5776_v44, %s4941_s27 }
  0xbf   : > { %952 = vrot.lane.b32.xlu0 %v5783_v41, %s4941_s27 }
  0xc0   : > { %v5795_v2 = vpop.permute.xlu1 %715 }
  0xc1   : > { %9097 = vst [vmem:[#allocation73_spill] sm:$0xff] %v5795_v2  ;;  %v5800_v18 = vpop.permute.xlu0 %713 }
  0xc2   : > { %9098 = vst [vmem:[#allocation74_spill] sm:$0xff] %v5800_v18  ;;  %958 = vrot.lane.b32.xlu1 %v5793_v21, %s4941_s27  ;;  %v9180_v18 = vld [vmem:[#allocation30_spill] sm:$0xff] }
  0xc3   : > { %956 = vrot.lane.b32.xlu0 %v5798_v0, %s4941_s27 }
  0xc4   : > { %v5806_v59 = vpop.permute.xlu1 %719 }
  0xc5   : > { %9099 = vst [vmem:[#allocation75_spill] sm:$0xff] %v5806_v59  ;;  %v5808_v11 = vpop.permute.xlu0 %717 }
  0xc6   : > { %9100 = vst [vmem:[#allocation76_spill] sm:$0xff] %v5808_v11  ;;  %1000 = vrot.lane.b32.xlu1 %v5185_v26, %s4942_s28 }
  0xc7   : > { %998 = vrot.lane.b32.xlu0 %v5183_v25, %s4942_s28 }
  0xc8   : > { %v5814_v34 = vpop.permute.xlu1 %723 }
  0xc9   : > { %9101 = vst [vmem:[#allocation77_spill] sm:$0xff] %v5814_v34  ;;  %v5816_v60 = vpop.permute.xlu0 %721  ;;  %v9170_v34 = vld [vmem:[#allocation24_spill] sm:$0xff] }
  0xca   : > { %9102 = vst [vmem:[#allocation78_spill] sm:$0xff] %v5816_v60  ;;  %1004 = vrot.lane.b32.xlu1 %v5203_v36, %s4942_s28 }
  0xcb   : > { %1002 = vrot.lane.b32.xlu0 %v5211_v40, %s4942_s28 }
  0xcc   : > { %v5822_v56 = vpop.permute.xlu1 %727 }
  0xcd   : > { %9103 = vst [vmem:[#allocation79_spill] sm:$0xff] %v5822_v56  ;;  %v5824_v11 = vpop.permute.xlu0 %725  ;;  %v9162_v56 = vld [vmem:[#allocation20_spill] sm:$0xff] }
  0xce   : > { %9104 = vst [vmem:[#allocation80_spill] sm:$0xff] %v5824_v11  ;;  %1008 = vrot.lane.b32.xlu1 %v5224_v47, %s4942_s28 }
  0xcf   : > { %1006 = vrot.lane.b32.xlu0 %v5228_v49, %s4942_s28 }
  0xd0   : > { %v5830_v25 = vpop.permute.xlu1 %731 }
  0xd1   : > { %9105 = vst [vmem:[#allocation81_spill] sm:$0xff] %v5830_v25  ;;  %v5832_v26 = vpop.permute.xlu0 %729  ;;  %v9154_v25 = vld [vmem:[#allocation16_spill] sm:$0xff] }
  0xd2   : > { %9106 = vst [vmem:[#allocation82_spill] sm:$0xff] %v5832_v26  ;;  %1012 = vrot.lane.b32.xlu1 %v5242_v55, %s4942_s28  ;;  %v9153_v26 = vld [vmem:[#allocation15_spill] sm:$0xff] }
  0xd3   : > { %1010 = vrot.lane.b32.xlu0 %v5246_v57, %s4942_s28 }
  0xd4   : > { %v5838_v36 = vpop.permute.xlu1 %735 }
  0xd5   : > { %9107 = vst [vmem:[#allocation83_spill] sm:$0xff] %v5838_v36  ;;  %v5840_v40 = vpop.permute.xlu0 %733 }
  0xd6   : > { %9108 = vst [vmem:[#allocation84_spill] sm:$0xff] %v5840_v40  ;;  %1016 = vrot.lane.b32.xlu1 %v5250_v58, %s4942_s28 }
  0xd7   : > { %1014 = vrot.lane.b32.xlu0 %v5261_v63, %s4942_s28 }
  0xd8   : > { %v5846_v47 = vpop.permute.xlu1 %739 }
  0xd9   : > { %9109 = vst [vmem:[#allocation85_spill] sm:$0xff] %v5846_v47  ;;  %v5848_v49 = vpop.permute.xlu0 %737  ;;  %v9150_v47 = vld [vmem:[#allocation14_spill] sm:$0xff] }
  0xda   : > { %9110 = vst [vmem:[#allocation86_spill] sm:$0xff] %v5848_v49  ;;  %1020 = vrot.lane.b32.xlu1 %v5303_v20, %s4942_s28  ;;  %v9149_v49 = vld [vmem:[#allocation13_spill] sm:$0xff] }
  0xdb   : > { %1018 = vrot.lane.b32.xlu0 %v5308_v22, %s4942_s28 }
  0xdc   : > { %v5854_v55 = vpop.permute.xlu1 %743 }
  0xdd   : > { %9111 = vst [vmem:[#allocation87_spill] sm:$0xff] %v5854_v55  ;;  %v5856_v57 = vpop.permute.xlu0 %741 }
  0xde   : > { %9112 = vst [vmem:[#allocation88_spill] sm:$0xff] %v5856_v57  ;;  %1024 = vrot.lane.b32.xlu1 %v5323_v33, %s4942_s28  ;;  %v9145_v57 = vld [vmem:[#allocation11_spill] sm:$0xff] }
  0xdf   : > { %1022 = vrot.lane.b32.xlu0 %v5327_v38, %s4942_s28 }
  0xe0   : > { %v5862_v58 = vpop.permute.xlu1 %747 }
  0xe1   : > { %9113 = vst [vmem:[#allocation89_spill] sm:$0xff] %v5862_v58  ;;  %v5864_v63 = vpop.permute.xlu0 %745 }
  0xe2   : > { %9114 = vst [vmem:[#allocation90_spill] sm:$0xff] %v5864_v63  ;;  %1028 = vrot.lane.b32.xlu1 %v5342_v51, %s4942_s28 }
  0xe3   : > { %1026 = vrot.lane.b32.xlu0 %v5346_v54, %s4942_s28 }
  0xe4   : > { %v5870_v20 = vpop.permute.xlu1 %751 }
  0xe5   : > { %9115 = vst [vmem:[#allocation91_spill] sm:$0xff] %v5870_v20  ;;  %v5872_v22 = vpop.permute.xlu0 %749  ;;  %v9142_v20 = vld [vmem:[#allocation10_spill] sm:$0xff] }
  0xe6   : > { %9116 = vst [vmem:[#allocation92_spill] sm:$0xff] %v5872_v22  ;;  %1032 = vrot.lane.b32.xlu1 %v5361_v5, %s4942_s28  ;;  %v9141_v22 = vld [vmem:[#allocation9_spill] sm:$0xff] }
  0xe7   : > { %1030 = vrot.lane.b32.xlu0 %v5365_v7, %s4942_s28 }
  0xe8   : > { %v5878_v33 = vpop.permute.xlu1 %755 }
  0xe9   : > { %9117 = vst [vmem:[#allocation93_spill] sm:$0xff] %v5878_v33  ;;  %v5880_v38 = vpop.permute.xlu0 %753 }
  0xea   : > { %9118 = vst [vmem:[#allocation94_spill] sm:$0xff] %v5880_v38  ;;  %1036 = vrot.lane.b32.xlu1 %v5380_v13, %s4942_s28 }
  0xeb   : > { %1034 = vrot.lane.b32.xlu0 %v5384_v16, %s4942_s28 }
  0xec   : > { %v5886_v51 = vpop.permute.xlu1 %759 }
  0xed   : > { %9119 = vst [vmem:[#allocation95_spill] sm:$0xff] %v5886_v51  ;;  %v5888_v54 = vpop.permute.xlu0 %757  ;;  %v9138_v51 = vld [vmem:[#allocation7_spill] sm:$0xff] }
  0xee   : > { %9120 = vst [vmem:[#allocation96_spill] sm:$0xff] %v5888_v54  ;;  %1040 = vrot.lane.b32.xlu1 %v5399_v43, %s4942_s28  ;;  %v5946_v54 = vld [vmem:[#allocation2 + $0x1b0] sm:$0xff] }
  0xef   : > { %1038 = vrot.lane.b32.xlu0 %v5403_v46, %s4942_s28  ;;  %9133 = vst [vmem:[#allocation109_spill] sm:$0xff] %v5946_v54 }
  0xf0   : > { %v5894_v5 = vpop.permute.xlu1 %890 }
  0xf1   : > { %v5896_v7 = vpop.permute.xlu0 %888 }
  0xf2   : > { %1044 = vrot.lane.b32.xlu1 %v5418_v12, %s4942_s28 }
  0xf3   : > { %1042 = vrot.lane.b32.xlu0 %v5422_v17, %s4942_s28 }
  0xf4   : > { %v5902_v13 = vpop.permute.xlu1 %894 }
  0xf5   : > { %9121 = vst [vmem:[#allocation97_spill] sm:$0xff] %v5902_v13  ;;  %v5904_v16 = vpop.permute.xlu0 %892 }
  0xf6   : > { %9122 = vst [vmem:[#allocation98_spill] sm:$0xff] %v5904_v16  ;;  %1048 = vrot.lane.b32.xlu1 %v5437_v8, %s4942_s28 }
  0xf7   : > { %1046 = vrot.lane.b32.xlu0 %v5441_v62, %s4942_s28 }
  0xf8   : > { %v5910_v43 = vpop.permute.xlu1 %898 }
  0xf9   : > { %9123 = vst [vmem:[#allocation99_spill] sm:$0xff] %v5910_v43  ;;  %v5912_v46 = vpop.permute.xlu0 %896  ;;  %v9192_v43 = vld [vmem:[#allocation36_spill] sm:$0xff] }
  0xfa   : > { %9124 = vst [vmem:[#allocation100_spill] sm:$0xff] %v5912_v46  ;;  %1052 = vrot.lane.b32.xlu1 %v5456_v45, %s4942_s28  ;;  %v9191_v46 = vld [vmem:[#allocation35_spill] sm:$0xff] }
  0xfb   : > { %1050 = vrot.lane.b32.xlu0 %v5460_v24, %s4942_s28 }
  0xfc   : > { %v5918_v17 = vpop.permute.xlu1 %902 }
  0xfd   : > { %9125 = vst [vmem:[#allocation101_spill] sm:$0xff] %v5918_v17  ;;  %v5920_v12 = vpop.permute.xlu0 %900 }
  0xfe   : > { %9126 = vst [vmem:[#allocation102_spill] sm:$0xff] %v5920_v12  ;;  %1056 = vrot.lane.b32.xlu1 %v5475_v23, %s4942_s28  ;;  %v5942_v23 = vld [vmem:[#allocation2 + $0x1b8] sm:$0xff] }
  0xff   : > { %1054 = vrot.lane.b32.xlu0 %v5479_v4, %s4942_s28  ;;  %9131 = vst [vmem:[#allocation107_spill] sm:$0xff] %v5942_v23 }
 0x100   : > { %v5926_v8 = vpop.permute.xlu1 %906 }
 0x101   : > { %9127 = vst [vmem:[#allocation103_spill] sm:$0xff] %v5926_v8  ;;  %v5928_v62 = vpop.permute.xlu0 %904  ;;  %v9188_v8 = vld [vmem:[#allocation34_spill] sm:$0xff] }
 0x102   : > { %9128 = vst [vmem:[#allocation104_spill] sm:$0xff] %v5928_v62  ;;  %1060 = vrot.lane.b32.xlu1 %v5494_v3, %s4942_s28  ;;  %v9187_v62 = vld [vmem:[#allocation33_spill] sm:$0xff] }
 0x103   : > { %1058 = vrot.lane.b32.xlu0 %v5498_v31, %s4942_s28 }
 0x104   : > { %v5934_v45 = vpop.permute.xlu1 %910 }
 0x105   : > { %9129 = vst [vmem:[#allocation105_spill] sm:$0xff] %v5934_v45  ;;  %v5936_v24 = vpop.permute.xlu0 %908 }
 0x106   : > { %9130 = vst [vmem:[#allocation106_spill] sm:$0xff] %v5936_v24  ;;  %1064 = vrot.lane.b32.xlu1 %v5513_v50, %s4942_s28  ;;  %v9184_v24 = vld [vmem:[#allocation32_spill] sm:$0xff] }
 0x107   : > { %1062 = vrot.lane.b32.xlu0 %v5517_v10, %s4942_s28  ;;  %v9137_v10 = vld [vmem:[#allocation8_spill] sm:$0xff] }
 0x108   : > { %v5944_v4 = vpop.permute.xlu1 %914 }
 0x109   : > { %9132 = vst [vmem:[#allocation108_spill] sm:$0xff] %v5944_v4  ;;  %v5948_v3 = vpop.permute.xlu0 %912 }
 0x10a   : > { %9134 = vst [vmem:[#allocation110_spill] sm:$0xff] %v5948_v3  ;;  %1068 = vrot.lane.b32.xlu1 %v5942_v23, %s4942_s28  ;;  %v9178_v3 = vld [vmem:[#allocation28_spill] sm:$0xff] }
 0x10b   : > { %1066 = vrot.lane.b32.xlu0 %v5946_v54, %s4942_s28 }
 0x10c   : > { %v5954_v31 = vpop.permute.xlu1 %918 }
 0x10d   : > { %9135 = vst [vmem:[#allocation111_spill] sm:$0xff] %v5954_v31  ;;  %v5956_v50 = vpop.permute.xlu0 %916  ;;  %v9174_v31 = vld [vmem:[#allocation26_spill] sm:$0xff] }
 0x10e   : > { %9136 = vst [vmem:[#allocation112_spill] sm:$0xff] %v5956_v50  ;;  %1114 = vrot.lane.b32.xlu1 %v9137_v10, %s4943_s30  ;;  %v9146_v10 = vld [vmem:[#allocation12_spill] sm:$0xff] }
 0x10f   : > { %1112 = vrot.lane.b32.xlu0 %v9138_v51, %s4943_s30 }
 0x110   : > { %v5962_v38 = vpop.permute.xlu1 %922 }
 0x111   : > { %9139 = vst [vmem:[#allocation8_spill] sm:$0xff] %v5962_v38  ;;  %v5964_v33 = vpop.permute.xlu0 %920  ;;  %v9166_v38 = vld [vmem:[#allocation22_spill] sm:$0xff] }
 0x112   : > { %9140 = vst [vmem:[#allocation7_spill] sm:$0xff] %v5964_v33  ;;  %1118 = vrot.lane.b32.xlu1 %v9141_v22, %s4943_s30 }
 0x113   : > { %1116 = vrot.lane.b32.xlu0 %v9142_v20, %s4943_s30 }
 0x114   : > { %v5970_v63 = vpop.permute.xlu1 %926 }
 0x115   : > { %9143 = vst [vmem:[#allocation9_spill] sm:$0xff] %v5970_v63  ;;  %v5972_v58 = vpop.permute.xlu0 %924  ;;  %v9158_v63 = vld [vmem:[#allocation18_spill] sm:$0xff] }
 0x116   : > { %9144 = vst [vmem:[#allocation10_spill] sm:$0xff] %v5972_v58  ;;  %1122 = vrot.lane.b32.xlu1 %v9145_v57, %s4943_s30 }
 0x117   : > { %1120 = vrot.lane.b32.xlu0 %v9146_v10, %s4943_s30 }
 0x118   : > { %v5978_v51 = vpop.permute.xlu1 %930 }
 0x119   : > { %9147 = vst [vmem:[#allocation11_spill] sm:$0xff] %v5978_v51  ;;  %v5980_v55 = vpop.permute.xlu0 %928 }
 0x11a   : > { %9148 = vst [vmem:[#allocation12_spill] sm:$0xff] %v5980_v55  ;;  %1126 = vrot.lane.b32.xlu1 %v9149_v49, %s4943_s30  ;;  %v9157_v55 = vld [vmem:[#allocation17_spill] sm:$0xff] }
 0x11b   : > { %1124 = vrot.lane.b32.xlu0 %v9150_v47, %s4943_s30 }
 0x11c   : > { %v5986_v40 = vpop.permute.xlu1 %934 }
 0x11d   : > { %9151 = vst [vmem:[#allocation13_spill] sm:$0xff] %v5986_v40  ;;  %v5988_v36 = vpop.permute.xlu0 %932 }
 0x11e   : > { %9152 = vst [vmem:[#allocation14_spill] sm:$0xff] %v5988_v36  ;;  %1130 = vrot.lane.b32.xlu1 %v9153_v26, %s4943_s30  ;;  %v9161_v36 = vld [vmem:[#allocation19_spill] sm:$0xff] }
 0x11f   : > { %1128 = vrot.lane.b32.xlu0 %v9154_v25, %s4943_s30 }
 0x120   : > { %v5994_v58 = vpop.permute.xlu1 %938 }
 0x121   : > { %9155 = vst [vmem:[#allocation15_spill] sm:$0xff] %v5994_v58  ;;  %v5996_v51 = vpop.permute.xlu0 %936 }
 0x122   : > { %9156 = vst [vmem:[#allocation16_spill] sm:$0xff] %v5996_v51  ;;  %1134 = vrot.lane.b32.xlu1 %v9157_v55, %s4943_s30  ;;  %v9165_v51 = vld [vmem:[#allocation21_spill] sm:$0xff] }
 0x123   : > { %1132 = vrot.lane.b32.xlu0 %v9158_v63, %s4943_s30 }
 0x124   : > { %v6002_v11 = vpop.permute.xlu1 %942 }
 0x125   : > { %9159 = vst [vmem:[#allocation17_spill] sm:$0xff] %v6002_v11  ;;  %v6004_v40 = vpop.permute.xlu0 %940 }
 0x126   : > { %9160 = vst [vmem:[#allocation18_spill] sm:$0xff] %v6004_v40  ;;  %1138 = vrot.lane.b32.xlu1 %v9161_v36, %s4943_s30  ;;  %v9169_v40 = vld [vmem:[#allocation23_spill] sm:$0xff] }
 0x127   : > { %1136 = vrot.lane.b32.xlu0 %v9162_v56, %s4943_s30 }
 0x128   : > { %v6010_v33 = vpop.permute.xlu1 %946 }
 0x129   : > { %9163 = vst [vmem:[#allocation19_spill] sm:$0xff] %v6010_v33  ;;  %v6012_v58 = vpop.permute.xlu0 %944 }
 0x12a   : > { %9164 = vst [vmem:[#allocation20_spill] sm:$0xff] %v6012_v58  ;;  %1142 = vrot.lane.b32.xlu1 %v9165_v51, %s4943_s30  ;;  %v9173_v58 = vld [vmem:[#allocation25_spill] sm:$0xff] }
 0x12b   : > { %1140 = vrot.lane.b32.xlu0 %v9166_v38, %s4943_s30 }
 0x12c   : > { %v6018_v60 = vpop.permute.xlu1 %950 }
 0x12d   : > { %9167 = vst [vmem:[#allocation21_spill] sm:$0xff] %v6018_v60  ;;  %v6020_v11 = vpop.permute.xlu0 %948 }
 0x12e   : > { %9168 = vst [vmem:[#allocation22_spill] sm:$0xff] %v6020_v11  ;;  %1146 = vrot.lane.b32.xlu1 %v9169_v40, %s4943_s30  ;;  %v9177_v11 = vld [vmem:[#allocation27_spill] sm:$0xff] }
 0x12f   : > { %1144 = vrot.lane.b32.xlu0 %v9170_v34, %s4943_s30 }
 0x130   : > { %v6026_v50 = vpop.permute.xlu1 %954 }
 0x131   : > { %9171 = vst [vmem:[#allocation23_spill] sm:$0xff] %v6026_v50  ;;  %v6028_v33 = vpop.permute.xlu0 %952 }
 0x132   : > { %9172 = vst [vmem:[#allocation24_spill] sm:$0xff] %v6028_v33  ;;  %1150 = vrot.lane.b32.xlu1 %v9173_v58, %s4943_s30  ;;  %v9179_v33 = vld [vmem:[#allocation29_spill] sm:$0xff] }
 0x133   : > { %1148 = vrot.lane.b32.xlu0 %v9174_v31, %s4943_s30 }
 0x134   : > { %v6034_v59 = vpop.permute.xlu1 %958 }
 0x135   : > { %9175 = vst [vmem:[#allocation25_spill] sm:$0xff] %v6034_v59  ;;  %v6036_v60 = vpop.permute.xlu0 %956 }
 0x136   : > { %9176 = vst [vmem:[#allocation26_spill] sm:$0xff] %v6036_v60  ;;  %1154 = vrot.lane.b32.xlu1 %v9177_v11, %s4943_s30  ;;  %v9183_v60 = vld [vmem:[#allocation31_spill] sm:$0xff] }
 0x137   : > { %1152 = vrot.lane.b32.xlu0 %v9178_v3, %s4943_s30 }
 0x138   : > { %v6042_v4 = vpop.permute.xlu1 %1000 }
 0x139   : > { %v6044_v50 = vpop.permute.xlu0 %998 }
 0x13a   : > { %1158 = vrot.lane.b32.xlu1 %v9179_v33, %s4943_s30 }
 0x13b   : > { %1156 = vrot.lane.b32.xlu0 %v9180_v18, %s4943_s30  ;;  %v9238_v18 = vld [vmem:[#allocation62_spill] sm:$0xff] }
 0x13c   : > { %v6050_v2 = vpop.permute.xlu1 %1004 }
 0x13d   : > { %9181 = vst [vmem:[#allocation27_spill] sm:$0xff] %v6050_v2  ;;  %v6052_v59 = vpop.permute.xlu0 %1002 }
 0x13e   : > { %9182 = vst [vmem:[#allocation28_spill] sm:$0xff] %v6052_v59  ;;  %1162 = vrot.lane.b32.xlu1 %v9183_v60, %s4943_s30 }
 0x13f   : > { %1160 = vrot.lane.b32.xlu0 %v9184_v24, %s4943_s30 }
 0x140   : > { %v6058_v45 = vpop.permute.xlu1 %1008 }
 0x141   : > { %9185 = vst [vmem:[#allocation29_spill] sm:$0xff] %v6058_v45  ;;  %v6060_v53 = vpop.permute.xlu0 %1006  ;;  %v6076_v45 = vld [vmem:[#allocation2 + $0x1c0] sm:$0x3] }
 0x142   : > { %9186 = vst [vmem:[#allocation113_spill] sm:$0xff] %v6060_v53  ;;  %1166 = vrot.lane.b32.xlu1 %v9187_v62, %s4943_s30 }
 0x143   : > { %1164 = vrot.lane.b32.xlu0 %v9188_v8, %s4943_s30  ;;  %v1108_v8 = vrot.slane %v5942_v23, 1 }
 0x144   : > { %v6066_v12 = vpop.permute.xlu1 %1012 }
 0x145   : > { %9189 = vst [vmem:[#allocation114_spill] sm:$0xff] %v6066_v12  ;;  %v6068_v17 = vpop.permute.xlu0 %1010 }
 0x146   : > { %9190 = vst [vmem:[#allocation115_spill] sm:$0xff] %v6068_v17  ;;  %1170 = vrot.lane.b32.xlu1 %v9191_v46, %s4943_s30  ;;  %v1110_v17 = vrot.slane %v6076_v45, 1  ;;  %v1107_v46 = vrot.slane %v5946_v54, 1 }
 0x147   : > { %1168 = vrot.lane.b32.xlu0 %v9192_v43, %s4943_s30 }
 0x148   : > { %v6074_v24 = vpop.permute.xlu1 %1016 }
 0x149   : > { %9193 = vst [vmem:[#allocation116_spill] sm:$0xff] %v6074_v24  ;;  %v6078_v53 = vpop.permute.xlu0 %1014 }
 0x14a   : > { %9194 = vst [vmem:[#allocation117_spill] sm:$0xff] %v6078_v53  ;;  %1174 = vrot.lane.b32.xlu1 %v5524_v1, %s4943_s30  ;;  %v9197_v53 = vld [vmem:[#allocation41_spill] sm:$0xff]  ;;  %v6096_v1 = vsel %vm598_vm2, %v1108_v8, %v1110_v17 }
 0x14b   : > { %1172 = vrot.lane.b32.xlu0 %v5529_v9, %s4943_s30  ;;  %9198 = vst [vmem:[#allocation120_spill] sm:$0xff] %v6096_v1  ;;  %v6101_v9 = vsel %vm598_vm2, %v1107_v46, %v1108_v8 }
 0x14c   : > { %v6087_v12 = vpop.permute.xlu1 %1020  ;;  %9200 = vst [vmem:[#allocation122_spill] sm:$0xff] %v6101_v9 }
 0x14d   : > { %9195 = vst [vmem:[#allocation118_spill] sm:$0xff] %v6087_v12  ;;  %v6089_v43 = vpop.permute.xlu0 %1018 }
 0x14e   : > { %9196 = vst [vmem:[#allocation119_spill] sm:$0xff] %v6089_v43  ;;  %1178 = vrot.lane.b32.xlu1 %v5537_v28, %s4943_s30 }
 0x14f   : > { %1176 = vrot.lane.b32.xlu0 %v9197_v53, %s4943_s30  ;;  %v9227_v53 = vld [vmem:[#allocation49_spill] sm:$0xff] }
 0x150   : > { %v6098_v24 = vpop.permute.xlu1 %1024 }
 0x151   : > { %9199 = vst [vmem:[#allocation121_spill] sm:$0xff] %v6098_v24  ;;  %v6103_v62 = vpop.permute.xlu0 %1022 }
 0x152   : > { %9201 = vst [vmem:[#allocation123_spill] sm:$0xff] %v6103_v62  ;;  %1182 = vrot.lane.b32.xlu1 %v6096_v1, %s4943_s30 }
 0x153   : > { %1180 = vrot.lane.b32.xlu0 %v6101_v9, %s4943_s30 }
 0x154   : > { %v6109_v28 = vpop.permute.xlu1 %1028 }
 0x155   : > { %9202 = vst [vmem:[#allocation124_spill] sm:$0xff] %v6109_v28  ;;  %v6111_v43 = vpop.permute.xlu0 %1026 }
 0x156   : > { %9203 = vst [vmem:[#allocation125_spill] sm:$0xff] %v6111_v43  ;;  %1227 = vrot.lane.b32.xlu1 %v5557_v27, %s4944_s8  ;;  %v9208_v27 = vld [vmem:[#allocation42_spill] sm:$0xff] }
 0x157   : > { %1225 = vrot.lane.b32.xlu0 %v5562_v37, %s4944_s8 }
 0x158   : > { %v6117_v46 = vpop.permute.xlu1 %1032 }
 0x159   : > { %9204 = vst [vmem:[#allocation126_spill] sm:$0xff] %v6117_v46  ;;  %v6119_v17 = vpop.permute.xlu0 %1030 }
 0x15a   : > { %9205 = vst [vmem:[#allocation127_spill] sm:$0xff] %v6119_v17  ;;  %1231 = vrot.lane.b32.xlu1 %v5572_v29, %s4944_s8  ;;  %v9211_v17 = vld [vmem:[#allocation43_spill] sm:$0xff] }
 0x15b   : > { %1229 = vrot.lane.b32.xlu0 %v5579_v30, %s4944_s8 }
 0x15c   : > { %v6125_v8 = vpop.permute.xlu1 %1036 }
 0x15d   : > { %9206 = vst [vmem:[#allocation128_spill] sm:$0xff] %v6125_v8  ;;  %v6127_v43 = vpop.permute.xlu0 %1034 }
 0x15e   : > { %9207 = vst [vmem:[#allocation129_spill] sm:$0xff] %v6127_v43  ;;  %1235 = vrot.lane.b32.xlu1 %v5587_v14, %s4944_s8  ;;  %v9214_v43 = vld [vmem:[#allocation44_spill] sm:$0xff] }
 0x15f   : > { %1233 = vrot.lane.b32.xlu0 %v9208_v27, %s4944_s8 }
 0x160   : > { %v6133_v37 = vpop.permute.xlu1 %1040 }
 0x161   : > { %9209 = vst [vmem:[#allocation42_spill] sm:$0xff] %v6133_v37  ;;  %v6135_v46 = vpop.permute.xlu0 %1038 }
 0x162   : > { %9210 = vst [vmem:[#allocation130_spill] sm:$0xff] %v6135_v46  ;;  %1239 = vrot.lane.b32.xlu1 %v5600_v32, %s4944_s8  ;;  %v9217_v46 = vld [vmem:[#allocation45_spill] sm:$0xff] }
 0x163   : > { %1237 = vrot.lane.b32.xlu0 %v9211_v17, %s4944_s8 }
 0x164   : > { %v6141_v28 = vpop.permute.xlu1 %1044 }
 0x165   : > { %9212 = vst [vmem:[#allocation43_spill] sm:$0xff] %v6141_v28  ;;  %v6143_v8 = vpop.permute.xlu0 %1042 }
 0x166   : > { %9213 = vst [vmem:[#allocation131_spill] sm:$0xff] %v6143_v8  ;;  %1243 = vrot.lane.b32.xlu1 %v5613_v42, %s4944_s8  ;;  %v9220_v8 = vld [vmem:[#allocation46_spill] sm:$0xff] }
 0x167   : > { %1241 = vrot.lane.b32.xlu0 %v9214_v43, %s4944_s8 }
 0x168   : > { %v6149_v9 = vpop.permute.xlu1 %1048 }
 0x169   : > { %9215 = vst [vmem:[#allocation44_spill] sm:$0xff] %v6149_v9  ;;  %v6151_v37 = vpop.permute.xlu0 %1046 }
 0x16a   : > { %9216 = vst [vmem:[#allocation132_spill] sm:$0xff] %v6151_v37  ;;  %1247 = vrot.lane.b32.xlu1 %v5626_v61, %s4944_s8  ;;  %v9223_v37 = vld [vmem:[#allocation47_spill] sm:$0xff] }
 0x16b   : > { %1245 = vrot.lane.b32.xlu0 %v9217_v46, %s4944_s8 }
 0x16c   : > { %v6157_v1 = vpop.permute.xlu1 %1052 }
 0x16d   : > { %9218 = vst [vmem:[#allocation45_spill] sm:$0xff] %v6157_v1  ;;  %v6159_v28 = vpop.permute.xlu0 %1050 }
 0x16e   : > { %9219 = vst [vmem:[#allocation133_spill] sm:$0xff] %v6159_v28  ;;  %1251 = vrot.lane.b32.xlu1 %v5639_v35, %s4944_s8  ;;  %v9226_v28 = vld [vmem:[#allocation48_spill] sm:$0xff] }
 0x16f   : > { %1249 = vrot.lane.b32.xlu0 %v9220_v8, %s4944_s8 }
 0x170   : > { %v6165_v62 = vpop.permute.xlu1 %1056 }
 0x171   : > { %9221 = vst [vmem:[#allocation46_spill] sm:$0xff] %v6165_v62  ;;  %v6167_v9 = vpop.permute.xlu0 %1054 }
 0x172   : > { %9222 = vst [vmem:[#allocation134_spill] sm:$0xff] %v6167_v9  ;;  %1255 = vrot.lane.b32.xlu1 %v5652_v48, %s4944_s8  ;;  %v9230_v9 = vld [vmem:[#allocation50_spill] sm:$0xff] }
 0x173   : > { %1253 = vrot.lane.b32.xlu0 %v9223_v37, %s4944_s8 }
 0x174   : > { %v6173_v24 = vpop.permute.xlu1 %1060 }
 0x175   : > { %9224 = vst [vmem:[#allocation47_spill] sm:$0xff] %v6173_v24  ;;  %v6175_v1 = vpop.permute.xlu0 %1058 }
 0x176   : > { %9225 = vst [vmem:[#allocation135_spill] sm:$0xff] %v6175_v1  ;;  %1259 = vrot.lane.b32.xlu1 %v9226_v28, %s4944_s8  ;;  %v9233_v1 = vld [vmem:[#allocation52_spill] sm:$0xff] }
 0x177   : > { %1257 = vrot.lane.b32.xlu0 %v9227_v53, %s4944_s8 }
 0x178   : > { %v6181_v12 = vpop.permute.xlu1 %1064 }
 0x179   : > { %9228 = vst [vmem:[#allocation48_spill] sm:$0xff] %v6181_v12  ;;  %v6183_v62 = vpop.permute.xlu0 %1062 }
 0x17a   : > { %9229 = vst [vmem:[#allocation49_spill] sm:$0xff] %v6183_v62  ;;  %1263 = vrot.lane.b32.xlu1 %v5678_v19, %s4944_s8  ;;  %v9234_v62 = vld [vmem:[#allocation56_spill] sm:$0xff] }
 0x17b   : > { %1261 = vrot.lane.b32.xlu0 %v9230_v9, %s4944_s8 }
 0x17c   : > { %v6189_v60 = vpop.permute.xlu1 %1068 }
 0x17d   : > { %9231 = vst [vmem:[#allocation50_spill] sm:$0xff] %v6189_v60  ;;  %v6191_v24 = vpop.permute.xlu0 %1066 }
 0x17e   : > { %9232 = vst [vmem:[#allocation136_spill] sm:$0xff] %v6191_v24  ;;  %1267 = vrot.lane.b32.xlu1 %v5691_v39, %s4944_s8  ;;  %v9236_v24 = vld [vmem:[#allocation60_spill] sm:$0xff] }
 0x17f   : > { %1265 = vrot.lane.b32.xlu0 %v9233_v1, %s4944_s8 }
 0x180   : > { %v6197_v59 = vpop.permute.xlu1 %1114 }
 0x181   : > { %v6199_v12 = vpop.permute.xlu0 %1112 }
 0x182   : > { %1271 = vrot.lane.b32.xlu1 %v5708_v52, %s4944_s8  ;;  %v9239_v52 = vld [vmem:[#allocation64_spill] sm:$0xff] }
 0x183   : > { %1269 = vrot.lane.b32.xlu0 %v9234_v62, %s4944_s8 }
 0x184   : > { %v6205_v2 = vpop.permute.xlu1 %1118 }
 0x185   : > { %9235 = vst [vmem:[#allocation52_spill] sm:$0xff] %v6205_v2  ;;  %v6207_v60 = vpop.permute.xlu0 %1116 }
 0x186   : > { %1275 = vrot.lane.b32.xlu1 %v5725_v6, %s4944_s8  ;;  %v9242_v6 = vld [vmem:[#allocation68_spill] sm:$0xff] }
 0x187   : > { %1273 = vrot.lane.b32.xlu0 %v9236_v24, %s4944_s8 }
 0x188   : > { %v6213_v16 = vpop.permute.xlu1 %1122 }
 0x189   : > { %9237 = vst [vmem:[#allocation137_spill] sm:$0xff] %v6213_v16  ;;  %v6215_v13 = vpop.permute.xlu0 %1120 }
 0x18a   : > { %1279 = vrot.lane.b32.xlu1 %v9238_v18, %s4944_s8  ;;  %v1221_v18 = vrot.slane %v5942_v23, 2 }
 0x18b   : > { %1277 = vrot.lane.b32.xlu0 %v9239_v52, %s4944_s8 }
 0x18c   : > { %v6221_v62 = vpop.permute.xlu1 %1126 }
 0x18d   : > { %9240 = vst [vmem:[#allocation64_spill] sm:$0xff] %v6221_v62  ;;  %v6223_v2 = vpop.permute.xlu0 %1124 }
 0x18e   : > { %9241 = vst [vmem:[#allocation138_spill] sm:$0xff] %v6223_v2  ;;  %1283 = vrot.lane.b32.xlu1 %v5759_v15, %s4944_s8  ;;  %v1223_v2 = vrot.slane %v6076_v45, 2  ;;  %v538_v15 = vld [vmem:[%s8881_s2] sm:$0xff] }
 0x18f   : > { %1281 = vrot.lane.b32.xlu0 %v9242_v6, %s4944_s8 }
 0x190   : > { %v6229_v24 = vpop.permute.xlu1 %1130  ;;  %v6255_v45 = vsel %vm797_vm3, %v1221_v18, %v1223_v2 }
 0x191   : > { %9243 = vst [vmem:[#allocation139_spill] sm:$0xff] %v6229_v24  ;;  %v6231_v16 = vpop.permute.xlu0 %1128  ;;  %v539_v24 = vld [vmem:[%s8881_s2 + $0x8] sm:$0xff]  ;;  %9246 = vst [vmem:[#allocation142_spill] sm:$0xff] %v6255_v45 }
 0x192   : > { %9244 = vst [vmem:[#allocation140_spill] sm:$0xff] %v6231_v16  ;;  %1287 = vrot.lane.b32.xlu1 %v5776_v44, %s4944_s8  ;;  %v1220_v16 = vrot.slane %v5946_v54, 2  ;;  %v4692_v44 = vpack.c.bf16 %v539_v24, %v538_v15  ;;  %v540_v54 = vld [vmem:[%s8881_s2 + $0x10] sm:$0xff]  ;;  %v541_v15 = vld [vmem:[%s8881_s2 + $0x18] sm:$0xff] }
 0x193   : > { %1285 = vrot.lane.b32.xlu0 %v5783_v41, %s4944_s8 }
 0x194   : > { %v6246_v6 = vpop.permute.xlu1 %1134  ;;  %4693 = vmatprep.subr.bf16.mxu0 %v4692_v44  ;;  %v6266_v23 = vsel %vm797_vm3, %v1220_v16, %v1221_v18  ;;  %v542_v18 = vld [vmem:[%s8881_s2 + $0x20] sm:$0xf]  ;;  %v6285_v16 = vld [vmem:[#allocation2 + $0x30] sm:$0xff] }
 0x195   : > { %v6248_v62 = vpop.permute.xlu0 %1132  ;;  %4695 = vmatpush3.bf16.msra.mxu0 %v4692_v44  ;;  %9247 = vst [vmem:[#allocation143_spill] sm:$0xff] %v6266_v23 }
 0x196   : > { %9245 = vst [vmem:[#allocation141_spill] sm:$0xff] %v6248_v62  ;;  %1291 = vrot.lane.b32.xlu1 %v5793_v21, %s4944_s8  ;;  %v4696_v21 = vpack.c.bf16 %v541_v15, %v540_v54  ;;  %v6281_v54 = vld [vmem:[#allocation2 + $0x38] sm:$0xff] }
 0x197   : > { %1289 = vrot.lane.b32.xlu0 %v5798_v0, %s4944_s8 }
 0x198   : > { %v6263_v24 = vpop.permute.xlu1 %1138  ;;  %4697 = vmatprep.subr.bf16.mxu0 %v4696_v21 }
 0x199   : > { %v6268_v62 = vpop.permute.xlu0 %1136  ;;  %4699 = vmatpush3.bf16.msra.mxu0 %v4696_v21 }
 0x19a   : > { %1295 = vrot.lane.b32.xlu1 %v6255_v45, %s4944_s8  ;;  %4570 = vmatprep.subr.msk.mxu0 %vm2080_vm4, %v542_v18 }
 0x19b   : > { %1293 = vrot.lane.b32.xlu0 %v6266_v23, %s4944_s8  ;;  %s4946_s8 = smov 28  }
 0x19c   : > { %v6274_v2 = vpop.permute.xlu1 %1142 }
 0x19d   : > { %9248 = vst [vmem:[#allocation144_spill] sm:$0xff] %v6274_v2  ;;  %v6276_v44 = vpop.permute.xlu0 %1140  ;;  %4571 = vmatpush3.msk.msra.mxu0 %vm2080_vm4, %v542_v18  ;;  %v6297_v2 = vld [vmem:[#allocation2 + $0x48] sm:$0xff]  ;;  %vm3742_vm4 = vcmask 523264  }
 0x19e   : > { %9249 = vst [vmem:[#allocation145_spill] sm:$0xff] %v6276_v44  ;;  %1337 = vrot.lane.b32.xlu1 %v6281_v54, %s4945_s11  ;;  %v6293_v44 = vld [vmem:[#allocation2 + $0x50] sm:$0xff] }
 0x19f   : > { %1335 = vrot.lane.b32.xlu0 %v6285_v16, %s4945_s11 }
 0x1a0   : > { %v6289_v21 = vpop.permute.xlu1 %1146 }
 0x1a1   : > { %9250 = vst [vmem:[#allocation146_spill] sm:$0xff] %v6289_v21  ;;  %v6291_v15 = vpop.permute.xlu0 %1144 }
 0x1a2   : > { %9251 = vst [vmem:[#allocation147_spill] sm:$0xff] %v6291_v15  ;;  %1341 = vrot.lane.b32.xlu1 %v6293_v44, %s4945_s11 }
 0x1a3   : > { %1339 = vrot.lane.b32.xlu0 %v6297_v2, %s4945_s11 }
 0x1a4   : > { %v6301_v23 = vpop.permute.xlu1 %1150 }
 0x1a5   : > { %9252 = vst [vmem:[#allocation148_spill] sm:$0xff] %v6301_v23  ;;  %v6303_v45 = vpop.permute.xlu0 %1148 }
 0x1a6   : > { %9253 = vst [vmem:[#allocation149_spill] sm:$0xff] %v6303_v45  ;;  %1451 = vrot.lane.b32.xlu1 %v9141_v22, %s4946_s8 }
 0x1a7   : > { %1449 = vrot.lane.b32.xlu0 %v9142_v20, %s4946_s8 }
 0x1a8   : > { %v6309_v18 = vpop.permute.xlu1 %1154 }
 0x1a9   : > { %9254 = vst [vmem:[#allocation150_spill] sm:$0xff] %v6309_v18  ;;  %v6311_v15 = vpop.permute.xlu0 %1152  ;;  %v402_v18 = vld [vmem:[%s5131_s16 + $0x38] sm:$0xff] }
 0x1aa   : > { %9255 = vst [vmem:[#allocation151_spill] sm:$0xff] %v6311_v15  ;;  %1564 = vrot.lane.b32.xlu1 %v5572_v29, %s4947_s12  ;;  %v401_v15 = vld [vmem:[%s5131_s16 + $0x30] sm:$0xff]  ;;  %477 = vst.msk [vmem:[#allocation2 + $0x1d1] sm:$0xff] %vm403_vm1, %v402_v18  ;;  %s4948_s16 = smov 40  }
 0x1ab   : > { %1562 = vrot.lane.b32.xlu0 %v5579_v30, %s4947_s12  ;;  %476 = vst.msk [vmem:[#allocation2 + $0x1c9] sm:$0xff] %vm403_vm1, %v401_v15 }
 0x1ac   : > { %v6317_v23 = vpop.permute.xlu1 %1158 }
 0x1ad   : > { %9256 = vst [vmem:[#allocation152_spill] sm:$0xff] %v6317_v23  ;;  %v6319_v45 = vpop.permute.xlu0 %1156 }
 0x1ae   : > { %9257 = vst [vmem:[#allocation153_spill] sm:$0xff] %v6319_v45  ;;  %1455 = vrot.lane.b32.xlu1 %v9145_v57, %s4946_s8  ;;  %v6337_v45 = vld [vmem:[#allocation2 + $0x68] sm:$0xff]  ;;  %v6341_v57 = vld [vmem:[#allocation2 + $0x60] sm:$0xff] }
 0x1af   : > { %1453 = vrot.lane.b32.xlu0 %v9146_v10, %s4946_s8 }
 0x1b0   : > { %v6325_v20 = vpop.permute.xlu1 %1162 }
 0x1b1   : > { %9258 = vst [vmem:[#allocation154_spill] sm:$0xff] %v6325_v20  ;;  %v6327_v22 = vpop.permute.xlu0 %1160 }
 0x1b2   : > { %9259 = vst [vmem:[#allocation155_spill] sm:$0xff] %v6327_v22  ;;  %1568 = vrot.lane.b32.xlu1 %v5587_v14, %s4947_s12 }
 0x1b3   : > { %1566 = vrot.lane.b32.xlu0 %v9208_v27, %s4947_s12 }
 0x1b4   : > { %v6333_v29 = vpop.permute.xlu1 %1166 }
 0x1b5   : > { %9260 = vst [vmem:[#allocation156_spill] sm:$0xff] %v6333_v29  ;;  %v6335_v30 = vpop.permute.xlu0 %1164 }
 0x1b6   : > { %9261 = vst [vmem:[#allocation157_spill] sm:$0xff] %v6335_v30  ;;  %1345 = vrot.lane.b32.xlu1 %v6337_v45, %s4945_s11 }
 0x1b7   : > { %1343 = vrot.lane.b32.xlu0 %v6341_v57, %s4945_s11 }
 0x1b8   : > { %v6345_v10 = vpop.permute.xlu1 %1170 }
 0x1b9   : > { %9262 = vst [vmem:[#allocation158_spill] sm:$0xff] %v6345_v10  ;;  %v6347_v14 = vpop.permute.xlu0 %1168 }
 0x1ba   : > { %9263 = vst [vmem:[#allocation159_spill] sm:$0xff] %v6347_v14  ;;  %1459 = vrot.lane.b32.xlu1 %v9149_v49, %s4946_s8  ;;  %v6365_v14 = vld [vmem:[#allocation2 + $0x80] sm:$0xff] }
 0x1bb   : > { %1457 = vrot.lane.b32.xlu0 %v9150_v47, %s4946_s8  ;;  %v6369_v47 = vld [vmem:[#allocation2 + $0x78] sm:$0xff] }
 0x1bc   : > { %v6353_v27 = vpop.permute.xlu1 %1174 }
 0x1bd   : > { %9264 = vst [vmem:[#allocation160_spill] sm:$0xff] %v6353_v27  ;;  %v6355_v30 = vpop.permute.xlu0 %1172 }
 0x1be   : > { %9265 = vst [vmem:[#allocation161_spill] sm:$0xff] %v6355_v30  ;;  %1572 = vrot.lane.b32.xlu1 %v5600_v32, %s4947_s12 }
 0x1bf   : > { %1570 = vrot.lane.b32.xlu0 %v9211_v17, %s4947_s12 }
 0x1c0   : > { %v6361_v29 = vpop.permute.xlu1 %1178 }
 0x1c1   : > { %9266 = vst [vmem:[#allocation162_spill] sm:$0xff] %v6361_v29  ;;  %v6363_v10 = vpop.permute.xlu0 %1176 }
 0x1c2   : > { %9267 = vst [vmem:[#allocation163_spill] sm:$0xff] %v6363_v10  ;;  %1349 = vrot.lane.b32.xlu1 %v6365_v14, %s4945_s11 }
 0x1c3   : > { %1347 = vrot.lane.b32.xlu0 %v6369_v47, %s4945_s11 }
 0x1c4   : > { %v6373_v49 = vpop.permute.xlu1 %1182 }
 0x1c5   : > { %9268 = vst [vmem:[#allocation164_spill] sm:$0xff] %v6373_v49  ;;  %v6375_v32 = vpop.permute.xlu0 %1180 }
 0x1c6   : > { %9269 = vst [vmem:[#allocation165_spill] sm:$0xff] %v6375_v32  ;;  %1463 = vrot.lane.b32.xlu1 %v9153_v26, %s4946_s8  ;;  %v6393_v32 = vld [vmem:[#allocation2 + $0x98] sm:$0xff] }
 0x1c7   : > { %1461 = vrot.lane.b32.xlu0 %v9154_v25, %s4946_s8  ;;  %v6397_v25 = vld [vmem:[#allocation2 + $0x90] sm:$0xff] }
 0x1c8   : > { %v6381_v17 = vpop.permute.xlu1 %1227 }
 0x1c9   : > { %v6383_v10 = vpop.permute.xlu0 %1225 }
 0x1ca   : > { %1576 = vrot.lane.b32.xlu1 %v5613_v42, %s4947_s12 }
 0x1cb   : > { %1574 = vrot.lane.b32.xlu0 %v9214_v43, %s4947_s12 }
 0x1cc   : > { %v6389_v29 = vpop.permute.xlu1 %1231 }
 0x1cd   : > { %v6391_v49 = vpop.permute.xlu0 %1229 }
 0x1ce   : > { %1353 = vrot.lane.b32.xlu1 %v6393_v32, %s4945_s11 }
 0x1cf   : > { %1351 = vrot.lane.b32.xlu0 %v6397_v25, %s4945_s11 }
 0x1d0   : > { %v6401_v26 = vpop.permute.xlu1 %1235 }
 0x1d1   : > { %v6403_v42 = vpop.permute.xlu0 %1233 }
 0x1d2   : > { %1467 = vrot.lane.b32.xlu1 %v9157_v55, %s4946_s8  ;;  %v6421_v55 = vld [vmem:[#allocation2 + $0xb0] sm:$0xff] }
 0x1d3   : > { %1465 = vrot.lane.b32.xlu0 %v9158_v63, %s4946_s8  ;;  %v6425_v63 = vld [vmem:[#allocation2 + $0xa8] sm:$0xff] }
 0x1d4   : > { %v6409_v43 = vpop.permute.xlu1 %1239  ;;  %9270 = vst [vmem:[#allocation166_spill] sm:$0xff] %v6425_v63 }
 0x1d5   : > { %v6411_v30 = vpop.permute.xlu0 %1237 }
 0x1d6   : > { %1580 = vrot.lane.b32.xlu1 %v5626_v61, %s4947_s12 }
 0x1d7   : > { %1578 = vrot.lane.b32.xlu0 %v9217_v46, %s4947_s12 }
 0x1d8   : > { %v6417_v27 = vpop.permute.xlu1 %1243 }
 0x1d9   : > { %v6419_v22 = vpop.permute.xlu0 %1241 }
 0x1da   : > { %1357 = vrot.lane.b32.xlu1 %v6421_v55, %s4945_s11 }
 0x1db   : > { %1355 = vrot.lane.b32.xlu0 %v6425_v63, %s4945_s11  ;;  %v6457_v63 = vld [vmem:[#allocation2 + $0xc0] sm:$0xff] }
 0x1dc   : > { %v6429_v20 = vpop.permute.xlu1 %1247  ;;  %9271 = vst [vmem:[#allocation167_spill] sm:$0xff] %v6457_v63 }
 0x1dd   : > { %v6431_v61 = vpop.permute.xlu0 %1245 }
 0x1de   : > { %1471 = vrot.lane.b32.xlu1 %v9161_v36, %s4946_s8 }
 0x1df   : > { %1469 = vrot.lane.b32.xlu0 %v9162_v56, %s4946_s8  ;;  %v6453_v56 = vld [vmem:[#allocation2 + $0xc8] sm:$0xff] }
 0x1e0   : > { %v6437_v46 = vpop.permute.xlu1 %1251 }
 0x1e1   : > { %v6439_v23 = vpop.permute.xlu0 %1249 }
 0x1e2   : > { %1584 = vrot.lane.b32.xlu1 %v5639_v35, %s4947_s12 }
 0x1e3   : > { %1582 = vrot.lane.b32.xlu0 %v9220_v8, %s4947_s12 }
 0x1e4   : > { %v6449_v36 = vpop.permute.xlu1 %1255 }
 0x1e5   : > { %v6451_v21 = vpop.permute.xlu0 %1253 }
 0x1e6   : > { %1361 = vrot.lane.b32.xlu1 %v6453_v56, %s4945_s11 }
 0x1e7   : > { %1359 = vrot.lane.b32.xlu0 %v6457_v63, %s4945_s11 }
 0x1e8   : > { %v6461_v35 = vpop.permute.xlu1 %1259 }
 0x1e9   : > { %9272 = vst [vmem:[#allocation168_spill] sm:$0xff] %v6461_v35  ;;  %v6463_v8 = vpop.permute.xlu0 %1257 }
 0x1ea   : > { %9273 = vst [vmem:[#allocation169_spill] sm:$0xff] %v6463_v8  ;;  %1475 = vrot.lane.b32.xlu1 %v9165_v51, %s4946_s8  ;;  %v6481_v8 = vld [vmem:[#allocation2 + $0xe0] sm:$0xff] }
 0x1eb   : > { %1473 = vrot.lane.b32.xlu0 %v9166_v38, %s4946_s8  ;;  %v6485_v38 = vld [vmem:[#allocation2 + $0xd8] sm:$0xff] }
 0x1ec   : > { %v6469_v15 = vpop.permute.xlu1 %1263 }
 0x1ed   : > { %v6471_v18 = vpop.permute.xlu0 %1261 }
 0x1ee   : > { %1588 = vrot.lane.b32.xlu1 %v5652_v48, %s4947_s12 }
 0x1ef   : > { %1586 = vrot.lane.b32.xlu0 %v9223_v37, %s4947_s12 }
 0x1f0   : > { %v6477_v63 = vpop.permute.xlu1 %1267 }
 0x1f1   : > { %9274 = vst [vmem:[#allocation170_spill] sm:$0xff] %v6477_v63  ;;  %v6479_v35 = vpop.permute.xlu0 %1265 }
 0x1f2   : > { %9275 = vst [vmem:[#allocation171_spill] sm:$0xff] %v6479_v35  ;;  %1365 = vrot.lane.b32.xlu1 %v6481_v8, %s4945_s11 }
 0x1f3   : > { %1363 = vrot.lane.b32.xlu0 %v6485_v38, %s4945_s11 }
 0x1f4   : > { %v6489_v51 = vpop.permute.xlu1 %1271 }
 0x1f5   : > { %9276 = vst [vmem:[#allocation172_spill] sm:$0xff] %v6489_v51  ;;  %v6491_v48 = vpop.permute.xlu0 %1269 }
 0x1f6   : > { %9277 = vst [vmem:[#allocation173_spill] sm:$0xff] %v6491_v48  ;;  %1479 = vrot.lane.b32.xlu1 %v9169_v40, %s4946_s8  ;;  %v6509_v48 = vld [vmem:[#allocation2 + $0xf8] sm:$0xff] }
 0x1f7   : > { %1477 = vrot.lane.b32.xlu0 %v9170_v34, %s4946_s8  ;;  %v6513_v34 = vld [vmem:[#allocation2 + $0xf0] sm:$0xff] }
 0x1f8   : > { %v6497_v37 = vpop.permute.xlu1 %1275 }
 0x1f9   : > { %9278 = vst [vmem:[#allocation174_spill] sm:$0xff] %v6497_v37  ;;  %v6499_v35 = vpop.permute.xlu0 %1273  ;;  %v6567_v37 = vld [vmem:[#allocation2 + $0x120] sm:$0xff] }
 0x1fa   : > { %9279 = vst [vmem:[#allocation175_spill] sm:$0xff] %v6499_v35  ;;  %1592 = vrot.lane.b32.xlu1 %v9226_v28, %s4947_s12  ;;  %v9292_v35 = vld [vmem:[#allocation53_spill] sm:$0xff] }
 0x1fb   : > { %1590 = vrot.lane.b32.xlu0 %v9227_v53, %s4947_s12  ;;  %9293 = vst [vmem:[#allocation53_spill] sm:$0xff] %v6567_v37 }
 0x1fc   : > { %v6505_v63 = vpop.permute.xlu1 %1279 }
 0x1fd   : > { %9280 = vst [vmem:[#allocation176_spill] sm:$0xff] %v6505_v63  ;;  %v6507_v51 = vpop.permute.xlu0 %1277 }
 0x1fe   : > { %9281 = vst [vmem:[#allocation177_spill] sm:$0xff] %v6507_v51  ;;  %1369 = vrot.lane.b32.xlu1 %v6509_v48, %s4945_s11 }
 0x1ff   : > { %1367 = vrot.lane.b32.xlu0 %v6513_v34, %s4945_s11 }
 0x200   : > { %v6517_v40 = vpop.permute.xlu1 %1283 }
 0x201   : > { %9282 = vst [vmem:[#allocation178_spill] sm:$0xff] %v6517_v40  ;;  %v6519_v28 = vpop.permute.xlu0 %1281 }
 0x202   : > { %9283 = vst [vmem:[#allocation179_spill] sm:$0xff] %v6519_v28  ;;  %1483 = vrot.lane.b32.xlu1 %v9173_v58, %s4946_s8  ;;  %v6537_v28 = vld [vmem:[#allocation2 + $0x110] sm:$0xff]  ;;  %v6541_v58 = vld [vmem:[#allocation2 + $0x108] sm:$0xff] }
 0x203   : > { %1481 = vrot.lane.b32.xlu0 %v9174_v31, %s4946_s8 }
 0x204   : > { %v6525_v53 = vpop.permute.xlu1 %1287 }
 0x205   : > { %9284 = vst [vmem:[#allocation180_spill] sm:$0xff] %v6525_v53  ;;  %v6527_v51 = vpop.permute.xlu0 %1285 }
 0x206   : > { %9285 = vst [vmem:[#allocation181_spill] sm:$0xff] %v6527_v51  ;;  %1596 = vrot.lane.b32.xlu1 %v5678_v19, %s4947_s12  ;;  %v4805_v51 = vld [vmem:[#allocation2 + $0x8] sm:$0xff] }
 0x207   : > { %1594 = vrot.lane.b32.xlu0 %v9230_v9, %s4947_s12 }
 0x208   : > { %v6533_v63 = vpop.permute.xlu1 %1291 }
 0x209   : > { %9286 = vst [vmem:[#allocation182_spill] sm:$0xff] %v6533_v63  ;;  %v6535_v40 = vpop.permute.xlu0 %1289 }
 0x20a   : > { %9287 = vst [vmem:[#allocation183_spill] sm:$0xff] %v6535_v40  ;;  %1373 = vrot.lane.b32.xlu1 %v6537_v28, %s4945_s11 }
 0x20b   : > { %1371 = vrot.lane.b32.xlu0 %v6541_v58, %s4945_s11 }
 0x20c   : > { %v6545_v31 = vpop.permute.xlu1 %1295 }
 0x20d   : > { %9288 = vst [vmem:[#allocation184_spill] sm:$0xff] %v6545_v31  ;;  %v6547_v19 = vpop.permute.xlu0 %1293 }
 0x20e   : > { %9289 = vst [vmem:[#allocation185_spill] sm:$0xff] %v6547_v19  ;;  %1487 = vrot.lane.b32.xlu1 %v9177_v11, %s4946_s8  ;;  %v9290_v19 = vld [vmem:[#allocation57_spill] sm:$0xff] }
 0x20f   : > { %1485 = vrot.lane.b32.xlu0 %v9178_v3, %s4946_s8  ;;  %v1671_v53 = vsel %vm403_vm1, %v4805_v51, %v9290_v19  ;;  %v6559_v11 = vld [vmem:[#allocation2 + $0x128] sm:$0xff]  ;;  %v4807_v3 = vld [vmem:[#allocation2] sm:$0xff] }
 0x210   : > { %v1338_v9 = vpop.permute.xlu1 %1337  ;;  %9291 = vst [vmem:[#allocation57_spill] sm:$0xff] %v6559_v11 }
 0x211   : > { %v1336_v40 = vpop.permute.xlu0 %1335 }
 0x212   : > { %1600 = vrot.lane.b32.xlu1 %v5691_v39, %s4947_s12  ;;  %v1670_v39 = vsel %vm403_vm1, %v4807_v3, %v9292_v35 }
 0x213   : > { %1598 = vrot.lane.b32.xlu0 %v9233_v1, %s4947_s12  ;;  %v1708_v1 = vsel %vm1706_vm5, %v1671_v53, %v5894_v5  ;;  %v1707_v51 = vsel %vm1706_vm5, %v1670_v39, %v5896_v7 }
 0x214   : > { %v1342_v63 = vpop.permute.xlu1 %1341  ;;  %v1745_v19 = vsel %vm1743_vm6, %v1708_v1, %v6042_v4  ;;  %v1744_v35 = vsel %vm1743_vm6, %v1707_v51, %v6044_v50  ;;  %v9294_v50 = vld [vmem:[#allocation30_spill] sm:$0xff]  ;;  %v4809_v51 = vld [vmem:[#allocation2 + $0x20] sm:$0xff] }
 0x215   : > { %v1340_v31 = vpop.permute.xlu0 %1339  ;;  %v1782_v5 = vsel %vm1780_vm7, %v1745_v19, %v6197_v59  ;;  %v1781_v3 = vsel %vm1780_vm7, %v1744_v35, %v6199_v12  ;;  %v9295_v19 = vld [vmem:[#allocation55_spill] sm:$0xff] }
 0x216   : > { %1377 = vrot.lane.b32.xlu1 %v6559_v11, %s4945_s11  ;;  %v1818_v7 = vsel %vm1817_vm8, %v1781_v3, %v6383_v10  ;;  %v1673_v10 = vsel %vm403_vm1, %v4809_v51, %v9295_v19  ;;  %v4810_v35 = vld [vmem:[#allocation2 + $0x18] sm:$0xff] }
 0x217   : > { %1375 = vrot.lane.b32.xlu0 %v6567_v37, %s4945_s11  ;;  %v1819_v37 = vsel %vm1817_vm8, %v1782_v5, %v6381_v17  ;;  %v1855_v59 = vsel %vm1854_vm9, %v1818_v7, %v1336_v40  ;;  %v9297_v40 = vld [vmem:[#allocation51_spill] sm:$0xff]  ;;  %v9298_v5 = vld [vmem:[#allocation97_spill] sm:$0xff]  ;;  %v9300_v7 = vld [vmem:[#allocation98_spill] sm:$0xff] }
 0x218   : > { %v1452_v11 = vpop.permute.xlu1 %1451  ;;  %v1856_v4 = vsel %vm1854_vm9, %v1819_v37, %v1338_v9  ;;  %v9296_v37 = vld [vmem:[#allocation54_spill] sm:$0xff]  ;;  %v1710_v3 = vsel %vm1706_vm5, %v1673_v10, %v9298_v5 }
 0x219   : > { %v1450_v53 = vpop.permute.xlu0 %1449  ;;  %v1893_v39 = vsel %vm1891_vm10, %v1856_v4, %v1452_v11  ;;  %v1672_v11 = vsel %vm403_vm1, %v4810_v35, %v9297_v40  ;;  %v6626_v40 = vld [vmem:[#allocation2 + $0x138] sm:$0xff] }
 0x21a   : > { %1491 = vrot.lane.b32.xlu1 %v9179_v33, %s4946_s8  ;;  %v1892_v17 = vsel %vm1891_vm10, %v1855_v59, %v1450_v53  ;;  %v9299_v53 = vld [vmem:[#allocation56_spill] sm:$0xff]  ;;  %v1709_v4 = vsel %vm1706_vm5, %v1672_v11, %v9300_v7 }
 0x21b   : > { %1489 = vrot.lane.b32.xlu0 %v9294_v50, %s4946_s8  ;;  %v9301_v50 = vld [vmem:[#allocation27_spill] sm:$0xff] }
 0x21c   : > { %v1565_v12 = vpop.permute.xlu1 %1564  ;;  %v1747_v59 = vsel %vm1743_vm6, %v1710_v3, %v9301_v50  ;;  %v9306_v50 = vld [vmem:[#allocation59_spill] sm:$0xff] }
 0x21d   : > { %v1930_v1 = vsel %vm1928_vm11, %v1893_v39, %v1565_v12  ;;  %v1563_v33 = vpop.permute.xlu0 %1562  ;;  %v9302_v12 = vld [vmem:[#allocation28_spill] sm:$0xff] }
 0x21e   : > { %1604 = vrot.lane.b32.xlu1 %v9296_v37, %s4947_s12  ;;  %v1929_v9 = vsel %vm1928_vm11, %v1892_v17, %v1563_v33  ;;  %v1746_v17 = vsel %vm1743_vm6, %v1709_v4, %v9302_v12  ;;  %v9303_v33 = vld [vmem:[#allocation52_spill] sm:$0xff]  ;;  %v9308_v12 = vld [vmem:[#allocation61_spill] sm:$0xff] }
 0x21f   : > { %1602 = vrot.lane.b32.xlu0 %v9299_v53, %s4947_s12  ;;  %4572 = vmatprep.mubr.msk.f32.mxu0 %vm1971_vm12, %v1929_v9  ;;  %v1784_v51 = vsel %vm1780_vm7, %v1747_v59, %v9303_v33  ;;  %v1783_v10 = vsel %vm1780_vm7, %v1746_v17, %v6207_v60  ;;  %v6619_v9 = vld [vmem:[#allocation2 + $0x140] sm:$0xff]  ;;  %v1675_v59 = vsel %vm403_vm1, %v6281_v54, %v9306_v50  ;;  %v9309_v33 = vld [vmem:[#allocation99_spill] sm:$0xff] }
 0x220   : > { %4573 = vmatmul.mubr.msk.f32.vlgmr.msra.gmra.mrb[0].mxu0 %vm1971_vm12, %v1930_v1  ;;  %v1456_v39 = vpop.permute.xlu1 %1455  ;;  %v1821_v37 = vsel %vm1817_vm8, %v1784_v51, %v6389_v29  ;;  %v1820_v1 = vsel %vm1817_vm8, %v1783_v10, %v6391_v49  ;;  %v9304_v49 = vld [vmem:[#allocation31_spill] sm:$0xff]  ;;  %v1674_v17 = vsel %vm403_vm1, %v6285_v16, %v9308_v12  ;;  %v1712_v51 = vsel %vm1706_vm5, %v1675_v59, %v9309_v33  ;;  %v9311_v10 = vld [vmem:[#allocation100_spill] sm:$0xff] }
 0x221   : > { %v1454_v19 = vpop.permute.xlu0 %1453  ;;  %v1858_v35 = vsel %vm1854_vm9, %v1821_v37, %v1342_v63  ;;  %v1857_v60 = vsel %vm1854_vm9, %v1820_v1, %v1340_v31  ;;  %v9305_v63 = vld [vmem:[#allocation32_spill] sm:$0xff]  ;;  %v1711_v37 = vsel %vm1706_vm5, %v1674_v17, %v9311_v10  ;;  %v9312_v1 = vld [vmem:[#allocation29_spill] sm:$0xff]  ;;  %v6672_v50 = vld [vmem:[#allocation2 + $0x150] sm:$0xff] }
 0x222   : > { %1381 = vrot.lane.b32.xlu1 %v6619_v9, %s4945_s11  ;;  %v1895_v11 = vsel %vm1891_vm10, %v1858_v35, %v1456_v39  ;;  %v1894_v5 = vsel %vm1891_vm10, %v1857_v60, %v1454_v19  ;;  %v9307_v39 = vld [vmem:[#allocation58_spill] sm:$0xff]  ;;  %v9310_v19 = vld [vmem:[#allocation60_spill] sm:$0xff]  ;;  %v1749_v35 = vsel %vm1743_vm6, %v1712_v51, %v9312_v1  ;;  %v9313_v60 = vld [vmem:[#allocation113_spill] sm:$0xff] }
 0x223   : > { %1379 = vrot.lane.b32.xlu0 %v6626_v40, %s4945_s11  ;;  %v9319_v1 = vld [vmem:[#allocation65_spill] sm:$0xff] }
 0x224   : > { %v1569_v29 = vpop.permute.xlu1 %1568 }
 0x225   : > { %v1932_v3 = vsel %vm1928_vm11, %v1895_v11, %v1569_v29  ;;  %v1567_v53 = vpop.permute.xlu0 %1566  ;;  %v1748_v11 = vsel %vm1743_vm6, %v1711_v37, %v9313_v60  ;;  %v9314_v29 = vld [vmem:[#allocation137_spill] sm:$0xff]  ;;  %v9318_v37 = vld [vmem:[#allocation62_spill] sm:$0xff] }
 0x226   : > { %v1931_v7 = vsel %vm1928_vm11, %v1894_v5, %v1567_v53  ;;  %1495 = vrot.lane.b32.xlu1 %v9304_v49, %s4946_s8  ;;  %v1786_v5 = vsel %vm1780_vm7, %v1749_v35, %v9314_v29  ;;  %v1676_v35 = vsel %vm403_vm1, %v6297_v2, %v9319_v1 }
 0x227   : > { %1493 = vrot.lane.b32.xlu0 %v9305_v63, %s4946_s8  ;;  %4575 = vmatprep.mubr.msk.f32.mxu0 %vm1971_vm12, %v1931_v7  ;;  %v1823_v53 = vsel %vm1817_vm8, %v1786_v5, %v6401_v26  ;;  %v6665_v7 = vld [vmem:[#allocation2 + $0x158] sm:$0xff]  ;;  %v9322_v5 = vld [vmem:[#allocation114_spill] sm:$0xff] }
 0x228   : > { %4576 = vmatmul.mubr.msk.f32.gmra.mrb[2].mxu0 %vm1971_vm12, %v1932_v3  ;;  %v1346_v31 = vpop.permute.xlu1 %1345  ;;  %v1785_v3 = vsel %vm1780_vm7, %v1748_v11, %v6215_v13  ;;  %v9321_v11 = vld [vmem:[#allocation102_spill] sm:$0xff] }
 0x229   : > { %v1344_v4 = vpop.permute.xlu0 %1343  ;;  %v1822_v49 = vsel %vm1817_vm8, %v1785_v3, %v6403_v42  ;;  %v1860_v63 = vsel %vm1854_vm9, %v1823_v53, %v1346_v31  ;;  %v9315_v42 = vld [vmem:[#allocation33_spill] sm:$0xff]  ;;  %v9316_v31 = vld [vmem:[#allocation34_spill] sm:$0xff]  ;;  %v1713_v29 = vsel %vm1706_vm5, %v1676_v35, %v9321_v11  ;;  %v9323_v3 = vld [vmem:[#allocation115_spill] sm:$0xff] }
 0x22a   : > { %1608 = vrot.lane.b32.xlu1 %v9307_v39, %s4947_s12  ;;  %v1859_v13 = vsel %vm1854_vm9, %v1822_v49, %v1344_v4  ;;  %v1750_v53 = vsel %vm1743_vm6, %v1713_v29, %v9323_v3  ;;  %v9324_v49 = vld [vmem:[#allocation64_spill] sm:$0xff]  ;;  %v9328_v35 = vld [vmem:[#allocation67_spill] sm:$0xff]  ;;  %v9330_v11 = vld [vmem:[#allocation69_spill] sm:$0xff] }
 0x22b   : > { %1606 = vrot.lane.b32.xlu0 %v9310_v19, %s4947_s12  ;;  %v9317_v19 = vld [vmem:[#allocation63_spill] sm:$0xff]  ;;  %v1678_v29 = vsel %vm403_vm1, %v6341_v57, %v9330_v11  ;;  %v9333_v3 = vld [vmem:[#allocation104_spill] sm:$0xff]  ;;  %v9340_v11 = vld [vmem:[#allocation37_spill] sm:$0xff] }
 0x22c   : > { %v1460_v54 = vpop.permute.xlu1 %1459  ;;  %v1677_v10 = vsel %vm403_vm1, %v6293_v44, %v9317_v19 }
 0x22d   : > { %v1458_v16 = vpop.permute.xlu0 %1457  ;;  %v1897_v59 = vsel %vm1891_vm10, %v1860_v63, %v1460_v54  ;;  %v9320_v54 = vld [vmem:[#allocation101_spill] sm:$0xff] }
 0x22e   : > { %1385 = vrot.lane.b32.xlu1 %v6665_v7, %s4945_s11  ;;  %v1896_v39 = vsel %vm1891_vm10, %v1859_v13, %v1458_v16  ;;  %v1714_v60 = vsel %vm1706_vm5, %v1677_v10, %v9320_v54  ;;  %v9325_v13 = vld [vmem:[#allocation138_spill] sm:$0xff]  ;;  %v1679_v54 = vsel %vm403_vm1, %v6337_v45, %v9328_v35 }
 0x22f   : > { %1383 = vrot.lane.b32.xlu0 %v6672_v50, %s4945_s11  ;;  %v1751_v16 = vsel %vm1743_vm6, %v1714_v60, %v9322_v5  ;;  %v9329_v60 = vld [vmem:[#allocation66_spill] sm:$0xff]  ;;  %v9331_v5 = vld [vmem:[#allocation103_spill] sm:$0xff] }
 0x230   : > { %v1573_v26 = vpop.permute.xlu1 %1572  ;;  %v1788_v63 = vsel %vm1780_vm7, %v1751_v16, %v9324_v49  ;;  %v1716_v16 = vsel %vm1706_vm5, %v1679_v54, %v9331_v5  ;;  %v9334_v49 = vld [vmem:[#allocation116_spill] sm:$0xff]  ;;  %v9341_v5 = vld [vmem:[#allocation70_spill] sm:$0xff] }
 0x231   : > { %v1934_v12 = vsel %vm1928_vm11, %v1897_v59, %v1573_v26  ;;  %v1571_v17 = vpop.permute.xlu0 %1570  ;;  %v1787_v59 = vsel %vm1780_vm7, %v1750_v53, %v9325_v13  ;;  %v6711_v26 = vld [vmem:[#allocation2 + $0x170] sm:$0xff]  ;;  %v1715_v53 = vsel %vm1706_vm5, %v1678_v29, %v9333_v3  ;;  %v1681_v29 = vsel %vm403_vm1, %v6365_v14, %v9340_v11  ;;  %v9343_v3 = vld [vmem:[#allocation105_spill] sm:$0xff] }
 0x232   : > { %v1933_v33 = vsel %vm1928_vm11, %v1896_v39, %v1571_v17  ;;  %1499 = vrot.lane.b32.xlu1 %v9315_v42, %s4946_s8  ;;  %v1824_v39 = vsel %vm1817_vm8, %v1787_v59, %v6411_v30  ;;  %v6718_v17 = vld [vmem:[#allocation2 + $0x168] sm:$0xff]  ;;  %v9326_v30 = vld [vmem:[#allocation35_spill] sm:$0xff] }
 0x233   : > { %1497 = vrot.lane.b32.xlu0 %v9316_v31, %s4946_s8  ;;  %4578 = vmatprep.mubr.msk.f32.mxu0 %vm1971_vm12, %v1933_v33  ;;  %v9336_v59 = vld [vmem:[#allocation139_spill] sm:$0xff]  ;;  %v9352_v11 = vld [vmem:[#allocation74_spill] sm:$0xff] }
 0x234   : > { %4579 = vmatmul.mubr.msk.f32.gmra.mrb[4].mxu0 %vm1971_vm12, %v1934_v12  ;;  %v1350_v4 = vpop.permute.xlu1 %1349 }
 0x235   : > { %v1348_v51 = vpop.permute.xlu0 %1347 }
 0x236   : > { %1612 = vrot.lane.b32.xlu1 %v9318_v37, %s4947_s12  ;;  %v1861_v33 = vsel %vm1854_vm9, %v1824_v39, %v1348_v51  ;;  %v9337_v39 = vld [vmem:[#allocation140_spill] sm:$0xff] }
 0x237   : > { %1610 = vrot.lane.b32.xlu0 %v9239_v52, %s4947_s12  ;;  %v1825_v52 = vsel %vm1817_vm8, %v1788_v63, %v6409_v43  ;;  %v1753_v63 = vsel %vm1743_vm6, %v1716_v16, %v9334_v49  ;;  %v9342_v16 = vld [vmem:[#allocation71_spill] sm:$0xff]  ;;  %v9344_v49 = vld [vmem:[#allocation106_spill] sm:$0xff] }
 0x238   : > { %v1464_v44 = vpop.permute.xlu1 %1463  ;;  %v1862_v12 = vsel %vm1854_vm9, %v1825_v52, %v1350_v4  ;;  %v9327_v4 = vld [vmem:[#allocation36_spill] sm:$0xff]  ;;  %v1790_v52 = vsel %vm1780_vm7, %v1753_v63, %v9336_v59 }
 0x239   : > { %v1462_v2 = vpop.permute.xlu0 %1461  ;;  %v1899_v42 = vsel %vm1891_vm10, %v1862_v12, %v1464_v44  ;;  %v9332_v44 = vld [vmem:[#allocation68_spill] sm:$0xff] }
 0x23a   : > { %1389 = vrot.lane.b32.xlu1 %v6711_v26, %s4945_s11  ;;  %v1898_v31 = vsel %vm1891_vm10, %v1861_v33, %v1462_v2  ;;  %v9335_v2 = vld [vmem:[#allocation117_spill] sm:$0xff]  ;;  %v1827_v33 = vsel %vm1817_vm8, %v1790_v52, %v6417_v27 }
 0x23b   : > { %1387 = vrot.lane.b32.xlu0 %v6718_v17, %s4945_s11  ;;  %v1752_v13 = vsel %vm1743_vm6, %v1715_v53, %v9335_v2  ;;  %v1718_v53 = vsel %vm1706_vm5, %v1681_v29, %v9343_v3  ;;  %v1682_v29 = vsel %vm403_vm1, %v6397_v25, %v9352_v11 }
 0x23c   : > { %v1577_v43 = vpop.permute.xlu1 %1576  ;;  %v1789_v12 = vsel %vm1780_vm7, %v1752_v13, %v9337_v39  ;;  %v9346_v13 = vld [vmem:[#allocation119_spill] sm:$0xff] }
 0x23d   : > { %v1936_v19 = vsel %vm1928_vm11, %v1899_v42, %v1577_v43  ;;  %v1575_v10 = vpop.permute.xlu0 %1574  ;;  %v6757_v42 = vld [vmem:[#allocation2 + $0x188] sm:$0xff]  ;;  %v1826_v43 = vsel %vm1817_vm8, %v1789_v12, %v6419_v22  ;;  %v6803_v12 = vld [vmem:[#allocation2 + $0x1a0] sm:$0xff] }
 0x23e   : > { %v1935_v37 = vsel %vm1928_vm11, %v1898_v31, %v1575_v10  ;;  %1503 = vrot.lane.b32.xlu1 %v9326_v30, %s4946_s8  ;;  %v9338_v22 = vld [vmem:[#allocation38_spill] sm:$0xff] }
 0x23f   : > { %1501 = vrot.lane.b32.xlu0 %v9327_v4, %s4946_s8  ;;  %4581 = vmatprep.mubr.msk.f32.mxu0 %vm1971_vm12, %v1935_v37 }
 0x240   : > { %4582 = vmatmul.mubr.msk.f32.gmra.mrb[6].mxu0 %vm1971_vm12, %v1936_v19  ;;  %v1354_v51 = vpop.permute.xlu1 %1353  ;;  %v6764_v19 = vld [vmem:[#allocation2 + $0x180] sm:$0xff] }
 0x241   : > { %v1352_v1 = vpop.permute.xlu0 %1351  ;;  %v1864_v31 = vsel %vm1854_vm9, %v1827_v33, %v1354_v51  ;;  %v9339_v51 = vld [vmem:[#allocation39_spill] sm:$0xff] }
 0x242   : > { %1616 = vrot.lane.b32.xlu1 %v9329_v60, %s4947_s12  ;;  %v1863_v10 = vsel %vm1854_vm9, %v1826_v43, %v1352_v1 }
 0x243   : > { %1614 = vrot.lane.b32.xlu0 %v9332_v44, %s4947_s12  ;;  %v1680_v44 = vsel %vm403_vm1, %v6369_v47, %v9342_v16 }
 0x244   : > { %v1468_v45 = vpop.permute.xlu1 %1467  ;;  %v1717_v63 = vsel %vm1706_vm5, %v1680_v44, %v9344_v49  ;;  %v9354_v44 = vld [vmem:[#allocation110_spill] sm:$0xff] }
 0x245   : > { %v1466_v57 = vpop.permute.xlu0 %1465  ;;  %v1901_v37 = vsel %vm1891_vm10, %v1864_v31, %v1468_v45  ;;  %v9345_v45 = vld [vmem:[#allocation118_spill] sm:$0xff]  ;;  %v1754_v59 = vsel %vm1743_vm6, %v1717_v63, %v9346_v13  ;;  %v6810_v31 = vld [vmem:[#allocation2 + $0x198] sm:$0xff]  ;;  %v1719_v3 = vsel %vm1706_vm5, %v1682_v29, %v9354_v44 }
 0x246   : > { %1393 = vrot.lane.b32.xlu1 %v6757_v42, %s4945_s11  ;;  %v1900_v30 = vsel %vm1891_vm10, %v1863_v10, %v1466_v57  ;;  %v1755_v2 = vsel %vm1743_vm6, %v1718_v53, %v9345_v45  ;;  %v9347_v57 = vld [vmem:[#allocation141_spill] sm:$0xff]  ;;  %v9356_v63 = vld [vmem:[#allocation123_spill] sm:$0xff] }
 0x247   : > { %1391 = vrot.lane.b32.xlu0 %v6764_v19, %s4945_s11  ;;  %v1792_v52 = vsel %vm1780_vm7, %v1755_v2, %v6246_v6  ;;  %v1791_v39 = vsel %vm1780_vm7, %v1754_v59, %v9347_v57  ;;  %v9355_v53 = vld [vmem:[#allocation121_spill] sm:$0xff]  ;;  %v1756_v45 = vsel %vm1743_vm6, %v1719_v3, %v9356_v63  ;;  %v9357_v13 = vld [vmem:[#allocation107_spill] sm:$0xff]  ;;  %v9370_v63 = vld [vmem:[#allocation144_spill] sm:$0xff] }
 0x248   : > { %v1581_v27 = vpop.permute.xlu1 %1580  ;;  %v1828_v33 = vsel %vm1817_vm8, %v1791_v39, %v6431_v61  ;;  %v9348_v61 = vld [vmem:[#allocation40_spill] sm:$0xff]  ;;  %v9367_v29 = vld [vmem:[#allocation143_spill] sm:$0xff]  ;;  %v9369_v3 = vld [vmem:[#allocation125_spill] sm:$0xff] }
 0x249   : > { %v1938_v4 = vsel %vm1928_vm11, %v1901_v37, %v1581_v27  ;;  %v1579_v35 = vpop.permute.xlu0 %1578 }
 0x24a   : > { %v1937_v54 = vsel %vm1928_vm11, %v1900_v30, %v1579_v35  ;;  %1507 = vrot.lane.b32.xlu1 %v9338_v22, %s4946_s8  ;;  %v9349_v35 = vld [vmem:[#allocation41_spill] sm:$0xff] }
 0x24b   : > { %1505 = vrot.lane.b32.xlu0 %v9339_v51, %s4946_s8  ;;  %4584 = vmatprep.mubr.msk.f32.mxu0 %vm1971_vm12, %v1937_v54  ;;  %v9350_v51 = vld [vmem:[#allocation73_spill] sm:$0xff] }
 0x24c   : > { %4585 = vmatmul.mubr.msk.f32.gmra.mrb[8].mxu0 %vm1971_vm12, %v1938_v4  ;;  %v1358_v1 = vpop.permute.xlu1 %1357 }
 0x24d   : > { %v1356_v60 = vpop.permute.xlu0 %1355 }
 0x24e   : > { %1620 = vrot.lane.b32.xlu1 %v9341_v5, %s4947_s12  ;;  %v1865_v6 = vsel %vm1854_vm9, %v1828_v33, %v1356_v60  ;;  %v9351_v60 = vld [vmem:[#allocation72_spill] sm:$0xff] }
 0x24f   : > { %1618 = vrot.lane.b32.xlu0 %v5783_v41, %s4947_s12  ;;  %v1829_v41 = vsel %vm1817_vm8, %v1792_v52, %v6429_v20  ;;  %v9353_v5 = vld [vmem:[#allocation108_spill] sm:$0xff] }
 0x250   : > { %v1472_v14 = vpop.permute.xlu1 %1471  ;;  %v1866_v43 = vsel %vm1854_vm9, %v1829_v41, %v1358_v1  ;;  %v1683_v1 = vsel %vm403_vm1, %v6393_v32, %v9350_v51  ;;  %v9365_v51 = vld [vmem:[#allocation111_spill] sm:$0xff] }
 0x251   : > { %v1470_v47 = vpop.permute.xlu0 %1469  ;;  %v1903_v10 = vsel %vm1891_vm10, %v1866_v43, %v1472_v14  ;;  %v1720_v16 = vsel %vm1706_vm5, %v1683_v1, %v9353_v5  ;;  %v1793_v14 = vsel %vm1780_vm7, %v1756_v45, %v6268_v62  ;;  %v9359_v43 = vld [vmem:[#allocation120_spill] sm:$0xff] }
 0x252   : > { %1397 = vrot.lane.b32.xlu1 %v6803_v12, %s4945_s11  ;;  %v1902_v37 = vsel %vm1891_vm10, %v1865_v6, %v1470_v47  ;;  %v1757_v49 = vsel %vm1743_vm6, %v1720_v16, %v9355_v53  ;;  %v1830_v59 = vsel %vm1817_vm8, %v1793_v14, %v6439_v23  ;;  %v9358_v47 = vld [vmem:[#allocation109_spill] sm:$0xff]  ;;  %v9360_v23 = vld [vmem:[#allocation122_spill] sm:$0xff]  ;;  %v9368_v16 = vld [vmem:[#allocation124_spill] sm:$0xff] }
 0x253   : > { %1395 = vrot.lane.b32.xlu0 %v6810_v31, %s4945_s11  ;;  %v1794_v2 = vsel %vm1780_vm7, %v1757_v49, %v6263_v24 }
 0x254   : > { %v1585_v20 = vpop.permute.xlu1 %1584 }
 0x255   : > { %v1940_v27 = vsel %vm1928_vm11, %v1903_v10, %v1585_v20  ;;  %v1583_v30 = vpop.permute.xlu0 %1582  ;;  %v6867_v10 = vld [vmem:[#allocation2 + $0x1d0] sm:$0xff]  ;;  %v6869_v20 = vld [vmem:[#allocation2 + $0x1d8] sm:$0x3] }
 0x256   : > { %v1939_v4 = vsel %vm1928_vm11, %v1902_v37, %v1583_v30  ;;  %1511 = vrot.lane.b32.xlu1 %v9348_v61, %s4946_s8  ;;  %v9361_v30 = vld [vmem:[#allocation75_spill] sm:$0xff]  ;;  %v9362_v61 = vld [vmem:[#allocation76_spill] sm:$0xff]  ;;  %v1445_v5 = vrot.slane %v6867_v10, 1 }
 0x257   : > { %1509 = vrot.lane.b32.xlu0 %v9349_v35, %s4946_s8  ;;  %4587 = vmatprep.mubr.msk.f32.mxu0 %vm1971_vm12, %v1939_v4  ;;  %v1685_v4 = vsel %vm403_vm1, %v6421_v55, %v9361_v30  ;;  %v9363_v35 = vld [vmem:[#allocation166_spill] sm:$0xff]  ;;  %v1447_v55 = vrot.slane %v6869_v20, 1 }
 0x258   : > { %4588 = vmatmul.mubr.msk.f32.gmra.mrb[10].mxu0 %vm1971_vm12, %v1940_v27  ;;  %v1362_v54 = vpop.permute.xlu1 %1361  ;;  %v6873_v27 = vld [vmem:[#allocation2 + $0x1c8] sm:$0xff]  ;;  %v1722_v1 = vsel %vm1706_vm5, %v1685_v4, %v9365_v51  ;;  %v9377_v51 = vld [vmem:[#allocation7_spill] sm:$0xff] }
 0x259   : > { %v1360_v22 = vpop.permute.xlu0 %1359  ;;  %v1759_v44 = vsel %vm1743_vm6, %v1722_v1, %v9368_v16  ;;  %v9374_v4 = vld [vmem:[#allocation78_spill] sm:$0xff] }
 0x25a   : > { %1624 = vrot.lane.b32.xlu1 %v9351_v60, %s4947_s12  ;;  %v1867_v24 = vsel %vm1854_vm9, %v1830_v59, %v1360_v22  ;;  %v9364_v22 = vld [vmem:[#allocation142_spill] sm:$0xff]  ;;  %v9366_v60 = vld [vmem:[#allocation112_spill] sm:$0xff]  ;;  %v1796_v45 = vsel %vm1780_vm7, %v1759_v44, %v9370_v63  ;;  %v9383_v63 = vld [vmem:[#allocation169_spill] sm:$0xff] }
 0x25b   : > { %1622 = vrot.lane.b32.xlu0 %v5798_v0, %s4947_s12  ;;  %v1831_v0 = vsel %vm1817_vm8, %v1794_v2, %v6437_v46  ;;  %v9371_v2 = vld [vmem:[#allocation145_spill] sm:$0xff] }
 0x25c   : > { %v1476_v32 = vpop.permute.xlu1 %1475  ;;  %v1868_v52 = vsel %vm1854_vm9, %v1831_v0, %v1362_v54  ;;  %v1684_v54 = vsel %vm403_vm1, %v9363_v35, %v9362_v61  ;;  %v9372_v0 = vmov 0.0   ;;  %v9375_v61 = vld [vmem:[#allocation167_spill] sm:$0xff] }
 0x25d   : > { %v1474_v25 = vpop.permute.xlu0 %1473  ;;  %v1905_v57 = vsel %vm1891_vm10, %v1868_v52, %v1476_v32  ;;  %v1721_v11 = vsel %vm1706_vm5, %v1684_v54, %v9366_v60  ;;  %v1444_v32 = vrot.slane %v6873_v27, 1  ;;  %377 = vst.msk [vmem:[#allocation3 + $0x11] sm:$0x1] %vm358_vm13, %v9372_v0  ;;  %359 = vst.msk [vmem:[#allocation3] sm:$0x1] %vm358_vm13, %v9372_v0  ;;  %v1686_v35 = vsel %vm403_vm1, %v9375_v61, %v9374_v4  ;;  %v9376_v54 = vld [vmem:[#allocation8_spill] sm:$0xff] }
 0x25e   : > { %1401 = vrot.lane.b32.xlu1 %v9357_v13, %s4945_s11  ;;  %v1904_v62 = vsel %vm1891_vm10, %v1867_v24, %v1474_v25  ;;  %v1758_v53 = vsel %vm1743_vm6, %v1721_v11, %v9369_v3  ;;  %360 = vst.msk [vmem:[#allocation3 + $0x18] sm:$0x1] %vm358_vm13, %v9372_v0  ;;  %361 = vst.msk [vmem:[#allocation3 + $0x30] sm:$0x1] %vm358_vm13, %v9372_v0  ;;  %v1833_v13 = vsel %vm1817_vm8, %v1796_v45, %v6449_v36  ;;  %v9378_v60 = vld [vmem:[#allocation126_spill] sm:$0xff]  ;;  %v9381_v3 = vld [vmem:[#allocation147_spill] sm:$0xff] }
 0x25f   : > { %1399 = vrot.lane.b32.xlu0 %v9358_v47, %s4945_s11  ;;  %v1795_v25 = vsel %vm1780_vm7, %v1758_v53, %v9371_v2  ;;  %362 = vst.msk [vmem:[#allocation3 + $0x48] sm:$0x1] %vm358_vm13, %v9372_v0  ;;  %363 = vst.msk [vmem:[#allocation3 + $0x60] sm:$0x1] %vm358_vm13, %v9372_v0  ;;  %v1558_v47 = vrot.slane %v6867_v10, 2  ;;  %v1448_v24 = vsel %vm598_vm2, %v1445_v5, %v1447_v55  ;;  %v9380_v55 = vld [vmem:[#allocation146_spill] sm:$0xff] }
 0x260   : > { %v1589_v39 = vpop.permute.xlu1 %1588  ;;  %364 = vst.msk [vmem:[#allocation3 + $0x78] sm:$0x1] %vm358_vm13, %v9372_v0  ;;  %365 = vst.msk [vmem:[#allocation3 + $0x90] sm:$0x1] %vm358_vm13, %v9372_v0  ;;  %v1832_v59 = vsel %vm1817_vm8, %v1795_v25, %v6451_v21  ;;  %v1557_v21 = vrot.slane %v6873_v27, 2  ;;  %v1723_v1 = vsel %vm1706_vm5, %v1686_v35, %v9377_v51  ;;  %v9391_v61 = vld [vmem:[#allocation149_spill] sm:$0xff] }
 0x261   : > { %v1942_v46 = vsel %vm1928_vm11, %v1905_v57, %v1589_v39  ;;  %v1587_v41 = vpop.permute.xlu0 %1586  ;;  %366 = vst.msk [vmem:[#allocation3 + $0xa8] sm:$0x1] %vm358_vm13, %v9372_v0  ;;  %367 = vst.msk [vmem:[#allocation3 + $0xc0] sm:$0x1] %vm358_vm13, %v9372_v0  ;;  %v1560_v57 = vrot.slane %v6869_v20, 2 }
 0x262   : > { %v1941_v33 = vsel %vm1928_vm11, %v1904_v62, %v1587_v41  ;;  %1515 = vrot.lane.b32.xlu1 %v9359_v43, %s4946_s8  ;;  %368 = vst.msk [vmem:[#allocation3 + $0xd8] sm:$0x1] %vm358_vm13, %v9372_v0  ;;  %369 = vst.msk [vmem:[#allocation3 + $0xf0] sm:$0x1] %vm358_vm13, %v9372_v0  ;;  %v1559_v20 = vsel %vm797_vm3, %v1557_v21, %v1558_v47 }
 0x263   : > { %1513 = vrot.lane.b32.xlu0 %v9360_v23, %s4946_s8  ;;  %4590 = vmatprep.mubr.msk.f32.mxu0 %vm1971_vm12, %v1941_v33  ;;  %370 = vst.msk [vmem:[#allocation3 + $0x108] sm:$0x1] %vm358_vm13, %v9372_v0  ;;  %371 = vst.msk [vmem:[#allocation3 + $0x120] sm:$0x1] %vm358_vm13, %v9372_v0 }
 0x264   : > { %4591 = vmatmul.mubr.msk.f32.gmra.mrb[12].mxu0 %vm1971_vm12, %v1942_v46  ;;  %v1366_v6 = vpop.permute.xlu1 %1365  ;;  %372 = vst.msk [vmem:[#allocation3 + $0x138] sm:$0x1] %vm358_vm13, %v9372_v0  ;;  %373 = vst.msk [vmem:[#allocation3 + $0x150] sm:$0x1] %vm358_vm13, %v9372_v0  ;;  %v1446_v46 = vsel %vm598_vm2, %v1444_v32, %v1445_v5  ;;  %v9379_v5 = vld [vmem:[#allocation127_spill] sm:$0xff] }
 0x265   : > { %v6871_v37 = vpop.permute.xlu0 %1363  ;;  %374 = vst.msk [vmem:[#allocation3 + $0x168] sm:$0x1] %vm358_vm13, %v9372_v0  ;;  %375 = vst.msk [vmem:[#allocation3 + $0x180] sm:$0x1] %vm358_vm13, %v9372_v0  ;;  %v1870_v52 = vsel %vm1854_vm9, %v1833_v13, %v1366_v6  ;;  %v1561_v6 = vsel %vm797_vm3, %v1558_v47, %v1560_v57 }
 0x266   : > { %1628 = vrot.lane.b32.xlu1 %v9364_v22, %s4947_s12  ;;  %376 = vst.msk [vmem:[#allocation3 + $0x198] sm:$0x1] %vm358_vm13, %v9372_v0  ;;  %378 = vst.msk [vmem:[#allocation3 + $0x29] sm:$0x1] %vm358_vm13, %v9372_v0  ;;  %v1869_v36 = vsel %vm1854_vm9, %v1832_v59, %v6871_v37 }
 0x267   : > { %1626 = vrot.lane.b32.xlu0 %v9367_v29, %s4947_s12  ;;  %379 = vst.msk [vmem:[#allocation3 + $0x41] sm:$0x1] %vm358_vm13, %v9372_v0  ;;  %380 = vst.msk [vmem:[#allocation3 + $0x59] sm:$0x1] %vm358_vm13, %v9372_v0 }
 0x268   : > { %v1480_v49 = vpop.permute.xlu1 %1479  ;;  %381 = vst.msk [vmem:[#allocation3 + $0x71] sm:$0x1] %vm358_vm13, %v9372_v0  ;;  %382 = vst.msk [vmem:[#allocation3 + $0x89] sm:$0x1] %vm358_vm13, %v9372_v0 }
 0x269   : > { %v1478_v14 = vpop.permute.xlu0 %1477  ;;  %383 = vst.msk [vmem:[#allocation3 + $0xa1] sm:$0x1] %vm358_vm13, %v9372_v0  ;;  %384 = vst.msk [vmem:[#allocation3 + $0xb9] sm:$0x1] %vm358_vm13, %v9372_v0  ;;  %v1907_v39 = vsel %vm1891_vm10, %v1870_v52, %v1480_v49  ;;  %v9382_v49 = vld [vmem:[#allocation168_spill] sm:$0xff] }
 0x26a   : > { %385 = vst.msk [vmem:[#allocation3 + $0xd1] sm:$0x1] %vm358_vm13, %v9372_v0  ;;  %386 = vst.msk [vmem:[#allocation3 + $0xe9] sm:$0x1] %vm358_vm13, %v9372_v0  ;;  %1405 = vrot.lane.b32.xlu1 %v6867_v10, %s4945_s11  ;;  %v1906_v41 = vsel %vm1891_vm10, %v1869_v36, %v1478_v14 }
 0x26b   : > { %387 = vst.msk [vmem:[#allocation3 + $0x101] sm:$0x1] %vm358_vm13, %v9372_v0  ;;  %388 = vst.msk [vmem:[#allocation3 + $0x119] sm:$0x1] %vm358_vm13, %v9372_v0  ;;  %1403 = vrot.lane.b32.xlu0 %v6873_v27, %s4945_s11  ;;  %v9373_v27 = vld [vmem:[#allocation77_spill] sm:$0xff] }
 0x26c   : > { %389 = vst.msk [vmem:[#allocation3 + $0x131] sm:$0x1] %vm358_vm13, %v9372_v0  ;;  %390 = vst.msk [vmem:[#allocation3 + $0x149] sm:$0x1] %vm358_vm13, %v9372_v0  ;;  %v1593_v62 = vpop.permute.xlu1 %1592  ;;  %v1687_v30 = vsel %vm403_vm1, %v6453_v56, %v9373_v27  ;;  %v1760_v56 = vsel %vm1743_vm6, %v1723_v1, %v9379_v5 }
 0x26d   : > { %391 = vst.msk [vmem:[#allocation3 + $0x161] sm:$0x1] %vm358_vm13, %v9372_v0  ;;  %392 = vst.msk [vmem:[#allocation3 + $0x179] sm:$0x1] %vm358_vm13, %v9372_v0  ;;  %v1944_v33 = vsel %vm1928_vm11, %v1907_v39, %v1593_v62  ;;  %v1591_v43 = vpop.permute.xlu0 %1590  ;;  %v1724_v22 = vsel %vm1706_vm5, %v1687_v30, %v9376_v54  ;;  %v1797_v53 = vsel %vm1780_vm7, %v1760_v56, %v9381_v3  ;;  %v9384_v39 = vld [vmem:[#allocation79_spill] sm:$0xff]  ;;  %v9385_v62 = vld [vmem:[#allocation80_spill] sm:$0xff] }
 0x26e   : > { %393 = vst.msk [vmem:[#allocation3 + $0x191] sm:$0x1] %vm358_vm13, %v9372_v0  ;;  %394 = vst.msk [vmem:[#allocation3 + $0x1a9] sm:$0x1] %vm358_vm13, %v9372_v0  ;;  %v1943_v23 = vsel %vm1928_vm11, %v1906_v41, %v1591_v43  ;;  %1519 = vrot.lane.b32.xlu1 %v1448_v24, %s4946_s8  ;;  %v1761_v11 = vsel %vm1743_vm6, %v1724_v22, %v9378_v60  ;;  %v1834_v45 = vsel %vm1817_vm8, %v1797_v53, %v9383_v63  ;;  %v9386_v41 = vld [vmem:[#allocation9_spill] sm:$0xff]  ;;  %v9387_v43 = vld [vmem:[#allocation10_spill] sm:$0xff] }
 0x26f   : > { %1517 = vrot.lane.b32.xlu0 %v1446_v46, %s4946_s8  ;;  %4593 = vmatprep.mubr.msk.f32.mxu0 %vm1971_vm12, %v1943_v23  ;;  %v1798_v16 = vsel %vm1780_vm7, %v1761_v11, %v9380_v55  ;;  %v1689_v21 = vsel %vm403_vm1, %v6481_v8, %v9384_v39  ;;  %v1688_v46 = vsel %vm403_vm1, %v6485_v38, %v9385_v62  ;;  %v9390_v30 = vld [vmem:[#allocation148_spill] sm:$0xff]  ;;  %v9392_v55 = vld [vmem:[#allocation81_spill] sm:$0xff]  ;;  %v9394_v53 = vld [vmem:[#allocation11_spill] sm:$0xff] }
 0x270   : > { %4594 = vmatmul.mubr.msk.f32.gmra.mrb[14].mxu0 %vm1971_vm12, %v1944_v33  ;;  %v1370_v10 = vpop.permute.xlu1 %1369  ;;  %v1835_v32 = vsel %vm1817_vm8, %v1798_v16, %v9382_v49  ;;  %v1726_v33 = vsel %vm1706_vm5, %v1689_v21, %v9386_v41  ;;  %v1725_v23 = vsel %vm1706_vm5, %v1688_v46, %v9387_v43  ;;  %v1691_v16 = vsel %vm403_vm1, %v6509_v48, %v9392_v55 }
 0x271   : > { %v1368_v37 = vpop.permute.xlu0 %1367  ;;  %v1872_v2 = vsel %vm1854_vm9, %v1835_v32, %v1370_v10  ;;  %v1728_v49 = vsel %vm1706_vm5, %v1691_v16, %v9394_v53  ;;  %v9395_v32 = vld [vmem:[#allocation12_spill] sm:$0xff] }
 0x272   : > { %1632 = vrot.lane.b32.xlu1 %v1561_v6, %s4947_s12  ;;  %v1871_v25 = vsel %vm1854_vm9, %v1834_v45, %v1368_v37  ;;  %v9388_v6 = vld [vmem:[#allocation128_spill] sm:$0xff]  ;;  %v9389_v37 = vld [vmem:[#allocation129_spill] sm:$0xff]  ;;  %v9396_v45 = vld [vmem:[#allocation42_spill] sm:$0xff] }
 0x273   : > { %1630 = vrot.lane.b32.xlu0 %v1559_v20, %s4947_s12  ;;  %v1763_v10 = vsel %vm1743_vm6, %v1726_v33, %v9388_v6  ;;  %v1762_v27 = vsel %vm1743_vm6, %v1725_v23, %v9389_v37  ;;  %v9402_v37 = vld [vmem:[#allocation83_spill] sm:$0xff] }
 0x274   : > { %v1484_v29 = vpop.permute.xlu1 %1483  ;;  %v1800_v8 = vsel %vm1780_vm7, %v1763_v10, %v9390_v30  ;;  %v1799_v38 = vsel %vm1780_vm7, %v1762_v27, %v9391_v61  ;;  %v1693_v27 = vsel %vm403_vm1, %v6537_v28, %v9402_v37  ;;  %v9403_v30 = vld [vmem:[#allocation84_spill] sm:$0xff] }
 0x275   : > { %v1482_v44 = vpop.permute.xlu0 %1481  ;;  %v1909_v14 = vsel %vm1891_vm10, %v1872_v2, %v1484_v29  ;;  %v1837_v35 = vsel %vm1817_vm8, %v1800_v8, %v6469_v15  ;;  %v1836_v54 = vsel %vm1817_vm8, %v1799_v38, %v6471_v18  ;;  %v1765_v2 = vsel %vm1743_vm6, %v1728_v49, %v9396_v45  ;;  %v9405_v38 = vld [vmem:[#allocation14_spill] sm:$0xff] }
 0x276   : > { %v1908_v59 = vsel %vm1891_vm10, %v1871_v25, %v1482_v44  ;;  %v9393_v44 = vld [vmem:[#allocation82_spill] sm:$0xff]  ;;  %v1692_v8 = vsel %vm403_vm1, %v6541_v58, %v9403_v30 }
 0x277   : > { %v1690_v3 = vsel %vm403_vm1, %v6513_v34, %v9393_v44 }
 0x278   : > { %v1597_v13 = vpop.permute.xlu1 %1596  ;;  %v1727_v63 = vsel %vm1706_vm5, %v1690_v3, %v9395_v32 }
 0x279   : > { %v1946_v52 = vsel %vm1928_vm11, %v1909_v14, %v1597_v13  ;;  %v1595_v47 = vpop.permute.xlu0 %1594  ;;  %v9397_v14 = vld [vmem:[#allocation130_spill] sm:$0xff] }
 0x27a   : > { %v1945_v24 = vsel %vm1928_vm11, %v1908_v59, %v1595_v47  ;;  %v1764_v13 = vsel %vm1743_vm6, %v1727_v63, %v9397_v14  ;;  %v9398_v59 = vld [vmem:[#allocation150_spill] sm:$0xff]  ;;  %v9399_v47 = vld [vmem:[#allocation151_spill] sm:$0xff]  ;;  %v9412_v14 = vld [vmem:[#allocation85_spill] sm:$0xff] }
 0x27b   : > { %4596 = vmatprep.mubr.msk.f32.mxu0 %vm1971_vm12, %v1945_v24  ;;  %v1802_v48 = vsel %vm1780_vm7, %v1765_v2, %v9398_v59  ;;  %v1801_v34 = vsel %vm1780_vm7, %v1764_v13, %v9399_v47  ;;  %v9400_v24 = vld [vmem:[#allocation170_spill] sm:$0xff]  ;;  %v9413_v13 = vld [vmem:[#allocation57_spill] sm:$0xff] }
 0x27c   : > { %4597 = vmatmul.mubr.msk.f32.gmra.mrb[16].mxu0 %vm1971_vm12, %v1946_v52  ;;  %v1374_v57 = vpop.permute.xlu1 %1373  ;;  %v1695_v59 = vsel %vm403_vm1, %v9413_v13, %v9412_v14 }
 0x27d   : > { %v1372_v36 = vpop.permute.xlu0 %1371  ;;  %v1874_v22 = vsel %vm1854_vm9, %v1837_v35, %v1374_v57  ;;  %v1839_v57 = vsel %vm1817_vm8, %v1802_v48, %v9400_v24  ;;  %v1729_v35 = vsel %vm1706_vm5, %v1692_v8, %v9405_v38  ;;  %v9414_v48 = vld [vmem:[#allocation86_spill] sm:$0xff] }
 0x27e   : > { %v1873_v51 = vsel %vm1854_vm9, %v1836_v54, %v1372_v36  ;;  %v9401_v36 = vld [vmem:[#allocation171_spill] sm:$0xff] }
 0x27f   : > { %v1838_v39 = vsel %vm1817_vm8, %v1801_v34, %v9401_v36  ;;  %v9406_v54 = vld [vmem:[#allocation43_spill] sm:$0xff] }
 0x280   : > { %v1488_v20 = vpop.permute.xlu1 %1487  ;;  %v9416_v34 = vld [vmem:[#allocation15_spill] sm:$0xff] }
 0x281   : > { %v1486_v4 = vpop.permute.xlu0 %1485  ;;  %v1911_v1 = vsel %vm1891_vm10, %v1874_v22, %v1488_v20  ;;  %v1732_v24 = vsel %vm1706_vm5, %v1695_v59, %v9416_v34 }
 0x282   : > { %v1910_v11 = vsel %vm1891_vm10, %v1873_v51, %v1486_v4  ;;  %v9404_v4 = vld [vmem:[#allocation13_spill] sm:$0xff] }
 0x283   : > { %v1730_v61 = vsel %vm1706_vm5, %v1693_v27, %v9404_v4  ;;  %v9423_v27 = vld [vmem:[#allocation175_spill] sm:$0xff] }
 0x284   : > { %v1601_v60 = vpop.permute.xlu1 %1600  ;;  %v1767_v22 = vsel %vm1743_vm6, %v1730_v61, %v9406_v54 }
 0x285   : > { %v1948_v29 = vsel %vm1928_vm11, %v1911_v1, %v1601_v60  ;;  %v1599_v5 = vpop.permute.xlu0 %1598  ;;  %v9407_v1 = vld [vmem:[#allocation131_spill] sm:$0xff] }
 0x286   : > { %v1947_v56 = vsel %vm1928_vm11, %v1910_v11, %v1599_v5  ;;  %v1766_v60 = vsel %vm1743_vm6, %v1729_v35, %v9407_v1  ;;  %v9408_v11 = vld [vmem:[#allocation152_spill] sm:$0xff]  ;;  %v9409_v5 = vld [vmem:[#allocation153_spill] sm:$0xff] }
 0x287   : > { %4599 = vmatprep.mubr.msk.f32.mxu0 %vm1971_vm12, %v1947_v56  ;;  %v1804_v28 = vsel %vm1780_vm7, %v1767_v22, %v9408_v11  ;;  %v1803_v58 = vsel %vm1780_vm7, %v1766_v60, %v9409_v5  ;;  %v9410_v56 = vld [vmem:[#allocation172_spill] sm:$0xff]  ;;  %v9424_v11 = vld [vmem:[#allocation87_spill] sm:$0xff] }
 0x288   : > { %4600 = vmatmul.mubr.msk.f32.gmra.mrb[18].mxu0 %vm1971_vm12, %v1948_v29  ;;  %v1378_v15 = vpop.permute.xlu1 %1377 }
 0x289   : > { %v1376_v18 = vpop.permute.xlu0 %1375  ;;  %v1876_v21 = vsel %vm1854_vm9, %v1839_v57, %v1378_v15  ;;  %v1841_v15 = vsel %vm1817_vm8, %v1804_v28, %v9410_v56  ;;  %v9417_v57 = vld [vmem:[#allocation16_spill] sm:$0xff]  ;;  %v1697_v28 = vsel %vm403_vm1, %v6619_v9, %v9424_v11 }
 0x28a   : > { %v1875_v62 = vsel %vm1854_vm9, %v1838_v39, %v1376_v18  ;;  %v9411_v18 = vld [vmem:[#allocation173_spill] sm:$0xff]  ;;  %v9418_v39 = vld [vmem:[#allocation44_spill] sm:$0xff] }
 0x28b   : > { %v1840_v55 = vsel %vm1817_vm8, %v1803_v58, %v9411_v18  ;;  %v9426_v58 = vld [vmem:[#allocation17_spill] sm:$0xff] }
 0x28c   : > { %v1492_v25 = vpop.permute.xlu1 %1491  ;;  %v1734_v56 = vsel %vm1706_vm5, %v1697_v28, %v9426_v58 }
 0x28d   : > { %v1490_v52 = vpop.permute.xlu0 %1489  ;;  %v1913_v46 = vsel %vm1891_vm10, %v1876_v21, %v1492_v25  ;;  %v1769_v21 = vsel %vm1743_vm6, %v1732_v24, %v9418_v39 }
 0x28e   : > { %v1912_v33 = vsel %vm1891_vm10, %v1875_v62, %v1490_v52  ;;  %v9415_v52 = vld [vmem:[#allocation53_spill] sm:$0xff] }
 0x28f   : > { %v1694_v47 = vsel %vm403_vm1, %v9415_v52, %v9414_v48 }
 0x290   : > { %v1605_v41 = vpop.permute.xlu1 %1604  ;;  %v1731_v36 = vsel %vm1706_vm5, %v1694_v47, %v9417_v57 }
 0x291   : > { %v1950_v43 = vsel %vm1928_vm11, %v1913_v46, %v1605_v41  ;;  %v1603_v23 = vpop.permute.xlu0 %1602  ;;  %v9419_v46 = vld [vmem:[#allocation132_spill] sm:$0xff] }
 0x292   : > { %v1949_v6 = vsel %vm1928_vm11, %v1912_v33, %v1603_v23  ;;  %v1768_v41 = vsel %vm1743_vm6, %v1731_v36, %v9419_v46  ;;  %v9420_v33 = vld [vmem:[#allocation154_spill] sm:$0xff] }
 0x293   : > { %4602 = vmatprep.mubr.msk.f32.mxu0 %vm1971_vm12, %v1949_v6  ;;  %v9421_v6 = vld [vmem:[#allocation155_spill] sm:$0xff]  ;;  %v9435_v46 = vld [vmem:[#allocation90_spill] sm:$0xff] }
 0x294   : > { %4603 = vmatmul.mubr.msk.f32.gmra.mrb[20].mxu0 %vm1971_vm12, %v1950_v43  ;;  %v1382_v10 = vpop.permute.xlu1 %1381  ;;  %v1806_v43 = vsel %vm1780_vm7, %v1769_v21, %v9420_v33  ;;  %v9434_v21 = vld [vmem:[#allocation89_spill] sm:$0xff]  ;;  %v9436_v33 = vld [vmem:[#allocation19_spill] sm:$0xff] }
 0x295   : > { %v1380_v20 = vpop.permute.xlu0 %1379  ;;  %v1878_v16 = vsel %vm1854_vm9, %v1841_v15, %v1382_v10  ;;  %v1805_v10 = vsel %vm1780_vm7, %v1768_v41, %v9421_v6  ;;  %v9427_v15 = vld [vmem:[#allocation18_spill] sm:$0xff]  ;;  %v1698_v41 = vsel %vm403_vm1, %v6672_v50, %v9435_v46 }
 0x296   : > { %v1877_v44 = vsel %vm1854_vm9, %v1840_v55, %v1380_v20  ;;  %v9422_v20 = vld [vmem:[#allocation174_spill] sm:$0xff]  ;;  %v1842_v30 = vsel %vm1817_vm8, %v1805_v10, %v9423_v27  ;;  %v9428_v55 = vld [vmem:[#allocation45_spill] sm:$0xff] }
 0x297   : > { %v1843_v37 = vsel %vm1817_vm8, %v1806_v43, %v9422_v20  ;;  %v9438_v10 = vld [vmem:[#allocation46_spill] sm:$0xff] }
 0x298   : > { %v1496_v51 = vpop.permute.xlu1 %1495  ;;  %v9439_v27 = vld [vmem:[#allocation134_spill] sm:$0xff] }
 0x299   : > { %v1494_v29 = vpop.permute.xlu0 %1493  ;;  %v1915_v3 = vsel %vm1891_vm10, %v1878_v16, %v1496_v51  ;;  %v1771_v16 = vsel %vm1743_vm6, %v1734_v56, %v9428_v55 }
 0x29a   : > { %v1914_v49 = vsel %vm1891_vm10, %v1877_v44, %v1494_v29  ;;  %v9425_v29 = vld [vmem:[#allocation88_spill] sm:$0xff] }
 0x29b   : > { %v1696_v5 = vsel %vm403_vm1, %v6626_v40, %v9425_v29 }
 0x29c   : > { %v1609_v53 = vpop.permute.xlu1 %1608  ;;  %v1733_v18 = vsel %vm1706_vm5, %v1696_v5, %v9427_v15 }
 0x29d   : > { %v1952_v32 = vsel %vm1928_vm11, %v1915_v3, %v1609_v53  ;;  %v1607_v63 = vpop.permute.xlu0 %1606  ;;  %v9429_v3 = vld [vmem:[#allocation133_spill] sm:$0xff] }
 0x29e   : > { %v1951_v45 = vsel %vm1928_vm11, %v1914_v49, %v1607_v63  ;;  %v1770_v53 = vsel %vm1743_vm6, %v1733_v18, %v9429_v3  ;;  %v9430_v49 = vld [vmem:[#allocation156_spill] sm:$0xff]  ;;  %v9431_v63 = vld [vmem:[#allocation157_spill] sm:$0xff]  ;;  %v9444_v18 = vld [vmem:[#allocation91_spill] sm:$0xff] }
 0x29f   : > { %4605 = vmatprep.mubr.msk.f32.mxu0 %vm1971_vm12, %v1951_v45  ;;  %v1808_v9 = vsel %vm1780_vm7, %v1771_v16, %v9430_v49  ;;  %v1807_v40 = vsel %vm1780_vm7, %v1770_v53, %v9431_v63  ;;  %v9432_v45 = vld [vmem:[#allocation176_spill] sm:$0xff]  ;;  %v1701_v55 = vsel %vm403_vm1, %v6711_v26, %v9444_v18  ;;  %v9446_v3 = vld [vmem:[#allocation21_spill] sm:$0xff]  ;;  %v9447_v49 = vld [vmem:[#allocation22_spill] sm:$0xff] }
 0x2a0   : > { %4606 = vmatmul.mubr.msk.f32.gmra.mrb[22].mxu0 %vm1971_vm12, %v1952_v32  ;;  %v1386_v2 = vpop.permute.xlu1 %1385  ;;  %v9445_v16 = vld [vmem:[#allocation92_spill] sm:$0xff]  ;;  %v1738_v53 = vsel %vm1706_vm5, %v1701_v55, %v9446_v3 }
 0x2a1   : > { %v1384_v25 = vpop.permute.xlu0 %1383  ;;  %v1880_v8 = vsel %vm1854_vm9, %v1843_v37, %v1386_v2  ;;  %v1845_v2 = vsel %vm1817_vm8, %v1808_v9, %v9432_v45  ;;  %v9449_v45 = vld [vmem:[#allocation135_spill] sm:$0xff] }
 0x2a2   : > { %v1879_v4 = vsel %vm1854_vm9, %v1842_v30, %v1384_v25  ;;  %v9433_v25 = vld [vmem:[#allocation177_spill] sm:$0xff] }
 0x2a3   : > { %v1844_v14 = vsel %vm1817_vm8, %v1807_v40, %v9433_v25  ;;  %v9450_v25 = vld [vmem:[#allocation160_spill] sm:$0xff] }
 0x2a4   : > { %v1500_v62 = vpop.permute.xlu1 %1499 }
 0x2a5   : > { %v1498_v23 = vpop.permute.xlu0 %1497  ;;  %v1917_v61 = vsel %vm1891_vm10, %v1880_v8, %v1500_v62  ;;  %v1699_v62 = vsel %vm403_vm1, %v6665_v7, %v9434_v21  ;;  %v9440_v8 = vld [vmem:[#allocation158_spill] sm:$0xff] }
 0x2a6   : > { %v1916_v35 = vsel %vm1891_vm10, %v1879_v4, %v1498_v23  ;;  %v1736_v43 = vsel %vm1706_vm5, %v1699_v62, %v9436_v33  ;;  %v9437_v23 = vld [vmem:[#allocation20_spill] sm:$0xff] }
 0x2a7   : > { %v1735_v6 = vsel %vm1706_vm5, %v1698_v41, %v9437_v23  ;;  %v1773_v20 = vsel %vm1743_vm6, %v1736_v43, %v9438_v10  ;;  %v9454_v43 = vld [vmem:[#allocation93_spill] sm:$0xff] }
 0x2a8   : > { %v1613_v38 = vpop.permute.xlu1 %1612  ;;  %v1772_v30 = vsel %vm1743_vm6, %v1735_v6, %v9439_v27  ;;  %v1810_v7 = vsel %vm1780_vm7, %v1773_v20, %v9440_v8  ;;  %v1703_v23 = vsel %vm403_vm1, %v6757_v42, %v9454_v43  ;;  %v9455_v6 = vld [vmem:[#allocation94_spill] sm:$0xff]  ;;  %v9456_v20 = vld [vmem:[#allocation23_spill] sm:$0xff]  ;;  %v9457_v27 = vld [vmem:[#allocation24_spill] sm:$0xff] }
 0x2a9   : > { %v1954_v54 = vsel %vm1928_vm11, %v1917_v61, %v1613_v38  ;;  %v1611_v22 = vpop.permute.xlu0 %1610  ;;  %v9441_v61 = vld [vmem:[#allocation159_spill] sm:$0xff]  ;;  %v9442_v38 = vld [vmem:[#allocation178_spill] sm:$0xff]  ;;  %v1702_v10 = vsel %vm403_vm1, %v6764_v19, %v9455_v6  ;;  %v9458_v8 = vld [vmem:[#allocation48_spill] sm:$0xff] }
 0x2aa   : > { %v1953_v51 = vsel %vm1928_vm11, %v1916_v35, %v1611_v22  ;;  %v1809_v50 = vsel %vm1780_vm7, %v1772_v30, %v9441_v61  ;;  %v1847_v35 = vsel %vm1817_vm8, %v1810_v7, %v9442_v38  ;;  %v1739_v30 = vsel %vm1706_vm5, %v1702_v10, %v9457_v27  ;;  %v9459_v61 = vld [vmem:[#allocation49_spill] sm:$0xff]  ;;  %v9460_v38 = vld [vmem:[#allocation162_spill] sm:$0xff] }
 0x2ab   : > { %4608 = vmatprep.mubr.msk.f32.mxu0 %vm1971_vm12, %v1953_v51 }
 0x2ac   : > { %4609 = vmatmul.mubr.msk.f32.gmra.mrb[24].mxu0 %vm1971_vm12, %v1954_v54  ;;  %v1390_v1 = vpop.permute.xlu1 %1389  ;;  %v9443_v54 = vld [vmem:[#allocation179_spill] sm:$0xff] }
 0x2ad   : > { %v1388_v60 = vpop.permute.xlu0 %1387  ;;  %v1882_v13 = vsel %vm1854_vm9, %v1845_v2, %v1390_v1  ;;  %v1846_v22 = vsel %vm1817_vm8, %v1809_v50, %v9443_v54  ;;  %v1776_v50 = vsel %vm1743_vm6, %v1739_v30, %v9459_v61  ;;  %v9461_v54 = vld [vmem:[#allocation163_spill] sm:$0xff] }
 0x2ae   : > { %v1881_v59 = vsel %vm1854_vm9, %v1844_v14, %v1388_v60  ;;  %v1813_v19 = vsel %vm1780_vm7, %v1776_v50, %v9461_v54 }
 0x2b0   : > { %v1504_v44 = vpop.permute.xlu1 %1503 }
 0x2b1   : > { %v1502_v32 = vpop.permute.xlu0 %1501  ;;  %v1919_v48 = vsel %vm1891_vm10, %v1882_v13, %v1504_v44  ;;  %v1700_v44 = vsel %vm403_vm1, %v6718_v17, %v9445_v16  ;;  %v9451_v13 = vld [vmem:[#allocation161_spill] sm:$0xff] }
 0x2b2   : > { %v1918_v47 = vsel %vm1891_vm10, %v1881_v59, %v1502_v32  ;;  %v1737_v9 = vsel %vm1706_vm5, %v1700_v44, %v9447_v49  ;;  %v9448_v32 = vld [vmem:[#allocation47_spill] sm:$0xff]  ;;  %v9452_v59 = vld [vmem:[#allocation180_spill] sm:$0xff] }
 0x2b3   : > { %v1775_v63 = vsel %vm1743_vm6, %v1738_v53, %v9448_v32  ;;  %v1774_v2 = vsel %vm1743_vm6, %v1737_v9, %v9449_v45  ;;  %v9464_v44 = vld [vmem:[#allocation95_spill] sm:$0xff]  ;;  %v9465_v53 = vld [vmem:[#allocation96_spill] sm:$0xff]  ;;  %v9466_v9 = vld [vmem:[#allocation25_spill] sm:$0xff] }
 0x2b4   : > { %v1617_v52 = vpop.permute.xlu1 %1616  ;;  %v1812_v26 = vsel %vm1780_vm7, %v1775_v63, %v9450_v25  ;;  %v1811_v17 = vsel %vm1780_vm7, %v1774_v2, %v9451_v13  ;;  %v1705_v3 = vsel %vm403_vm1, %v6803_v12, %v9464_v44  ;;  %v1704_v49 = vsel %vm403_vm1, %v6810_v31, %v9465_v53  ;;  %v9467_v63 = vld [vmem:[#allocation26_spill] sm:$0xff]  ;;  %v9470_v13 = vld [vmem:[#allocation164_spill] sm:$0xff] }
 0x2b5   : > { %v1956_v34 = vsel %vm1928_vm11, %v1919_v48, %v1617_v52  ;;  %v1615_v24 = vpop.permute.xlu0 %1614  ;;  %v1849_v48 = vsel %vm1817_vm8, %v1812_v26, %v9452_v59  ;;  %v9453_v52 = vld [vmem:[#allocation181_spill] sm:$0xff]  ;;  %v1742_v32 = vsel %vm1706_vm5, %v1705_v3, %v9466_v9  ;;  %v9468_v45 = vld [vmem:[#allocation50_spill] sm:$0xff]  ;;  %v9469_v26 = vld [vmem:[#allocation136_spill] sm:$0xff]  ;;  %vm3709_vm1 = vcmask 457728  }
 0x2b6   : > { %v1955_v57 = vsel %vm1928_vm11, %v1918_v47, %v1615_v24  ;;  %v1848_v47 = vsel %vm1817_vm8, %v1811_v17, %v9453_v52  ;;  %v1779_v2 = vsel %vm1743_vm6, %v1742_v32, %v9468_v45  ;;  %v9471_v59 = vld [vmem:[#allocation165_spill] sm:$0xff] }
 0x2b7   : > { %4611 = vmatprep.mubr.msk.f32.mxu0 %vm1971_vm12, %v1955_v57  ;;  %v1816_v12 = vsel %vm1780_vm7, %v1779_v2, %v9470_v13 }
 0x2b8   : > { %4612 = vmatmul.mubr.msk.f32.gmra.mrb[26].mxu0 %vm1971_vm12, %v1956_v34  ;;  %v1394_v36 = vpop.permute.xlu1 %1393 }
 0x2b9   : > { %v1392_v39 = vpop.permute.xlu0 %1391  ;;  %v1884_v51 = vsel %vm1854_vm9, %v1847_v35, %v1394_v36 }
 0x2ba   : > { %v1883_v1 = vsel %vm1854_vm9, %v1846_v22, %v1392_v39  ;;  %v9462_v22 = vld [vmem:[#allocation182_spill] sm:$0xff] }
 0x2bc   : > { %v1508_v37 = vpop.permute.xlu1 %1507 }
 0x2bd   : > { %v1506_v4 = vpop.permute.xlu0 %1505  ;;  %v1921_v60 = vsel %vm1891_vm10, %v1884_v51, %v1508_v37  ;;  %v1740_v37 = vsel %vm1706_vm5, %v1703_v23, %v9456_v20 }
 0x2be   : > { %v1920_v28 = vsel %vm1891_vm10, %v1883_v1, %v1506_v4  ;;  %v1777_v7 = vsel %vm1743_vm6, %v1740_v37, %v9458_v8  ;;  %v9463_v1 = vld [vmem:[#allocation183_spill] sm:$0xff] }
 0x2bf   : > { %v1814_v42 = vsel %vm1780_vm7, %v1777_v7, %v9460_v38 }
 0x2c0   : > { %v1621_v11 = vpop.permute.xlu1 %1620  ;;  %v1851_v51 = vsel %vm1817_vm8, %v1814_v42, %v9462_v22 }
 0x2c1   : > { %v1958_v29 = vsel %vm1928_vm11, %v1921_v60, %v1621_v11  ;;  %v1619_v5 = vpop.permute.xlu0 %1618  ;;  %v1850_v60 = vsel %vm1817_vm8, %v1813_v19, %v9463_v1 }
 0x2c2   : > { %v1957_v58 = vsel %vm1928_vm11, %v1920_v28, %v1619_v5 }
 0x2c3   : > { %4614 = vmatprep.mubr.msk.f32.mxu0 %vm1971_vm12, %v1957_v58 }
 0x2c4   : > { %4615 = vmatmul.mubr.msk.f32.gmra.mrb[28].mxu0 %vm1971_vm12, %v1958_v29  ;;  %v1398_v56 = vpop.permute.xlu1 %1397 }
 0x2c5   : > { %v1396_v15 = vpop.permute.xlu0 %1395  ;;  %v1886_v34 = vsel %vm1854_vm9, %v1849_v48, %v1398_v56  ;;  %v9472_v48 = vld [vmem:[#allocation184_spill] sm:$0xff] }
 0x2c6   : > { %v1885_v24 = vsel %vm1854_vm9, %v1848_v47, %v1396_v15  ;;  %v1853_v52 = vsel %vm1817_vm8, %v1816_v12, %v9472_v48  ;;  %v9473_v47 = vld [vmem:[#allocation185_spill] sm:$0xff] }
 0x2c8   : > { %v1512_v40 = vpop.permute.xlu1 %1511 }
 0x2c9   : > { %v1510_v14 = vpop.permute.xlu0 %1509  ;;  %v1923_v57 = vsel %vm1891_vm10, %v1886_v34, %v1512_v40  ;;  %v1741_v40 = vsel %vm1706_vm5, %v1704_v49, %v9467_v63 }
 0x2ca   : > { %v1922_v39 = vsel %vm1891_vm10, %v1885_v24, %v1510_v14  ;;  %v1778_v14 = vsel %vm1743_vm6, %v1741_v40, %v9469_v26  ;;  %vm3781_vm6 = vcmask 588800  }
 0x2cb   : > { %v1815_v31 = vsel %vm1780_vm7, %v1778_v14, %v9471_v59 }
 0x2cc   : > { %v1625_v36 = vpop.permute.xlu1 %1624  ;;  %v1852_v34 = vsel %vm1817_vm8, %v1815_v31, %v9473_v47 }
 0x2cd   : > { %v1960_v21 = vsel %vm1928_vm11, %v1923_v57, %v1625_v36  ;;  %v1623_v62 = vpop.permute.xlu0 %1622 }
 0x2ce   : > { %v1959_v46 = vsel %vm1928_vm11, %v1922_v39, %v1623_v62 }
 0x2cf   : > { %4617 = vmatprep.mubr.msk.f32.mxu0 %vm1971_vm12, %v1959_v46 }
 0x2d0   : > { %4618 = vmatmul.mubr.msk.f32.gmra.mrb[30].mxu0 %vm1971_vm12, %v1960_v21  ;;  %v1402_v41 = vpop.permute.xlu1 %1401 }
 0x2d1   : > { %v1400_v33 = vpop.permute.xlu0 %1399  ;;  %v1888_v11 = vsel %vm1854_vm9, %v1851_v51, %v1402_v41 }
 0x2d2   : > { %v1887_v28 = vsel %vm1854_vm9, %v1850_v60, %v1400_v33  ;;  %v7303_v33 = vld [vmem:[%s8882_s3] ss:$0 sm:$0xff] }
 0x2d4   : > { %v1516_v4 = vpop.permute.xlu1 %1515 }
 0x2d5   : > { %v1514_v35 = vpop.permute.xlu0 %1513  ;;  %v1925_v29 = vsel %vm1891_vm10, %v1888_v11, %v1516_v4 }
 0x2d6   : > { %v1924_v58 = vsel %vm1891_vm10, %v1887_v28, %v1514_v35 }
 0x2d8   : > { %v1629_v5 = vpop.permute.xlu1 %1628 }
 0x2d9   : > { %v1962_v56 = vsel %vm1928_vm11, %v1925_v29, %v1629_v5  ;;  %v1627_v15 = vpop.permute.xlu0 %1626 }
 0x2da   : > { %v1961_v18 = vsel %vm1928_vm11, %v1924_v58, %v1627_v15 }
 0x2db   : > { %4620 = vmatprep.mubr.msk.f32.mxu0 %vm1971_vm12, %v1961_v18 }
 0x2dc   : > { %4621 = vmatmul.mubr.msk.f32.gmra.mrb[32].mxu0 %vm1971_vm12, %v1962_v56  ;;  %v1406_v55 = vpop.permute.xlu1 %1405 }
 0x2dd   : > { %v1404_v16 = vpop.permute.xlu0 %1403  ;;  %v1890_v24 = vsel %vm1854_vm9, %v1853_v52, %v1406_v55 }
 0x2de   : > { %v1889_v57 = vsel %vm1854_vm9, %v1852_v34, %v1404_v16 }
 0x2e0   : > { %v1520_v25 = vpop.permute.xlu1 %1519 }
 0x2e1   : > { %v1518_v17 = vpop.permute.xlu0 %1517  ;;  %v1927_v36 = vsel %vm1891_vm10, %v1890_v24, %v1520_v25 }
 0x2e2   : > { %v1926_v21 = vsel %vm1891_vm10, %v1889_v57, %v1518_v17 }
 0x2e4   : > { %v1633_v39 = vpop.permute.xlu1 %1632 }
 0x2e5   : > { %v1964_v62 = vsel %vm1928_vm11, %v1927_v36, %v1633_v39  ;;  %v1631_v46 = vpop.permute.xlu0 %1630 }
 0x2e6   : > { %v1963_v41 = vsel %vm1928_vm11, %v1926_v21, %v1631_v46 }
 0x2e7   : > { %4623 = vmatprep.mubr.msk.f32.mxu0 %vm1971_vm12, %v1963_v41 }
 0x2e8   : > { %4624 = vmatmul.mubr.msk.f32.gmra.mrb[34].mxu0 %vm1971_vm12, %v1964_v62 }
 0x2f3   : > { %v4574_v43 = vpop.f32.mrb[0].mxu0 }
 0x2f4   : > { %v2156_v23 = vadd.f32 %v4574_v43, %v7303_v33  ;;  %v2150_v6 = vpop.f32.mrb[1].mxu0 }
 0x2f5   : > { %v2151_v10 = vadd.f32 %v7303_v33, %v2150_v6 }
 0x2f6   : > { %v2330_v20 = vmul.f32 0.8, %v2156_v23 }
 0x2f7   : > { %v2329_v37 = vmul.f32 0.8, %v2151_v10 }
 0x2f8   : > { %v2366_v27 = vmax.f32 %v2156_v23, %v2330_v20 }
 0x2f9   : > { %v2365_v30 = vmax.f32 %v2151_v10, %v2329_v37 }
 0x2fa   : > { %2402 = vst.msk [vmem:[#allocation3 + $0x9] sm:$0xff] %vm1706_vm5, %v2366_v27 }
 0x2fb   : > { %2444 = vst.msk [vmem:[#allocation3 + $0x10] sm:$0x3] %vm2443_vm14, %v9372_v0  ;;  %v4577_v8 = vpop.f32.mrb[2].mxu0 }
 0x2fc   : > { %2401 = vst.msk [vmem:[#allocation3 + $0x1] sm:$0xff] %vm1706_vm5, %v2365_v30  ;;  %v2166_v7 = vadd.f32 %v4577_v8, %v7303_v33  ;;  %v2160_v4 = vpop.f32.mrb[3].mxu0 }
 0x2fd   : > { %2441 = vst.msk [vmem:[#allocation3] sm:$0xff] %vm1706_vm5, %v9372_v0  ;;  %2442 = vst.msk [vmem:[#allocation3 + $0x8] sm:$0xff] %vm1706_vm5, %v9372_v0  ;;  %v2161_v61 = vadd.f32 %v7303_v33, %v2160_v4 }
 0x2fe   : > { %v2332_v50 = vmul.f32 0.8, %v2166_v7 }
 0x2ff   : > { %v2331_v38 = vmul.f32 0.8, %v2161_v61 }
 0x300   : > { %v2368_v42 = vmax.f32 %v2166_v7, %v2332_v50 }
 0x301   : > { %v2367_v35 = vmax.f32 %v2161_v61, %v2331_v38 }
 0x302   : > { %2404 = vst.msk [vmem:[#allocation3 + $0x21] sm:$0xff] %vm1706_vm5, %v2368_v42  ;;  %v7318_v54 = vld [vmem:[#allocation3 + $0x10] sm:$0x3] }
 0x303   : > { %2403 = vst.msk [vmem:[#allocation3 + $0x19] sm:$0xff] %vm1706_vm5, %v2367_v35  ;;  %v2564_v22 = vrot.slane %v7318_v54, 1 }
 0x304   : > { %v7321_v19 = vld [vmem:[#allocation3 + $0x8] sm:$0xff]  ;;  %v7324_v51 = vld [vmem:[#allocation3] sm:$0xff] }
 0x305   : > { %v2562_v1 = vrot.slane %v7321_v19, 1  ;;  %v2561_v60 = vrot.slane %v7324_v51, 1 }
 0x307   : > { %v2565_v11 = vsel %vm598_vm2, %v2562_v1, %v2564_v22  ;;  %v2563_v28 = vsel %vm598_vm2, %v2561_v60, %v2562_v1  ;;  %v4580_v29 = vpop.f32.mrb[4].mxu0 }
 0x308   : > { %2643 = vrot.lane.b32.xlu1 %v2565_v11, %s4941_s27  ;;  %2641 = vrot.lane.b32.xlu0 %v2563_v28, %s4941_s27  ;;  %v2176_v5 = vadd.f32 %v4580_v29, %v7303_v33  ;;  %v2170_v58 = vpop.f32.mrb[5].mxu0 }
 0x309   : > { %v2171_v56 = vadd.f32 %v7303_v33, %v2170_v58  ;;  %v7334_v15 = vld [vmem:[#allocation3 + $0x28] sm:$0x3] }
 0x30a   : > { %v2334_v18 = vmul.f32 0.8, %v2176_v5  ;;  %v7336_v55 = vld [vmem:[#allocation3 + $0x20] sm:$0xff]  ;;  %v2569_v16 = vrot.slane %v7334_v15, 1  ;;  %v7339_v44 = vld [vmem:[#allocation3 + $0x18] sm:$0xff] }
 0x30b   : > { %v2333_v3 = vmul.f32 0.8, %v2171_v56  ;;  %v2567_v53 = vrot.slane %v7336_v55, 1  ;;  %v2566_v49 = vrot.slane %v7339_v44, 1 }
 0x30c   : > { %v2370_v9 = vmax.f32 %v2176_v5, %v2334_v18 }
 0x30d   : > { %v2369_v32 = vmax.f32 %v2171_v56, %v2333_v3  ;;  %v7344_v63 = vsel %vm598_vm2, %v2567_v53, %v2569_v16  ;;  %v7347_v40 = vsel %vm598_vm2, %v2566_v49, %v2567_v53 }
 0x30e   : > { %2406 = vst.msk [vmem:[#allocation3 + $0x39] sm:$0xff] %vm1706_vm5, %v2370_v9  ;;  %2647 = vrot.lane.b32.xlu1 %v7344_v63, %s4941_s27  ;;  %2645 = vrot.lane.b32.xlu0 %v7347_v40, %s4941_s27 }
 0x30f   : > { %2405 = vst.msk [vmem:[#allocation3 + $0x31] sm:$0xff] %vm1706_vm5, %v2369_v32 }
 0x313   : > { %v4583_v45 = vpop.f32.mrb[6].mxu0 }
 0x314   : > { %v2186_v2 = vadd.f32 %v4583_v45, %v7303_v33  ;;  %v2180_v25 = vpop.f32.mrb[7].mxu0 }
 0x315   : > { %v2181_v26 = vadd.f32 %v7303_v33, %v2180_v25  ;;  %v7357_v14 = vld [vmem:[#allocation3 + $0x40] sm:$0x3] }
 0x316   : > { %v2336_v13 = vmul.f32 0.8, %v2186_v2  ;;  %v7359_v12 = vld [vmem:[#allocation3 + $0x38] sm:$0xff]  ;;  %v2574_v17 = vrot.slane %v7357_v14, 1  ;;  %v7362_v59 = vld [vmem:[#allocation3 + $0x30] sm:$0xff] }
 0x317   : > { %v2335_v31 = vmul.f32 0.8, %v2181_v26  ;;  %v2572_v48 = vrot.slane %v7359_v12, 1  ;;  %v2571_v52 = vrot.slane %v7362_v59, 1 }
 0x318   : > { %v2372_v47 = vmax.f32 %v2186_v2, %v2336_v13 }
 0x319   : > { %v2371_v34 = vmax.f32 %v2181_v26, %v2335_v31  ;;  %v7367_v24 = vsel %vm598_vm2, %v2572_v48, %v2574_v17  ;;  %v7370_v57 = vsel %vm598_vm2, %v2571_v52, %v2572_v48 }
 0x31a   : > { %2408 = vst.msk [vmem:[#allocation3 + $0x51] sm:$0xff] %vm1706_vm5, %v2372_v47  ;;  %2651 = vrot.lane.b32.xlu1 %v7367_v24, %s4941_s27  ;;  %2649 = vrot.lane.b32.xlu0 %v7370_v57, %s4941_s27 }
 0x31b   : > { %2407 = vst.msk [vmem:[#allocation3 + $0x49] sm:$0xff] %vm1706_vm5, %v2371_v34 }
 0x31f   : > { %v4586_v36 = vpop.f32.mrb[8].mxu0 }
 0x320   : > { %v2196_v39 = vadd.f32 %v4586_v36, %v7303_v33  ;;  %v2190_v21 = vpop.f32.mrb[9].mxu0 }
 0x321   : > { %v2191_v62 = vadd.f32 %v7303_v33, %v2190_v21  ;;  %v7380_v46 = vld [vmem:[#allocation3 + $0x58] sm:$0x3] }
 0x322   : > { %v2338_v41 = vmul.f32 0.8, %v2196_v39  ;;  %v7382_v43 = vld [vmem:[#allocation3 + $0x50] sm:$0xff]  ;;  %v2579_v23 = vrot.slane %v7380_v46, 1  ;;  %v7385_v6 = vld [vmem:[#allocation3 + $0x48] sm:$0xff] }
 0x323   : > { %v2337_v10 = vmul.f32 0.8, %v2191_v62  ;;  %v2577_v20 = vrot.slane %v7382_v43, 1  ;;  %v2576_v37 = vrot.slane %v7385_v6, 1 }
 0x324   : > { %v2374_v27 = vmax.f32 %v2196_v39, %v2338_v41 }
 0x325   : > { %v2373_v30 = vmax.f32 %v2191_v62, %v2337_v10  ;;  %v7390_v8 = vsel %vm598_vm2, %v2577_v20, %v2579_v23  ;;  %v7393_v7 = vsel %vm598_vm2, %v2576_v37, %v2577_v20 }
 0x326   : > { %2410 = vst.msk [vmem:[#allocation3 + $0x69] sm:$0xff] %vm1706_vm5, %v2374_v27  ;;  %2655 = vrot.lane.b32.xlu1 %v7390_v8, %s4941_s27  ;;  %2653 = vrot.lane.b32.xlu0 %v7393_v7, %s4941_s27 }
 0x327   : > { %2409 = vst.msk [vmem:[#allocation3 + $0x61] sm:$0xff] %vm1706_vm5, %v2373_v30 }
 0x32b   : > { %v4589_v4 = vpop.f32.mrb[10].mxu0 }
 0x32c   : > { %v2206_v61 = vadd.f32 %v4589_v4, %v7303_v33  ;;  %v2200_v50 = vpop.f32.mrb[11].mxu0 }
 0x32d   : > { %v2201_v38 = vadd.f32 %v7303_v33, %v2200_v50  ;;  %v7403_v42 = vld [vmem:[#allocation3 + $0x70] sm:$0x3] }
 0x32e   : > { %v2340_v35 = vmul.f32 0.8, %v2206_v61  ;;  %v7405_v22 = vld [vmem:[#allocation3 + $0x68] sm:$0xff]  ;;  %v2584_v1 = vrot.slane %v7403_v42, 1  ;;  %v7408_v60 = vld [vmem:[#allocation3 + $0x60] sm:$0xff] }
 0x32f   : > { %v2339_v11 = vmul.f32 0.8, %v2201_v38  ;;  %v2582_v28 = vrot.slane %v7405_v22, 1  ;;  %v2581_v29 = vrot.slane %v7408_v60, 1 }
 0x330   : > { %v2376_v5 = vmax.f32 %v2206_v61, %v2340_v35 }
 0x331   : > { %v2375_v58 = vmax.f32 %v2201_v38, %v2339_v11  ;;  %v7413_v56 = vsel %vm598_vm2, %v2582_v28, %v2584_v1  ;;  %v7416_v18 = vsel %vm598_vm2, %v2581_v29, %v2582_v28 }
 0x332   : > { %2412 = vst.msk [vmem:[#allocation3 + $0x81] sm:$0xff] %vm1706_vm5, %v2376_v5  ;;  %2659 = vrot.lane.b32.xlu1 %v7413_v56, %s4941_s27  ;;  %2657 = vrot.lane.b32.xlu0 %v7416_v18, %s4941_s27 }
 0x333   : > { %2411 = vst.msk [vmem:[#allocation3 + $0x79] sm:$0xff] %vm1706_vm5, %v2375_v58 }
 0x337   : > { %v4592_v16 = vpop.f32.mrb[12].mxu0 }
 0x338   : > { %v2216_v3 = vadd.f32 %v4592_v16, %v7303_v33  ;;  %v2210_v53 = vpop.f32.mrb[13].mxu0 }
 0x339   : > { %v2211_v49 = vadd.f32 %v7303_v33, %v2210_v53  ;;  %v7426_v9 = vld [vmem:[#allocation3 + $0x88] sm:$0x3] }
 0x33a   : > { %v2342_v32 = vmul.f32 0.8, %v2216_v3  ;;  %v7428_v45 = vld [vmem:[#allocation3 + $0x80] sm:$0xff]  ;;  %v2589_v2 = vrot.slane %v7426_v9, 1  ;;  %v7431_v25 = vld [vmem:[#allocation3 + $0x78] sm:$0xff] }
 0x33b   : > { %v2341_v26 = vmul.f32 0.8, %v2211_v49  ;;  %v2587_v13 = vrot.slane %v7428_v45, 1  ;;  %v2586_v17 = vrot.slane %v7431_v25, 1 }
 0x33c   : > { %v2378_v31 = vmax.f32 %v2216_v3, %v2342_v32 }
 0x33d   : > { %v2377_v48 = vmax.f32 %v2211_v49, %v2341_v26  ;;  %v7436_v52 = vsel %vm598_vm2, %v2587_v13, %v2589_v2  ;;  %v7439_v47 = vsel %vm598_vm2, %v2586_v17, %v2587_v13 }
 0x33e   : > { %2414 = vst.msk [vmem:[#allocation3 + $0x99] sm:$0xff] %vm1706_vm5, %v2378_v31  ;;  %2663 = vrot.lane.b32.xlu1 %v7436_v52, %s4941_s27  ;;  %2661 = vrot.lane.b32.xlu0 %v7439_v47, %s4941_s27 }
 0x33f   : > { %2413 = vst.msk [vmem:[#allocation3 + $0x91] sm:$0xff] %vm1706_vm5, %v2377_v48 }
 0x343   : > { %v4595_v34 = vpop.f32.mrb[14].mxu0 }
 0x344   : > { %v2226_v36 = vadd.f32 %v4595_v34, %v7303_v33  ;;  %v2220_v39 = vpop.f32.mrb[15].mxu0 }
 0x345   : > { %v2221_v21 = vadd.f32 %v7303_v33, %v2220_v39  ;;  %v7449_v62 = vld [vmem:[#allocation3 + $0xa0] sm:$0x3] }
 0x346   : > { %v2344_v41 = vmul.f32 0.8, %v2226_v36  ;;  %v7451_v23 = vld [vmem:[#allocation3 + $0x98] sm:$0xff]  ;;  %v2594_v10 = vrot.slane %v7449_v62, 1  ;;  %v7454_v20 = vld [vmem:[#allocation3 + $0x90] sm:$0xff] }
 0x347   : > { %v2343_v37 = vmul.f32 0.8, %v2221_v21  ;;  %v2592_v27 = vrot.slane %v7451_v23, 1  ;;  %v2591_v30 = vrot.slane %v7454_v20, 1 }
 0x348   : > { %v2380_v4 = vmax.f32 %v2226_v36, %v2344_v41 }
 0x349   : > { %v2379_v61 = vmax.f32 %v2221_v21, %v2343_v37  ;;  %v7459_v50 = vsel %vm598_vm2, %v2592_v27, %v2594_v10  ;;  %v7462_v38 = vsel %vm598_vm2, %v2591_v30, %v2592_v27 }
 0x34a   : > { %2416 = vst.msk [vmem:[#allocation3 + $0xb1] sm:$0xff] %vm1706_vm5, %v2380_v4  ;;  %2667 = vrot.lane.b32.xlu1 %v7459_v50, %s4941_s27  ;;  %2665 = vrot.lane.b32.xlu0 %v7462_v38, %s4941_s27 }
 0x34b   : > { %2415 = vst.msk [vmem:[#allocation3 + $0xa9] sm:$0xff] %vm1706_vm5, %v2379_v61 }
 0x34f   : > { %v4598_v35 = vpop.f32.mrb[16].mxu0 }
 0x350   : > { %v2236_v1 = vadd.f32 %v4598_v35, %v7303_v33  ;;  %v2230_v11 = vpop.f32.mrb[17].mxu0 }
 0x351   : > { %v2231_v28 = vadd.f32 %v7303_v33, %v2230_v11  ;;  %v7472_v29 = vld [vmem:[#allocation3 + $0xb8] sm:$0x3] }
 0x352   : > { %v2346_v5 = vmul.f32 0.8, %v2236_v1  ;;  %v7474_v58 = vld [vmem:[#allocation3 + $0xb0] sm:$0xff]  ;;  %v2599_v16 = vrot.slane %v7472_v29, 1  ;;  %v7477_v3 = vld [vmem:[#allocation3 + $0xa8] sm:$0xff] }
 0x353   : > { %v2345_v53 = vmul.f32 0.8, %v2231_v28  ;;  %v2597_v49 = vrot.slane %v7474_v58, 1  ;;  %v2596_v32 = vrot.slane %v7477_v3, 1 }
 0x354   : > { %v2382_v2 = vmax.f32 %v2236_v1, %v2346_v5 }
 0x355   : > { %v2381_v26 = vmax.f32 %v2231_v28, %v2345_v53  ;;  %v7482_v13 = vsel %vm598_vm2, %v2597_v49, %v2599_v16  ;;  %v7485_v17 = vsel %vm598_vm2, %v2596_v32, %v2597_v49 }
 0x356   : > { %2418 = vst.msk [vmem:[#allocation3 + $0xc9] sm:$0xff] %vm1706_vm5, %v2382_v2  ;;  %2671 = vrot.lane.b32.xlu1 %v7482_v13, %s4941_s27  ;;  %2669 = vrot.lane.b32.xlu0 %v7485_v17, %s4941_s27 }
 0x357   : > { %2417 = vst.msk [vmem:[#allocation3 + $0xc1] sm:$0xff] %vm1706_vm5, %v2381_v26 }
 0x35b   : > { %v4601_v31 = vpop.f32.mrb[18].mxu0 }
 0x35c   : > { %v2246_v48 = vadd.f32 %v4601_v31, %v7303_v33  ;;  %v2240_v34 = vpop.f32.mrb[19].mxu0 }
 0x35d   : > { %v2241_v36 = vadd.f32 %v7303_v33, %v2240_v34  ;;  %v7495_v39 = vld [vmem:[#allocation3 + $0xd0] sm:$0x3] }
 0x35e   : > { %v2348_v21 = vmul.f32 0.8, %v2246_v48  ;;  %v7497_v41 = vld [vmem:[#allocation3 + $0xc8] sm:$0xff]  ;;  %v2604_v10 = vrot.slane %v7495_v39, 1  ;;  %v7500_v37 = vld [vmem:[#allocation3 + $0xc0] sm:$0xff] }
 0x35f   : > { %v2347_v27 = vmul.f32 0.8, %v2241_v36  ;;  %v2602_v30 = vrot.slane %v7497_v41, 1  ;;  %v2601_v4 = vrot.slane %v7500_v37, 1 }
 0x360   : > { %v2384_v61 = vmax.f32 %v2246_v48, %v2348_v21 }
 0x361   : > { %v2383_v35 = vmax.f32 %v2241_v36, %v2347_v27  ;;  %v7505_v1 = vsel %vm598_vm2, %v2602_v30, %v2604_v10  ;;  %v7508_v11 = vsel %vm598_vm2, %v2601_v4, %v2602_v30 }
 0x362   : > { %2420 = vst.msk [vmem:[#allocation3 + $0xe1] sm:$0xff] %vm1706_vm5, %v2384_v61  ;;  %2675 = vrot.lane.b32.xlu1 %v7505_v1, %s4941_s27  ;;  %2673 = vrot.lane.b32.xlu0 %v7508_v11, %s4941_s27 }
 0x363   : > { %2419 = vst.msk [vmem:[#allocation3 + $0xd9] sm:$0xff] %vm1706_vm5, %v2383_v35 }
 0x367   : > { %v4604_v28 = vpop.f32.mrb[20].mxu0 }
 0x368   : > { %v2256_v5 = vadd.f32 %v4604_v28, %v7303_v33  ;;  %v2250_v16 = vpop.f32.mrb[21].mxu0 }
 0x369   : > { %v2251_v53 = vadd.f32 %v7303_v33, %v2250_v16  ;;  %v7518_v49 = vld [vmem:[#allocation3 + $0xe8] sm:$0x3] }
 0x36a   : > { %9474 = vst [vmem:[#allocation30_spill] sm:$0xff] %v7518_v49  ;;  %v2350_v32 = vmul.f32 0.8, %v2256_v5  ;;  %v7520_v2 = vld [vmem:[#allocation3 + $0xe0] sm:$0xff]  ;;  %v2609_v26 = vrot.slane %v7518_v49, 1  ;;  %v7523_v31 = vld [vmem:[#allocation3 + $0xd8] sm:$0xff] }
 0x36b   : > { %9475 = vst [vmem:[#allocation55_spill] sm:$0xff] %v7520_v2  ;;  %v2349_v48 = vmul.f32 0.8, %v2251_v53  ;;  %v2607_v34 = vrot.slane %v7520_v2, 1  ;;  %v2606_v36 = vrot.slane %v7523_v31, 1 }
 0x36c   : > { %v2386_v21 = vmax.f32 %v2256_v5, %v2350_v32 }
 0x36d   : > { %v2385_v10 = vmax.f32 %v2251_v53, %v2349_v48  ;;  %v7528_v27 = vsel %vm598_vm2, %v2607_v34, %v2609_v26  ;;  %v7531_v30 = vsel %vm598_vm2, %v2606_v36, %v2607_v34 }
 0x36e   : > { %9476 = vst [vmem:[#allocation54_spill] sm:$0xff] %v7528_v27  ;;  %2422 = vst.msk [vmem:[#allocation3 + $0xf9] sm:$0xff] %vm1706_vm5, %v2386_v21  ;;  %2679 = vrot.lane.b32.xlu1 %v7528_v27, %s4941_s27  ;;  %2677 = vrot.lane.b32.xlu0 %v7531_v30, %s4941_s27 }
 0x36f   : > { %2421 = vst.msk [vmem:[#allocation3 + $0xf1] sm:$0xff] %vm1706_vm5, %v2385_v10 }
 0x373   : > { %v4607_v4 = vpop.f32.mrb[22].mxu0 }
 0x374   : > { %v2266_v61 = vadd.f32 %v4607_v4, %v7303_v33  ;;  %v2260_v35 = vpop.f32.mrb[23].mxu0 }
 0x375   : > { %v2261_v28 = vadd.f32 %v7303_v33, %v2260_v35  ;;  %v2481_v5 = vld [vmem:[#allocation3 + $0x100] sm:$0x3] }
 0x376   : > { %v2352_v16 = vmul.f32 0.8, %v2266_v61  ;;  %v7541_v53 = vld [vmem:[#allocation3 + $0xf8] sm:$0xff]  ;;  %v2614_v32 = vrot.slane %v2481_v5, 1  ;;  %v7543_v26 = vld [vmem:[#allocation3 + $0xf0] sm:$0xff] }
 0x377   : > { %9477 = vst [vmem:[#allocation51_spill] sm:$0xff] %v7541_v53  ;;  %9478 = vst [vmem:[#allocation97_spill] sm:$0xff] %v7543_v26  ;;  %v2351_v48 = vmul.f32 0.8, %v2261_v28  ;;  %v2612_v34 = vrot.slane %v7541_v53, 1  ;;  %v2611_v36 = vrot.slane %v7543_v26, 1 }
 0x378   : > { %v2388_v21 = vmax.f32 %v2266_v61, %v2352_v16 }
 0x379   : > { %v2387_v10 = vmax.f32 %v2261_v28, %v2351_v48  ;;  %v7548_v49 = vsel %vm598_vm2, %v2612_v34, %v2614_v32  ;;  %v7551_v4 = vsel %vm598_vm2, %v2611_v36, %v2612_v34 }
 0x37a   : > { %9479 = vst [vmem:[#allocation56_spill] sm:$0xff] %v7548_v49  ;;  %9480 = vst [vmem:[#allocation98_spill] sm:$0xff] %v7551_v4  ;;  %2683 = vrot.lane.b32.xlu1 %v7548_v49, %s4941_s27  ;;  %2681 = vrot.lane.b32.xlu0 %v7551_v4, %s4941_s27 }
 0x37b   : > { %2424 = vst.msk [vmem:[#allocation3 + $0x111] sm:$0xff] %vm1706_vm5, %v2388_v21  ;;  %2423 = vst.msk [vmem:[#allocation3 + $0x109] sm:$0xff] %vm1706_vm5, %v2387_v10 }
 0x37f   : > { %v4610_v35 = vpop.f32.mrb[24].mxu0 }
 0x380   : > { %v2276_v61 = vadd.f32 %v4610_v35, %v7303_v33  ;;  %v2270_v28 = vpop.f32.mrb[25].mxu0 }
 0x381   : > { %v2271_v5 = vadd.f32 %v7303_v33, %v2270_v28 }
 0x382   : > { %v2484_v16 = vld [vmem:[#allocation3 + $0x118] sm:$0x3]  ;;  %v2354_v32 = vmul.f32 0.8, %v2276_v61  ;;  %v2483_v48 = vld [vmem:[#allocation3 + $0x110] sm:$0xff]  ;;  %v2482_v36 = vld [vmem:[#allocation3 + $0x108] sm:$0xff] }
 0x383   : > { %v2619_v34 = vrot.slane %v2484_v16, 1  ;;  %v2353_v21 = vmul.f32 0.8, %v2271_v5  ;;  %v2617_v53 = vrot.slane %v2483_v48, 1  ;;  %v2616_v26 = vrot.slane %v2482_v36, 1 }
 0x384   : > { %v2390_v49 = vmax.f32 %v2276_v61, %v2354_v32 }
 0x385   : > { %v2389_v27 = vmax.f32 %v2271_v5, %v2353_v21  ;;  %v7562_v4 = vsel %vm598_vm2, %v2617_v53, %v2619_v34  ;;  %v7565_v10 = vsel %vm598_vm2, %v2616_v26, %v2617_v53 }
 0x386   : > { %9481 = vst [vmem:[#allocation27_spill] sm:$0xff] %v7562_v4  ;;  %9482 = vst [vmem:[#allocation28_spill] sm:$0xff] %v7565_v10  ;;  %2687 = vrot.lane.b32.xlu1 %v7562_v4, %s4941_s27  ;;  %2685 = vrot.lane.b32.xlu0 %v7565_v10, %s4941_s27 }
 0x387   : > { %2426 = vst.msk [vmem:[#allocation3 + $0x129] sm:$0xff] %vm1706_vm5, %v2390_v49  ;;  %2425 = vst.msk [vmem:[#allocation3 + $0x121] sm:$0xff] %vm1706_vm5, %v2389_v27 }
 0x38b   : > { %v4613_v35 = vpop.f32.mrb[26].mxu0 }
 0x38c   : > { %v2286_v61 = vadd.f32 %v4613_v35, %v7303_v33  ;;  %v2280_v28 = vpop.f32.mrb[27].mxu0 }
 0x38d   : > { %v2281_v5 = vadd.f32 %v7303_v33, %v2280_v28 }
 0x38e   : > { %v2487_v16 = vld [vmem:[#allocation3 + $0x130] sm:$0x3]  ;;  %v2356_v32 = vmul.f32 0.8, %v2286_v61  ;;  %v2486_v53 = vld [vmem:[#allocation3 + $0x128] sm:$0xff]  ;;  %v2485_v48 = vld [vmem:[#allocation3 + $0x120] sm:$0xff] }
 0x38f   : > { %v2624_v26 = vrot.slane %v2487_v16, 1  ;;  %v2355_v49 = vmul.f32 0.8, %v2281_v5  ;;  %v2622_v34 = vrot.slane %v2486_v53, 1  ;;  %v2621_v36 = vrot.slane %v2485_v48, 1 }
 0x390   : > { %v2392_v21 = vmax.f32 %v2286_v61, %v2356_v32 }
 0x391   : > { %v2391_v4 = vmax.f32 %v2281_v5, %v2355_v49  ;;  %v7576_v10 = vsel %vm598_vm2, %v2622_v34, %v2624_v26  ;;  %v7579_v27 = vsel %vm598_vm2, %v2621_v36, %v2622_v34 }
 0x392   : > { %9483 = vst [vmem:[#allocation52_spill] sm:$0xff] %v7576_v10  ;;  %9484 = vst [vmem:[#allocation31_spill] sm:$0xff] %v7579_v27  ;;  %2691 = vrot.lane.b32.xlu1 %v7576_v10, %s4941_s27  ;;  %2689 = vrot.lane.b32.xlu0 %v7579_v27, %s4941_s27 }
 0x393   : > { %2428 = vst.msk [vmem:[#allocation3 + $0x141] sm:$0xff] %vm1706_vm5, %v2392_v21  ;;  %2427 = vst.msk [vmem:[#allocation3 + $0x139] sm:$0xff] %vm1706_vm5, %v2391_v4 }
 0x397   : > { %v4616_v35 = vpop.f32.mrb[28].mxu0 }
 0x398   : > { %v2296_v61 = vadd.f32 %v4616_v35, %v7303_v33  ;;  %v2290_v28 = vpop.f32.mrb[29].mxu0 }
 0x399   : > { %v2291_v5 = vadd.f32 %v7303_v33, %v2290_v28 }
 0x39a   : > { %v2490_v16 = vld [vmem:[#allocation3 + $0x148] sm:$0x3]  ;;  %v2358_v32 = vmul.f32 0.8, %v2296_v61  ;;  %v2489_v53 = vld [vmem:[#allocation3 + $0x140] sm:$0xff]  ;;  %v2488_v48 = vld [vmem:[#allocation3 + $0x138] sm:$0xff] }
 0x39b   : > { %v2629_v26 = vrot.slane %v2490_v16, 1  ;;  %v2357_v49 = vmul.f32 0.8, %v2291_v5  ;;  %v2627_v34 = vrot.slane %v2489_v53, 1  ;;  %v2626_v36 = vrot.slane %v2488_v48, 1 }
 0x39c   : > { %v2394_v21 = vmax.f32 %v2296_v61, %v2358_v32 }
 0x39d   : > { %v2393_v10 = vmax.f32 %v2291_v5, %v2357_v49  ;;  %v7590_v27 = vsel %vm598_vm2, %v2627_v34, %v2629_v26  ;;  %v7593_v4 = vsel %vm598_vm2, %v2626_v36, %v2627_v34 }
 0x39e   : > { %9485 = vst [vmem:[#allocation32_spill] sm:$0xff] %v7590_v27  ;;  %9486 = vst [vmem:[#allocation59_spill] sm:$0xff] %v7593_v4  ;;  %2695 = vrot.lane.b32.xlu1 %v7590_v27, %s4941_s27  ;;  %2693 = vrot.lane.b32.xlu0 %v7593_v4, %s4941_s27 }
 0x39f   : > { %2430 = vst.msk [vmem:[#allocation3 + $0x159] sm:$0xff] %vm1706_vm5, %v2394_v21  ;;  %2429 = vst.msk [vmem:[#allocation3 + $0x151] sm:$0xff] %vm1706_vm5, %v2393_v10 }
 0x3a3   : > { %v4619_v35 = vpop.f32.mrb[30].mxu0 }
 0x3a4   : > { %v2306_v61 = vadd.f32 %v4619_v35, %v7303_v33  ;;  %v2300_v28 = vpop.f32.mrb[31].mxu0 }
 0x3a5   : > { %v2301_v5 = vadd.f32 %v7303_v33, %v2300_v28 }
 0x3a6   : > { %v2493_v16 = vld [vmem:[#allocation3 + $0x160] sm:$0x3]  ;;  %v2360_v32 = vmul.f32 0.8, %v2306_v61  ;;  %v2492_v53 = vld [vmem:[#allocation3 + $0x158] sm:$0xff]  ;;  %v2491_v48 = vld [vmem:[#allocation3 + $0x150] sm:$0xff] }
 0x3a7   : > { %v2634_v26 = vrot.slane %v2493_v16, 1  ;;  %v2359_v49 = vmul.f32 0.8, %v2301_v5  ;;  %v2632_v34 = vrot.slane %v2492_v53, 1  ;;  %v2631_v36 = vrot.slane %v2491_v48, 1 }
 0x3a8   : > { %v2396_v21 = vmax.f32 %v2306_v61, %v2360_v32  ;;  %v2738_v32 = vrot.slane %v7321_v19, 2 }
 0x3a9   : > { %v2395_v27 = vmax.f32 %v2301_v5, %v2359_v49  ;;  %v7604_v4 = vsel %vm598_vm2, %v2632_v34, %v2634_v26  ;;  %v7607_v10 = vsel %vm598_vm2, %v2631_v36, %v2632_v34  ;;  %v2740_v34 = vrot.slane %v7318_v54, 2 }
 0x3aa   : > { %9487 = vst [vmem:[#allocation58_spill] sm:$0xff] %v7604_v4  ;;  %9488 = vst [vmem:[#allocation61_spill] sm:$0xff] %v7607_v10  ;;  %2699 = vrot.lane.b32.xlu1 %v7604_v4, %s4941_s27  ;;  %2697 = vrot.lane.b32.xlu0 %v7607_v10, %s4941_s27 }
 0x3ab   : > { %2432 = vst.msk [vmem:[#allocation3 + $0x171] sm:$0xff] %vm1706_vm5, %v2396_v21  ;;  %2431 = vst.msk [vmem:[#allocation3 + $0x169] sm:$0xff] %vm1706_vm5, %v2395_v27  ;;  %v2737_v27 = vrot.slane %v7324_v51, 2  ;;  %v2741_v54 = vsel %vm797_vm3, %v2738_v32, %v2740_v34  ;;  %v2743_v51 = vrot.slane %v7336_v55, 2 }
 0x3ad   : > { %v2739_v19 = vsel %vm797_vm3, %v2737_v27, %v2738_v32  ;;  %v2747_v32 = vrot.slane %v7362_v59, 2 }
 0x3af   : > { %v4622_v35 = vpop.f32.mrb[32].mxu0 }
 0x3b0   : > { %v2316_v61 = vadd.f32 %v4622_v35, %v7303_v33  ;;  %v2310_v28 = vpop.f32.mrb[33].mxu0 }
 0x3b1   : > { %v2311_v5 = vadd.f32 %v7303_v33, %v2310_v28 }
 0x3b2   : > { %v2496_v16 = vld [vmem:[#allocation3 + $0x178] sm:$0x3]  ;;  %v2362_v53 = vmul.f32 0.8, %v2316_v61  ;;  %v2495_v26 = vld [vmem:[#allocation3 + $0x170] sm:$0xff]  ;;  %v2494_v49 = vld [vmem:[#allocation3 + $0x168] sm:$0xff] }
 0x3b3   : > { %v2639_v48 = vrot.slane %v2496_v16, 1  ;;  %v2361_v36 = vmul.f32 0.8, %v2311_v5  ;;  %v2637_v21 = vrot.slane %v2495_v26, 1  ;;  %v2636_v4 = vrot.slane %v2494_v49, 1 }
 0x3b4   : > { %v2398_v10 = vmax.f32 %v2316_v61, %v2362_v53  ;;  %v2745_v61 = vrot.slane %v7334_v15, 2  ;;  %v2750_v53 = vrot.slane %v7357_v14, 2 }
 0x3b5   : > { %v2397_v2 = vmax.f32 %v2311_v5, %v2361_v36  ;;  %v7621_v35 = vsel %vm598_vm2, %v2637_v21, %v2639_v48  ;;  %v7624_v28 = vsel %vm598_vm2, %v2636_v4, %v2637_v21  ;;  %v2742_v4 = vrot.slane %v7339_v44, 2 }
 0x3b6   : > { %2434 = vst.msk [vmem:[#allocation3 + $0x189] sm:$0xff] %vm1706_vm5, %v2398_v10  ;;  %2703 = vrot.lane.b32.xlu1 %v7621_v35, %s4941_s27  ;;  %2701 = vrot.lane.b32.xlu0 %v7624_v28, %s4941_s27  ;;  %v2746_v15 = vsel %vm797_vm3, %v2743_v51, %v2745_v61 }
 0x3b7   : > { %2433 = vst.msk [vmem:[#allocation3 + $0x181] sm:$0xff] %vm1706_vm5, %v2397_v2  ;;  %v2748_v2 = vrot.slane %v7359_v12, 2  ;;  %v2744_v48 = vsel %vm797_vm3, %v2742_v4, %v2743_v51  ;;  %v2760_v51 = vrot.slane %v7403_v42, 2  ;;  %v2763_v42 = vrot.slane %v7428_v45, 2 }
 0x3b9   : > { %v7649_v21 = vsel %vm797_vm3, %v2748_v2, %v2750_v53  ;;  %v7652_v14 = vsel %vm797_vm3, %v2747_v32, %v2748_v2  ;;  %v2765_v2 = vrot.slane %v7426_v9, 2  ;;  %v2762_v53 = vrot.slane %v7431_v25, 2  ;;  %v2503_v9 = vld [vmem:[%s8883_s4] sm:$0xff] }
 0x3ba   : > { %2819 = vrot.lane.b32.xlu1 %v2741_v54, %s4943_s30  ;;  %2817 = vrot.lane.b32.xlu0 %v2739_v19, %s4943_s30  ;;  %v2755_v54 = vrot.slane %v7380_v46, 2  ;;  %v2752_v19 = vrot.slane %v7385_v6, 2  ;;  %v2758_v46 = vrot.slane %v7405_v22, 2 }
 0x3bb   : > { %v4625_v10 = vpop.f32.mrb[34].mxu0  ;;  %v7696_v32 = vsel %vm797_vm3, %v2763_v42, %v2765_v2 }
 0x3bc   : > { %v2326_v5 = vadd.f32 %v4625_v10, %v7303_v33  ;;  %v2320_v16 = vpop.f32.mrb[35].mxu0  ;;  %v2757_v10 = vrot.slane %v7408_v60, 2 }
 0x3bd   : > { %v2321_v26 = vadd.f32 %v7303_v33, %v2320_v16  ;;  %v2753_v33 = vrot.slane %v7382_v43, 2 }
 0x3be   : > { %v2364_v49 = vmul.f32 0.8, %v2326_v5  ;;  %2823 = vrot.lane.b32.xlu1 %v2746_v15, %s4943_s30  ;;  %2821 = vrot.lane.b32.xlu0 %v2744_v48, %s4943_s30  ;;  %v7686_v16 = vsel %vm797_vm3, %v2757_v10, %v2758_v46 }
 0x3bf   : > { %v2363_v34 = vmul.f32 0.8, %v2321_v26  ;;  %v7672_v61 = vsel %vm797_vm3, %v2753_v33, %v2755_v54  ;;  %v7675_v4 = vsel %vm797_vm3, %v2752_v19, %v2753_v33  ;;  %v7754_v54 = vpop.permute.xlu1 %2643  ;;  %v7756_v19 = vpop.permute.xlu0 %2641 }
 0x3c0   : > { %v2400_v36 = vmax.f32 %v2326_v5, %v2364_v49  ;;  %v7683_v5 = vsel %vm797_vm3, %v2758_v46, %v2760_v51  ;;  %v2504_v49 = vld [vmem:[%s8883_s4 + $0x8] sm:$0xff] }
 0x3c1   : > { %v2399_v27 = vmax.f32 %v2321_v26, %v2363_v34  ;;  %v7699_v26 = vsel %vm797_vm3, %v2762_v53, %v2763_v42  ;;  %v4700_v34 = vpack.c.bf16 %v2504_v49, %v2503_v9 }
 0x3c2   : > { %2436 = vst.msk [vmem:[#allocation3 + $0x1a1] sm:$0xff] %vm1706_vm5, %v2400_v36  ;;  %2827 = vrot.lane.b32.xlu1 %v7649_v21, %s4943_s30  ;;  %2825 = vrot.lane.b32.xlu0 %v7652_v14, %s4943_s30 }
 0x3c3   : > { %2448 = vst.msk [vmem:[#allocation3 + $0x1a8] sm:$0x3] %vm2443_vm14, %v9372_v0  ;;  %4701 = vmatprep.subr.bf16.mxu1 %v4700_v34 }
 0x3c4   : > { %2435 = vst.msk [vmem:[#allocation3 + $0x199] sm:$0xff] %vm1706_vm5, %v2399_v27  ;;  %4703 = vmatpush3.bf16.msra.mxu1 %v4700_v34 }
 0x3c5   : > { %2446 = vst.msk [vmem:[#allocation3 + $0x198] sm:$0xff] %vm1706_vm5, %v9372_v0  ;;  %2447 = vst.msk [vmem:[#allocation3 + $0x1a0] sm:$0xff] %vm1706_vm5, %v9372_v0 }
 0x3c6   : > { %2831 = vrot.lane.b32.xlu1 %v7672_v61, %s4943_s30  ;;  %2829 = vrot.lane.b32.xlu0 %v7675_v4, %s4943_s30 }
 0x3ca   : > { %2835 = vrot.lane.b32.xlu1 %v7683_v5, %s4943_s30  ;;  %2833 = vrot.lane.b32.xlu0 %v7686_v16, %s4943_s30 }
 0x3ce   : > { %2839 = vrot.lane.b32.xlu1 %v7696_v32, %s4943_s30  ;;  %2837 = vrot.lane.b32.xlu0 %v7699_v26, %s4943_s30 }
 0x3d2   : > { %2917 = vrot.lane.b32.xlu1 %v7336_v55, %s4945_s11  ;;  %2915 = vrot.lane.b32.xlu0 %v7339_v44, %s4945_s11  ;;  %v2505_v55 = vld [vmem:[%s8883_s4 + $0x10] sm:$0xff]  ;;  %v2506_v44 = vld [vmem:[%s8883_s4 + $0x18] sm:$0xff] }
 0x3d3   : > { %v4704_v36 = vpack.c.bf16 %v2506_v44, %v2505_v55 }
 0x3d5   : > { %4705 = vmatprep.subr.bf16.mxu1 %v4704_v36 }
 0x3d6   : > { %3019 = vrot.lane.b32.xlu1 %v7344_v63, %s4947_s12  ;;  %3017 = vrot.lane.b32.xlu0 %v7347_v40, %s4947_s12  ;;  %v2507_v63 = vld [vmem:[%s8883_s4 + $0x20] sm:$0xff]  ;;  %v2508_v40 = vld [vmem:[%s8883_s4 + $0x28] sm:$0xff] }
 0x3d7   : > { %4707 = vmatpush3.bf16.msra.mxu1 %v4704_v36  ;;  %v4708_v27 = vpack.c.bf16 %v2508_v40, %v2507_v63 }
 0x3d9   : > { %4709 = vmatprep.subr.bf16.mxu1 %v4708_v27 }
 0x3da   : > { %3120 = vrot.lane.b32.xlu1 %v2746_v15, %s4948_s16  ;;  %3118 = vrot.lane.b32.xlu0 %v2744_v48, %s4948_s16  ;;  %v2509_v15 = vld [vmem:[%s8883_s4 + $0x30] sm:$0xff]  ;;  %v2510_v48 = vld [vmem:[%s8883_s4 + $0x38] sm:$0xff] }
 0x3db   : > { %4711 = vmatpush3.bf16.msra.mxu1 %v4708_v27  ;;  %v4712_v33 = vpack.c.bf16 %v2510_v48, %v2509_v15 }
 0x3dd   : > { %4713 = vmatprep.subr.bf16.mxu1 %v4712_v33 }
 0x3de   : > { %2919 = vrot.lane.b32.xlu1 %v7362_v59, %s4945_s11  ;;  %3216 = vrot.lane.b32.xlu0 %v7362_v59, %s4949_s18  ;;  %v2511_v59 = vld [vmem:[%s8883_s4 + $0x40] sm:$0xff] }
 0x3df   : > { %4715 = vmatpush3.bf16.msra.mxu1 %v4712_v33 }
 0x3e0   : > { %4642 = vmatprep.subr.mxu1 %v2511_v59 }
 0x3e2   : > { %3318 = vrot.lane.b32.xlu1 %v7370_v57, %s4950_s13  ;;  %3218 = vrot.lane.b32.xlu0 %v7359_v12, %s4949_s18 }
 0x3e3   : > { %4643 = vmatpush3.msra.mxu1 %v2511_v59 }
 0x3e6   : > { %3021 = vrot.lane.b32.xlu1 %v7370_v57, %s4947_s12  ;;  %2921 = vrot.lane.b32.xlu0 %v7359_v12, %s4945_s11  ;;  %v7766_v57 = vpop.permute.xlu1 %2647  ;;  %v7768_v12 = vpop.permute.xlu0 %2645 }
 0x3ea   : > { %3419 = vrot.lane.b32.xlu1 %v7652_v14, %s4951_s17  ;;  %3320 = vrot.lane.b32.xlu0 %v7367_v24, %s4950_s13  ;;  %v7774_v46 = vpop.permute.xlu1 %2651  ;;  %v7776_v51 = vpop.permute.xlu0 %2649 }
 0x3ee   : > { %3122 = vrot.lane.b32.xlu1 %v7652_v14, %s4948_s16  ;;  %3023 = vrot.lane.b32.xlu0 %v7367_v24, %s4947_s12  ;;  %v7782_v24 = vpop.permute.xlu1 %2655  ;;  %v7784_v14 = vpop.permute.xlu0 %2653 }
 0x3f2   : > { %3124 = vrot.lane.b32.xlu1 %v7649_v21, %s4948_s16  ;;  %3421 = vrot.lane.b32.xlu0 %v7649_v21, %s4951_s17  ;;  %v7790_v21 = vpop.permute.xlu1 %2659  ;;  %v7792_v10 = vpop.permute.xlu0 %2657 }
 0x3f6   : > { %2923 = vrot.lane.b32.xlu1 %v7385_v6, %s4945_s11  ;;  %3220 = vrot.lane.b32.xlu0 %v7385_v6, %s4949_s18  ;;  %v7798_v6 = vpop.permute.xlu1 %2663  ;;  %v7800_v42 = vpop.permute.xlu0 %2661 }
 0x3fa   : > { %3322 = vrot.lane.b32.xlu1 %v7393_v7, %s4950_s13  ;;  %3222 = vrot.lane.b32.xlu0 %v7382_v43, %s4949_s18  ;;  %v7806_v2 = vpop.permute.xlu1 %2667  ;;  %v7808_v53 = vpop.permute.xlu0 %2665 }
 0x3fe   : > { %3025 = vrot.lane.b32.xlu1 %v7393_v7, %s4947_s12  ;;  %2925 = vrot.lane.b32.xlu0 %v7382_v43, %s4945_s11  ;;  %v7814_v43 = vpop.permute.xlu1 %2671  ;;  %v7816_v7 = vpop.permute.xlu0 %2669 }
 0x402   : > { %3423 = vrot.lane.b32.xlu1 %v7675_v4, %s4951_s17  ;;  %3324 = vrot.lane.b32.xlu0 %v7390_v8, %s4950_s13  ;;  %v7822_v9 = vpop.permute.xlu1 %2675  ;;  %v7824_v49 = vpop.permute.xlu0 %2673 }
 0x406   : > { %3126 = vrot.lane.b32.xlu1 %v7675_v4, %s4948_s16  ;;  %3027 = vrot.lane.b32.xlu0 %v7390_v8, %s4947_s12  ;;  %v7830_v8 = vpop.permute.xlu1 %2679  ;;  %v7832_v4 = vpop.permute.xlu0 %2677 }
 0x407   : > { %9489 = vst [vmem:[#allocation99_spill] sm:$0xff] %v7830_v8 }
 0x40a   : > { %3128 = vrot.lane.b32.xlu1 %v7672_v61, %s4948_s16  ;;  %3425 = vrot.lane.b32.xlu0 %v7672_v61, %s4951_s17  ;;  %v7838_v61 = vpop.permute.xlu1 %2683  ;;  %v7840_v34 = vpop.permute.xlu0 %2681 }
 0x40b   : > { %9490 = vst [vmem:[#allocation60_spill] sm:$0xff] %v7838_v61  ;;  %9491 = vst [vmem:[#allocation100_spill] sm:$0xff] %v7840_v34  ;;  %v4821_v61 = vld [vmem:[#allocation3] sm:$0xff] }
 0x40e   : > { %2927 = vrot.lane.b32.xlu1 %v7408_v60, %s4945_s11  ;;  %3224 = vrot.lane.b32.xlu0 %v7408_v60, %s4949_s18  ;;  %v7846_v60 = vpop.permute.xlu1 %2687  ;;  %v7848_v55 = vpop.permute.xlu0 %2685 }
 0x40f   : > { %9492 = vst [vmem:[#allocation29_spill] sm:$0xff] %v7846_v60  ;;  %9493 = vst [vmem:[#allocation113_spill] sm:$0xff] %v7848_v55 }
 0x412   : > { %3326 = vrot.lane.b32.xlu1 %v7416_v18, %s4950_s13  ;;  %3226 = vrot.lane.b32.xlu0 %v7405_v22, %s4949_s18  ;;  %v7854_v44 = vpop.permute.xlu1 %2691  ;;  %v7856_v36 = vpop.permute.xlu0 %2689 }
 0x413   : > { %9494 = vst [vmem:[#allocation137_spill] sm:$0xff] %v7854_v44  ;;  %9495 = vst [vmem:[#allocation33_spill] sm:$0xff] %v7856_v36 }
 0x416   : > { %3029 = vrot.lane.b32.xlu1 %v7416_v18, %s4947_s12  ;;  %2929 = vrot.lane.b32.xlu0 %v7405_v22, %s4945_s11  ;;  %v7862_v22 = vpop.permute.xlu1 %2695  ;;  %v7864_v18 = vpop.permute.xlu0 %2693 }
 0x417   : > { %9496 = vst [vmem:[#allocation34_spill] sm:$0xff] %v7862_v22  ;;  %9497 = vst [vmem:[#allocation63_spill] sm:$0xff] %v7864_v18 }
 0x41a   : > { %3427 = vrot.lane.b32.xlu1 %v7686_v16, %s4951_s17  ;;  %3328 = vrot.lane.b32.xlu0 %v7413_v56, %s4950_s13 }
 0x41c   : > { %v7870_v63 = vpop.permute.xlu1 %2699  ;;  %v7872_v40 = vpop.permute.xlu0 %2697 }
 0x41d   : > { %9498 = vst [vmem:[#allocation62_spill] sm:$0xff] %v7870_v63  ;;  %9499 = vst [vmem:[#allocation65_spill] sm:$0xff] %v7872_v40  ;;  %v2768_v63 = vrot.slane %v7451_v23, 2 }
 0x41e   : > { %3130 = vrot.lane.b32.xlu1 %v7686_v16, %s4948_s16  ;;  %3031 = vrot.lane.b32.xlu0 %v7413_v56, %s4947_s12 }
 0x422   : > { %3132 = vrot.lane.b32.xlu1 %v7683_v5, %s4948_s16  ;;  %3429 = vrot.lane.b32.xlu0 %v7683_v5, %s4951_s17 }
 0x426   : > { %2931 = vrot.lane.b32.xlu1 %v7431_v25, %s4945_s11  ;;  %3228 = vrot.lane.b32.xlu0 %v7431_v25, %s4949_s18 }
 0x428   : > { %v7878_v56 = vpop.permute.xlu1 %2703  ;;  %v7880_v16 = vpop.permute.xlu0 %2701 }
 0x429   : > { %9500 = vst [vmem:[#allocation101_spill] sm:$0xff] %v7878_v56  ;;  %9501 = vst [vmem:[#allocation102_spill] sm:$0xff] %v7880_v16  ;;  %v2767_v56 = vrot.slane %v7454_v20, 2 }
 0x42a   : > { %3330 = vrot.lane.b32.xlu1 %v7439_v47, %s4950_s13  ;;  %3230 = vrot.lane.b32.xlu0 %v7428_v45, %s4949_s18 }
 0x42b   : > { %v2769_v18 = vsel %vm797_vm3, %v2767_v56, %v2768_v63 }
 0x42c   : > { %v7886_v5 = vpop.permute.xlu1 %2819  ;;  %v2818_v27 = vpop.permute.xlu0 %2817 }
 0x42e   : > { %3033 = vrot.lane.b32.xlu1 %v7439_v47, %s4947_s12  ;;  %2933 = vrot.lane.b32.xlu0 %v7428_v45, %s4945_s11 }
 0x430   : > { %v7892_v25 = vpop.permute.xlu1 %2823  ;;  %v7894_v15 = vpop.permute.xlu0 %2821 }
 0x432   : > { %3431 = vrot.lane.b32.xlu1 %v7699_v26, %s4951_s17  ;;  %3332 = vrot.lane.b32.xlu0 %v7436_v52, %s4950_s13 }
 0x434   : > { %v7900_v48 = vpop.permute.xlu1 %2827  ;;  %v7902_v33 = vpop.permute.xlu0 %2825 }
 0x436   : > { %3134 = vrot.lane.b32.xlu1 %v7699_v26, %s4948_s16  ;;  %3035 = vrot.lane.b32.xlu0 %v7436_v52, %s4947_s12 }
 0x438   : > { %v7908_v45 = vpop.permute.xlu1 %2831  ;;  %v7910_v47 = vpop.permute.xlu0 %2829 }
 0x43a   : > { %3136 = vrot.lane.b32.xlu1 %v7696_v32, %s4948_s16  ;;  %3433 = vrot.lane.b32.xlu0 %v7696_v32, %s4951_s17 }
 0x43c   : > { %v7916_v59 = vpop.permute.xlu1 %2835  ;;  %v7918_v0 = vpop.permute.xlu0 %2833 }
 0x43e   : > { %2935 = vrot.lane.b32.xlu1 %v7454_v20, %s4945_s11  ;;  %3232 = vrot.lane.b32.xlu0 %v7454_v20, %s4949_s18  ;;  %v2770_v20 = vrot.slane %v7449_v62, 2  ;;  %v3515_v62 = vsel %vm1706_vm5, %v4821_v61, %v7756_v19 }
 0x440   : > { %v7924_v52 = vpop.permute.xlu1 %2839  ;;  %v7926_v26 = vpop.permute.xlu0 %2837  ;;  %v2771_v60 = vsel %vm797_vm3, %v2768_v63, %v2770_v20 }
 0x442   : > { %3334 = vrot.lane.b32.xlu1 %v7462_v38, %s4950_s13  ;;  %3234 = vrot.lane.b32.xlu0 %v7451_v23, %s4949_s18 }
 0x444   : > { %v2918_v32 = vpop.permute.xlu1 %2917  ;;  %v2916_v16 = vpop.permute.xlu0 %2915 }
 0x446   : > { %3037 = vrot.lane.b32.xlu1 %v7462_v38, %s4947_s12  ;;  %2937 = vrot.lane.b32.xlu0 %v7451_v23, %s4945_s11 }
 0x448   : > { %v3020_v40 = vpop.permute.xlu1 %3019  ;;  %v3018_v22 = vpop.permute.xlu0 %3017 }
 0x44a   : > { %3435 = vrot.lane.b32.xlu1 %v2769_v18, %s4951_s17  ;;  %3336 = vrot.lane.b32.xlu0 %v7459_v50, %s4950_s13 }
 0x44c   : > { %v3121_v44 = vpop.permute.xlu1 %3120  ;;  %v3119_v36 = vpop.permute.xlu0 %3118 }
 0x44e   : > { %3138 = vrot.lane.b32.xlu1 %v2769_v18, %s4948_s16  ;;  %3039 = vrot.lane.b32.xlu0 %v7459_v50, %s4947_s12  ;;  %v3547_v50 = vsel %vm1780_vm7, %v3515_v62, %v2818_v27 }
 0x44f   : > { %v3579_v63 = vsel %vm1854_vm9, %v3547_v50, %v2916_v16  ;;  %v4822_v50 = vld [vmem:[#allocation3 + $0x8] sm:$0xff] }
 0x450   : > { %v7946_v38 = vpop.permute.xlu1 %2919  ;;  %v3217_v23 = vpop.permute.xlu0 %3216  ;;  %v3611_v34 = vsel %vm1928_vm11, %v3579_v63, %v3018_v22  ;;  %v3516_v22 = vsel %vm1706_vm5, %v4822_v50, %v7754_v54  ;;  %v2773_v54 = vrot.slane %v7474_v58, 2 }
 0x451   : > { %v3644_v8 = vsel %vm3643_vm15, %v3611_v34, %v3119_v36 }
 0x452   : > { %2841 = vrot.lane.b32.xlu1 %v2769_v18, %s4943_s30  ;;  %3437 = vrot.lane.b32.xlu0 %v2771_v60, %s4951_s17  ;;  %v3677_v19 = vsel %vm3676_vm0, %v3644_v8, %v3217_v23  ;;  %v3548_v8 = vsel %vm1780_vm7, %v3516_v22, %v7886_v5 }
 0x453   : > { %v3580_v34 = vsel %vm1854_vm9, %v3548_v8, %v2918_v32 }
 0x454   : > { %v3319_v56 = vpop.permute.xlu1 %3318  ;;  %v3219_v55 = vpop.permute.xlu0 %3218  ;;  %v3612_v23 = vsel %vm1928_vm11, %v3580_v34, %v3020_v40 }
 0x455   : > { %v3710_v61 = vsel %vm3709_vm1, %v3677_v19, %v3319_v56  ;;  %v2772_v56 = vrot.slane %v7477_v3, 2  ;;  %v3645_v63 = vsel %vm3643_vm15, %v3612_v23, %v3121_v44 }
 0x456   : > { %3236 = vrot.lane.b32.xlu1 %v7477_v3, %s4949_s18  ;;  %3140 = vrot.lane.b32.xlu0 %v2771_v60, %s4948_s16  ;;  %v3678_v5 = vsel %vm3676_vm0, %v3645_v63, %v3219_v55  ;;  %v4824_v63 = vld [vmem:[#allocation3 + $0x20] sm:$0xff] }
 0x458   : > { %v3022_v18 = vpop.permute.xlu1 %3021  ;;  %v7958_v20 = vpop.permute.xlu0 %2921 }
 0x45a   : > { %2939 = vrot.lane.b32.xlu1 %v7477_v3, %s4945_s11  ;;  %2843 = vrot.lane.b32.xlu0 %v2771_v60, %s4943_s30  ;;  %v2774_v3 = vsel %vm797_vm3, %v2772_v56, %v2773_v54 }
 0x45c   : > { %v3420_v16 = vpop.permute.xlu1 %3419  ;;  %v3321_v27 = vpop.permute.xlu0 %3320 }
 0x45d   : > { %v3743_v62 = vsel %vm3742_vm4, %v3710_v61, %v3420_v16  ;;  %v3711_v32 = vsel %vm3709_vm1, %v3678_v5, %v3321_v27  ;;  %v3518_v5 = vsel %vm1706_vm5, %v4824_v63, %v7766_v57 }
 0x45e   : > { %3338 = vrot.lane.b32.xlu1 %v7485_v17, %s4950_s13  ;;  %3238 = vrot.lane.b32.xlu0 %v7474_v58, %s4949_s18 }
 0x45f   : > { %4644 = vmatprep.mubr.msk.f32.mxu1 %vm3781_vm6, %v3743_v62  ;;  %v4823_v62 = vld [vmem:[#allocation3 + $0x18] sm:$0xff] }
 0x460   : > { %v3123_v60 = vpop.permute.xlu1 %3122  ;;  %v3024_v36 = vpop.permute.xlu0 %3023  ;;  %v3517_v50 = vsel %vm1706_vm5, %v4823_v62, %v7768_v12 }
 0x462   : > { %3041 = vrot.lane.b32.xlu1 %v7485_v17, %s4947_s12  ;;  %2941 = vrot.lane.b32.xlu0 %v7474_v58, %s4945_s11  ;;  %v2775_v58 = vrot.slane %v7472_v29, 2  ;;  %v3549_v29 = vsel %vm1780_vm7, %v3517_v50, %v7894_v15  ;;  %v2780_v50 = vrot.slane %v7495_v39, 2 }
 0x463   : > { %v3581_v22 = vsel %vm1854_vm9, %v3549_v29, %v7946_v38  ;;  %v4825_v29 = vld [vmem:[#allocation3 + $0x30] sm:$0xff] }
 0x464   : > { %v3125_v19 = vpop.permute.xlu1 %3124  ;;  %v3422_v61 = vpop.permute.xlu0 %3421  ;;  %v2776_v27 = vsel %vm797_vm3, %v2773_v54, %v2775_v58  ;;  %v3613_v34 = vsel %vm1928_vm11, %v3581_v22, %v3022_v18  ;;  %v3550_v18 = vsel %vm1780_vm7, %v3518_v5, %v7892_v25 }
 0x465   : > { %v3744_v40 = vsel %vm3742_vm4, %v3711_v32, %v3422_v61  ;;  %v3646_v23 = vsel %vm3643_vm15, %v3613_v34, %v3123_v60  ;;  %v3582_v60 = vsel %vm1854_vm9, %v3550_v18, %v7958_v20 }
 0x466   : > { %3439 = vrot.lane.b32.xlu1 %v2774_v3, %s4951_s17  ;;  %3340 = vrot.lane.b32.xlu0 %v7482_v13, %s4950_s13 }
 0x467   : > { %4645 = vmatmul.mubr.msk.f32.vlgmr.msra.gmra.mrb[0].mxu1 %vm3781_vm6, %v3744_v40  ;;  %v3614_v40 = vsel %vm1928_vm11, %v3582_v60, %v3024_v36  ;;  %v2778_v36 = vrot.slane %v7497_v41, 2 }
 0x468   : > { %v2924_v17 = vpop.permute.xlu1 %2923  ;;  %v3221_v44 = vpop.permute.xlu0 %3220 }
 0x469   : > { %v3679_v12 = vsel %vm3676_vm0, %v3646_v23, %v3221_v44  ;;  %v2781_v39 = vsel %vm797_vm3, %v2778_v36, %v2780_v50 }
 0x46a   : > { %3142 = vrot.lane.b32.xlu1 %v2774_v3, %s4948_s16  ;;  %3043 = vrot.lane.b32.xlu0 %v7482_v13, %s4947_s12 }
 0x46c   : > { %v3323_v55 = vpop.permute.xlu1 %3322  ;;  %v3223_v16 = vpop.permute.xlu0 %3222 }
 0x46d   : > { %v3712_v56 = vsel %vm3709_vm1, %v3679_v12, %v3323_v55  ;;  %v2777_v55 = vrot.slane %v7500_v37, 2 }
 0x46e   : > { %2845 = vrot.lane.b32.xlu1 %v2774_v3, %s4943_s30  ;;  %3441 = vrot.lane.b32.xlu0 %v2776_v27, %s4951_s17  ;;  %v3647_v3 = vsel %vm3643_vm15, %v3614_v40, %v3125_v19 }
 0x46f   : > { %v3680_v57 = vsel %vm3676_vm0, %v3647_v3, %v3223_v16 }
 0x470   : > { %v3026_v8 = vpop.permute.xlu1 %3025  ;;  %v8007_v13 = vpop.permute.xlu0 %2925 }
 0x472   : > { %3240 = vrot.lane.b32.xlu1 %v7500_v37, %s4949_s18  ;;  %3144 = vrot.lane.b32.xlu0 %v2776_v27, %s4948_s16 }
 0x474   : > { %v3424_v15 = vpop.permute.xlu1 %3423  ;;  %v3325_v54 = vpop.permute.xlu0 %3324 }
 0x475   : > { %v3745_v38 = vsel %vm3742_vm4, %v3712_v56, %v3424_v15  ;;  %v3713_v25 = vsel %vm3709_vm1, %v3680_v57, %v3325_v54  ;;  %v4826_v54 = vld [vmem:[#allocation3 + $0x38] sm:$0xff] }
 0x476   : > { %2943 = vrot.lane.b32.xlu1 %v7500_v37, %s4945_s11  ;;  %2847 = vrot.lane.b32.xlu0 %v2776_v27, %s4943_s30  ;;  %v2779_v27 = vsel %vm797_vm3, %v2777_v55, %v2778_v36 }
 0x477   : > { %4647 = vmatprep.mubr.msk.f32.mxu1 %vm3781_vm6, %v3745_v38 }
 0x478   : > { %v3127_v32 = vpop.permute.xlu1 %3126  ;;  %v3028_v61 = vpop.permute.xlu0 %3027 }
 0x47a   : > { %3342 = vrot.lane.b32.xlu1 %v7508_v11, %s4950_s13  ;;  %3242 = vrot.lane.b32.xlu0 %v7497_v41, %s4949_s18 }
 0x47c   : > { %v3129_v44 = vpop.permute.xlu1 %3128  ;;  %v3426_v58 = vpop.permute.xlu0 %3425 }
 0x47d   : > { %v3746_v20 = vsel %vm3742_vm4, %v3713_v25, %v3426_v58 }
 0x47e   : > { %3045 = vrot.lane.b32.xlu1 %v7508_v11, %s4947_s12  ;;  %2945 = vrot.lane.b32.xlu0 %v7497_v41, %s4945_s11  ;;  %v3519_v11 = vsel %vm1706_vm5, %v4825_v29, %v7776_v51 }
 0x47f   : > { %4648 = vmatmul.mubr.msk.f32.gmra.mrb[2].mxu1 %vm3781_vm6, %v3746_v20  ;;  %v3551_v41 = vsel %vm1780_vm7, %v3519_v11, %v7902_v33  ;;  %v9504_v11 = vld [vmem:[#allocation30_spill] sm:$0xff] }
 0x480   : > { %v2928_v19 = vpop.permute.xlu1 %2927  ;;  %v3225_v16 = vpop.permute.xlu0 %3224  ;;  %v3583_v22 = vsel %vm1854_vm9, %v3551_v41, %v2924_v17  ;;  %v2785_v41 = vrot.slane %v9504_v11, 2  ;;  %v4831_v11 = vld [vmem:[#allocation3 + $0x100] sm:$0x3] }
 0x481   : > { %v3615_v12 = vsel %vm1928_vm11, %v3583_v22, %v3026_v8  ;;  %v3520_v8 = vsel %vm1706_vm5, %v4826_v54, %v7774_v46 }
 0x482   : > { %3443 = vrot.lane.b32.xlu1 %v2779_v27, %s4951_s17  ;;  %3344 = vrot.lane.b32.xlu0 %v7505_v1, %s4950_s13  ;;  %v3648_v56 = vsel %vm3643_vm15, %v3615_v12, %v3127_v32  ;;  %v3552_v38 = vsel %vm1780_vm7, %v3520_v8, %v7900_v48 }
 0x483   : > { %v3584_v63 = vsel %vm1854_vm9, %v3552_v38, %v8007_v13  ;;  %v9502_v13 = vld [vmem:[#allocation55_spill] sm:$0xff] }
 0x484   : > { %v3327_v37 = vpop.permute.xlu1 %3326  ;;  %v3227_v62 = vpop.permute.xlu0 %3226  ;;  %v3616_v60 = vsel %vm1928_vm11, %v3584_v63, %v3028_v61  ;;  %v2783_v58 = vrot.slane %v9502_v13, 2 }
 0x485   : > { %v3649_v32 = vsel %vm3643_vm15, %v3616_v60, %v3129_v44  ;;  %v2782_v44 = vrot.slane %v7523_v31, 2 }
 0x486   : > { %3146 = vrot.lane.b32.xlu1 %v2779_v27, %s4948_s16  ;;  %3047 = vrot.lane.b32.xlu0 %v7505_v1, %s4947_s12  ;;  %v3681_v1 = vsel %vm3676_vm0, %v3648_v56, %v3225_v16  ;;  %v3682_v46 = vsel %vm3676_vm0, %v3649_v32, %v3227_v62  ;;  %v4827_v16 = vld [vmem:[#allocation3 + $0x48] sm:$0xff]  ;;  %v2786_v56 = vsel %vm797_vm3, %v2783_v58, %v2785_v41  ;;  %v2790_v41 = vrot.slane %v4831_v11, 2 }
 0x487   : > { %v3714_v51 = vsel %vm3709_vm1, %v3681_v1, %v3327_v37  ;;  %v2784_v36 = vsel %vm797_vm3, %v2782_v44, %v2783_v58  ;;  %v9506_v32 = vld [vmem:[#allocation98_spill] sm:$0xff]  ;;  %v8151_v44 = vld [vmem:[#allocation3 + $0xf8] sm:$0xff] }
 0x488   : > { %v3030_v34 = vpop.permute.xlu1 %3029  ;;  %v8056_v23 = vpop.permute.xlu0 %2929 }
 0x48a   : > { %2849 = vrot.lane.b32.xlu1 %v2779_v27, %s4943_s30  ;;  %3445 = vrot.lane.b32.xlu0 %v2781_v39, %s4951_s17  ;;  %v3521_v27 = vsel %vm1706_vm5, %v4827_v16, %v7784_v14 }
 0x48b   : > { %v3553_v37 = vsel %vm1780_vm7, %v3521_v27, %v7910_v47 }
 0x48c   : > { %v3428_v33 = vpop.permute.xlu1 %3427  ;;  %v3329_v15 = vpop.permute.xlu0 %3328 }
 0x48d   : > { %v3747_v17 = vsel %vm3742_vm4, %v3714_v51, %v3428_v33  ;;  %v3715_v48 = vsel %vm3709_vm1, %v3682_v46, %v3329_v15  ;;  %v9507_v46 = vld [vmem:[#allocation51_spill] sm:$0xff] }
 0x48e   : > { %3244 = vrot.lane.b32.xlu1 %v7523_v31, %s4949_s18  ;;  %3148 = vrot.lane.b32.xlu0 %v2781_v39, %s4948_s16 }
 0x48f   : > { %4650 = vmatprep.mubr.msk.f32.mxu1 %vm3781_vm6, %v3747_v17 }
 0x490   : > { %v3131_v5 = vpop.permute.xlu1 %3130  ;;  %v3032_v18 = vpop.permute.xlu0 %3031 }
 0x492   : > { %2947 = vrot.lane.b32.xlu1 %v7523_v31, %s4945_s11  ;;  %2851 = vrot.lane.b32.xlu0 %v2781_v39, %s4943_s30  ;;  %v9503_v31 = vld [vmem:[#allocation54_spill] sm:$0xff] }
 0x494   : > { %v3133_v40 = vpop.permute.xlu1 %3132  ;;  %v3430_v3 = vpop.permute.xlu0 %3429 }
 0x495   : > { %v3748_v57 = vsel %vm3742_vm4, %v3715_v48, %v3430_v3 }
 0x496   : > { %3346 = vrot.lane.b32.xlu1 %v7531_v30, %s4950_s13  ;;  %3246 = vrot.lane.b32.xlu0 %v9502_v13, %s4949_s18 }
 0x497   : > { %4651 = vmatmul.mubr.msk.f32.gmra.mrb[4].mxu1 %vm3781_vm6, %v3748_v57  ;;  %v2788_v57 = vrot.slane %v9507_v46, 2 }
 0x498   : > { %v8089_v61 = vpop.permute.xlu1 %2931  ;;  %v3229_v25 = vpop.permute.xlu0 %3228 }
 0x49a   : > { %3049 = vrot.lane.b32.xlu1 %v7531_v30, %s4947_s12  ;;  %2949 = vrot.lane.b32.xlu0 %v9502_v13, %s4945_s11  ;;  %v3585_v30 = vsel %vm1854_vm9, %v3553_v37, %v2928_v19  ;;  %v4829_v13 = vld [vmem:[#allocation3 + $0x60] sm:$0xff] }
 0x49b   : > { %v3617_v29 = vsel %vm1928_vm11, %v3585_v30, %v3030_v34  ;;  %v4828_v34 = vld [vmem:[#allocation3 + $0x50] sm:$0xff] }
 0x49c   : > { %v3331_v20 = vpop.permute.xlu1 %3330  ;;  %v3231_v55 = vpop.permute.xlu0 %3230  ;;  %v3650_v22 = vsel %vm3643_vm15, %v3617_v29, %v3131_v5  ;;  %v3522_v1 = vsel %vm1706_vm5, %v4828_v34, %v7782_v24  ;;  %v9505_v24 = vld [vmem:[#allocation97_spill] sm:$0xff] }
 0x49d   : > { %v3683_v14 = vsel %vm3676_vm0, %v3650_v22, %v3229_v25  ;;  %v3554_v51 = vsel %vm1780_vm7, %v3522_v1, %v7908_v45  ;;  %v2787_v3 = vrot.slane %v9505_v24, 2  ;;  %v3523_v25 = vsel %vm1706_vm5, %v4829_v13, %v7792_v10 }
 0x49e   : > { %3447 = vrot.lane.b32.xlu1 %v2784_v36, %s4951_s17  ;;  %3348 = vrot.lane.b32.xlu0 %v9503_v31, %s4950_s13  ;;  %v3716_v47 = vsel %vm3709_vm1, %v3683_v14, %v3331_v20  ;;  %v3586_v33 = vsel %vm1854_vm9, %v3554_v51, %v8056_v23  ;;  %v3555_v58 = vsel %vm1780_vm7, %v3523_v25, %v7918_v0  ;;  %v9510_v25 = vld [vmem:[#allocation27_spill] sm:$0xff] }
 0x49f   : > { %v3618_v54 = vsel %vm1928_vm11, %v3586_v33, %v3032_v18  ;;  %v3587_v20 = vsel %vm1854_vm9, %v3555_v58, %v8089_v61  ;;  %v2789_v10 = vsel %vm797_vm3, %v2787_v3, %v2788_v57  ;;  %v8190_v33 = vld [vmem:[#allocation3 + $0x108] sm:$0xff] }
 0x4a0   : > { %v3034_v62 = vpop.permute.xlu1 %3033  ;;  %v8106_v50 = vpop.permute.xlu0 %2933  ;;  %v3651_v8 = vsel %vm3643_vm15, %v3618_v54, %v3133_v40 }
 0x4a1   : > { %v3684_v38 = vsel %vm3676_vm0, %v3651_v8, %v3231_v55  ;;  %v3619_v16 = vsel %vm1928_vm11, %v3587_v20, %v3034_v62  ;;  %v4832_v62 = vld [vmem:[#allocation3 + $0x68] sm:$0xff] }
 0x4a2   : > { %3150 = vrot.lane.b32.xlu1 %v2784_v36, %s4948_s16  ;;  %3051 = vrot.lane.b32.xlu0 %v9503_v31, %s4947_s12  ;;  %v9508_v31 = vld [vmem:[#allocation56_spill] sm:$0xff]  ;;  %v3524_v22 = vsel %vm1706_vm5, %v4832_v62, %v7790_v21 }
 0x4a3   : > { %v3556_v14 = vsel %vm1780_vm7, %v3524_v22, %v7916_v59 }
 0x4a4   : > { %v3432_v12 = vpop.permute.xlu1 %3431  ;;  %v3333_v19 = vpop.permute.xlu0 %3332 }
 0x4a5   : > { %v3749_v39 = vsel %vm3742_vm4, %v3716_v47, %v3432_v12  ;;  %v3717_v45 = vsel %vm3709_vm1, %v3684_v38, %v3333_v19  ;;  %v3588_v47 = vsel %vm1854_vm9, %v3556_v14, %v8106_v50  ;;  %v8205_v38 = vld [vmem:[#allocation3 + $0x110] sm:$0xff]  ;;  %v8252_v14 = vld [vmem:[#allocation3 + $0x120] sm:$0xff] }
 0x4a6   : > { %2853 = vrot.lane.b32.xlu1 %v2784_v36, %s4943_s30  ;;  %3449 = vrot.lane.b32.xlu0 %v2786_v56, %s4951_s17 }
 0x4a7   : > { %4653 = vmatprep.mubr.msk.f32.mxu1 %vm3781_vm6, %v3749_v39 }
 0x4a8   : > { %v3135_v15 = vpop.permute.xlu1 %3134  ;;  %v3036_v17 = vpop.permute.xlu0 %3035 }
 0x4a9   : > { %v3652_v27 = vsel %vm3643_vm15, %v3619_v16, %v3135_v15  ;;  %v3620_v39 = vsel %vm1928_vm11, %v3588_v47, %v3036_v17 }
 0x4aa   : > { %3248 = vrot.lane.b32.xlu1 %v9505_v24, %s4949_s18  ;;  %3152 = vrot.lane.b32.xlu0 %v2786_v56, %s4948_s16 }
 0x4ac   : > { %v3137_v63 = vpop.permute.xlu1 %3136  ;;  %v3434_v5 = vpop.permute.xlu0 %3433 }
 0x4ad   : > { %v3750_v60 = vsel %vm3742_vm4, %v3717_v45, %v3434_v5  ;;  %v3653_v21 = vsel %vm3643_vm15, %v3620_v39, %v3137_v63  ;;  %v2792_v5 = vrot.slane %v8190_v33, 2 }
 0x4ae   : > { %2951 = vrot.lane.b32.xlu1 %v9505_v24, %s4945_s11  ;;  %2855 = vrot.lane.b32.xlu0 %v2786_v56, %s4943_s30  ;;  %v2791_v56 = vsel %vm797_vm3, %v2788_v57, %v2790_v41  ;;  %v9509_v24 = vld [vmem:[#allocation28_spill] sm:$0xff] }
 0x4af   : > { %4654 = vmatmul.mubr.msk.f32.gmra.mrb[6].mxu1 %vm3781_vm6, %v3750_v60  ;;  %v2793_v60 = vrot.slane %v8205_v38, 2 }
 0x4b0   : > { %v8139_v23 = vpop.permute.xlu1 %2935  ;;  %v3233_v18 = vpop.permute.xlu0 %3232 }
 0x4b1   : > { %v3685_v37 = vsel %vm3676_vm0, %v3652_v27, %v3233_v18  ;;  %v4835_v18 = vld [vmem:[#allocation3 + $0x78] sm:$0xff]  ;;  %v2794_v13 = vsel %vm797_vm3, %v2792_v5, %v2793_v60 }
 0x4b2   : > { %3350 = vrot.lane.b32.xlu1 %v9506_v32, %s4950_s13  ;;  %3250 = vrot.lane.b32.xlu0 %v9507_v46, %s4949_s18 }
 0x4b4   : > { %v3335_v48 = vpop.permute.xlu1 %3334  ;;  %v3235_v40 = vpop.permute.xlu0 %3234 }
 0x4b5   : > { %v3718_v0 = vsel %vm3709_vm1, %v3685_v37, %v3335_v48  ;;  %v3686_v34 = vsel %vm3676_vm0, %v3653_v21, %v3235_v40  ;;  %v8267_v21 = vld [vmem:[#allocation3 + $0x128] sm:$0xff] }
 0x4b6   : > { %3053 = vrot.lane.b32.xlu1 %v9506_v32, %s4947_s12  ;;  %2953 = vrot.lane.b32.xlu0 %v8151_v44, %s4945_s11  ;;  %v3525_v32 = vsel %vm1706_vm5, %v4835_v18, %v7800_v42 }
 0x4b7   : > { %v3557_v46 = vsel %vm1780_vm7, %v3525_v32, %v7926_v26  ;;  %v9512_v32 = vld [vmem:[#allocation52_spill] sm:$0xff] }
 0x4b8   : > { %v3038_v55 = vpop.permute.xlu1 %3037  ;;  %v8159_v36 = vpop.permute.xlu0 %2937  ;;  %v3589_v48 = vsel %vm1854_vm9, %v3557_v46, %v8139_v23 }
 0x4b9   : > { %v3621_v57 = vsel %vm1928_vm11, %v3589_v48, %v3038_v55  ;;  %v4837_v55 = vld [vmem:[#allocation3 + $0x80] sm:$0xff] }
 0x4ba   : > { %3451 = vrot.lane.b32.xlu1 %v2789_v10, %s4951_s17  ;;  %3352 = vrot.lane.b32.xlu0 %v9508_v31, %s4950_s13 }
 0x4bc   : > { %v3436_v30 = vpop.permute.xlu1 %3435  ;;  %v3337_v61 = vpop.permute.xlu0 %3336 }
 0x4bd   : > { %v3751_v29 = vsel %vm3742_vm4, %v3718_v0, %v3436_v30  ;;  %v3719_v59 = vsel %vm3709_vm1, %v3686_v34, %v3337_v61 }
 0x4be   : > { %3154 = vrot.lane.b32.xlu1 %v2789_v10, %s4948_s16  ;;  %3055 = vrot.lane.b32.xlu0 %v9508_v31, %s4947_s12  ;;  %v3526_v31 = vsel %vm1706_vm5, %v4837_v55, %v7798_v6 }
 0x4bf   : > { %4656 = vmatprep.mubr.msk.f32.mxu1 %vm3781_vm6, %v3751_v29  ;;  %v3558_v37 = vsel %vm1780_vm7, %v3526_v31, %v7924_v52 }
 0x4c0   : > { %v3139_v12 = vpop.permute.xlu1 %3138  ;;  %v3040_v19 = vpop.permute.xlu0 %3039  ;;  %v3590_v0 = vsel %vm1854_vm9, %v3558_v37, %v8159_v36  ;;  %v8314_v37 = vld [vmem:[#allocation3 + $0x138] sm:$0xff] }
 0x4c1   : > { %v3654_v42 = vsel %vm3643_vm15, %v3621_v57, %v3139_v12  ;;  %v3622_v29 = vsel %vm1928_vm11, %v3590_v0, %v3040_v19 }
 0x4c2   : > { %2857 = vrot.lane.b32.xlu1 %v2789_v10, %s4943_s30  ;;  %3453 = vrot.lane.b32.xlu0 %v2791_v56, %s4951_s17  ;;  %v4836_v10 = vld [vmem:[#allocation3 + $0x118] sm:$0x3] }
 0x4c3   : > { %v2795_v27 = vrot.slane %v4836_v10, 2 }
 0x4c4   : > { %v8187_v1 = vpop.permute.xlu1 %2841  ;;  %v3438_v51 = vpop.permute.xlu0 %3437 }
 0x4c5   : > { %v3752_v50 = vsel %vm3742_vm4, %v3719_v59, %v3438_v51  ;;  %v2796_v11 = vsel %vm797_vm3, %v2793_v60, %v2795_v27  ;;  %v2797_v51 = vrot.slane %v8252_v14, 2 }
 0x4c6   : > { %3252 = vrot.lane.b32.xlu1 %v8190_v33, %s4949_s18  ;;  %3156 = vrot.lane.b32.xlu0 %v2791_v56, %s4948_s16 }
 0x4c7   : > { %4657 = vmatmul.mubr.msk.f32.gmra.mrb[8].mxu1 %vm3781_vm6, %v3752_v50  ;;  %v2798_v50 = vrot.slane %v8267_v21, 2 }
 0x4c8   : > { %v3237_v15 = vpop.permute.xlu1 %3236  ;;  %v3141_v17 = vpop.permute.xlu0 %3140 }
 0x4c9   : > { %v3687_v58 = vsel %vm3676_vm0, %v3654_v42, %v3237_v15  ;;  %v3655_v6 = vsel %vm3643_vm15, %v3622_v29, %v3141_v17  ;;  %v4840_v15 = vld [vmem:[#allocation3 + $0x90] sm:$0xff]  ;;  %v2799_v18 = vsel %vm797_vm3, %v2797_v51, %v2798_v50 }
 0x4ca   : > { %2955 = vrot.lane.b32.xlu1 %v8190_v33, %s4945_s11  ;;  %2859 = vrot.lane.b32.xlu0 %v2791_v56, %s4943_s30  ;;  %v9511_v56 = vld [vmem:[#allocation31_spill] sm:$0xff]  ;;  %v3527_v17 = vsel %vm1706_vm5, %v4840_v15, %v7808_v53 }
 0x4cc   : > { %v8199_v54 = vpop.permute.xlu1 %2939  ;;  %v8201_v8 = vpop.permute.xlu0 %2843 }
 0x4ce   : > { %3354 = vrot.lane.b32.xlu1 %v9509_v24, %s4950_s13  ;;  %3254 = vrot.lane.b32.xlu0 %v8205_v38, %s4949_s18 }
 0x4d0   : > { %v3339_v45 = vpop.permute.xlu1 %3338  ;;  %v3239_v63 = vpop.permute.xlu0 %3238 }
 0x4d1   : > { %v3720_v26 = vsel %vm3709_vm1, %v3687_v58, %v3339_v45  ;;  %v3688_v41 = vsel %vm3676_vm0, %v3655_v6, %v3239_v63  ;;  %v8329_v6 = vld [vmem:[#allocation3 + $0x140] sm:$0xff] }
 0x4d2   : > { %3057 = vrot.lane.b32.xlu1 %v9509_v24, %s4947_s12  ;;  %2957 = vrot.lane.b32.xlu0 %v8205_v38, %s4945_s11  ;;  %v3559_v24 = vsel %vm1780_vm7, %v3527_v17, %v8187_v1  ;;  %v9514_v17 = vld [vmem:[#allocation32_spill] sm:$0xff] }
 0x4d3   : > { %v3591_v45 = vsel %vm1854_vm9, %v3559_v24, %v8199_v54 }
 0x4d4   : > { %v3042_v40 = vpop.permute.xlu1 %3041  ;;  %v8221_v3 = vpop.permute.xlu0 %2941 }
 0x4d5   : > { %v3623_v60 = vsel %vm1928_vm11, %v3591_v45, %v3042_v40  ;;  %v4842_v40 = vld [vmem:[#allocation3 + $0x98] sm:$0xff] }
 0x4d6   : > { %3455 = vrot.lane.b32.xlu1 %v2794_v13, %s4951_s17  ;;  %3356 = vrot.lane.b32.xlu0 %v9510_v25, %s4950_s13 }
 0x4d8   : > { %v3440_v20 = vpop.permute.xlu1 %3439  ;;  %v3341_v23 = vpop.permute.xlu0 %3340 }
 0x4d9   : > { %v3753_v16 = vsel %vm3742_vm4, %v3720_v26, %v3440_v20  ;;  %v3721_v52 = vsel %vm3709_vm1, %v3688_v41, %v3341_v23 }
 0x4da   : > { %3158 = vrot.lane.b32.xlu1 %v2794_v13, %s4948_s16  ;;  %3059 = vrot.lane.b32.xlu0 %v9510_v25, %s4947_s12  ;;  %v3528_v25 = vsel %vm1706_vm5, %v4842_v40, %v7806_v2 }
 0x4db   : > { %4659 = vmatprep.mubr.msk.f32.mxu1 %vm3781_vm6, %v3753_v16  ;;  %v3560_v58 = vsel %vm1780_vm7, %v3528_v25, %v8201_v8 }
 0x4dc   : > { %v3143_v30 = vpop.permute.xlu1 %3142  ;;  %v3044_v61 = vpop.permute.xlu0 %3043  ;;  %v3592_v26 = vsel %vm1854_vm9, %v3560_v58, %v8221_v3  ;;  %v8376_v58 = vld [vmem:[#allocation3 + $0x150] sm:$0xff] }
 0x4dd   : > { %v3656_v53 = vsel %vm3643_vm15, %v3623_v60, %v3143_v30  ;;  %v3624_v16 = vsel %vm1928_vm11, %v3592_v26, %v3044_v61 }
 0x4de   : > { %2861 = vrot.lane.b32.xlu1 %v2794_v13, %s4943_s30  ;;  %3457 = vrot.lane.b32.xlu0 %v2796_v11, %s4951_s17  ;;  %v4841_v13 = vld [vmem:[#allocation3 + $0x130] sm:$0x3] }
 0x4df   : > { %v2800_v42 = vrot.slane %v4841_v13, 2 }
 0x4e0   : > { %v8249_v62 = vpop.permute.xlu1 %2845  ;;  %v3442_v22 = vpop.permute.xlu0 %3441 }
 0x4e1   : > { %v3754_v36 = vsel %vm3742_vm4, %v3721_v52, %v3442_v22  ;;  %v2801_v10 = vsel %vm797_vm3, %v2798_v50, %v2800_v42  ;;  %v2802_v22 = vrot.slane %v8314_v37, 2 }
 0x4e2   : > { %3256 = vrot.lane.b32.xlu1 %v8252_v14, %s4949_s18  ;;  %3160 = vrot.lane.b32.xlu0 %v2796_v11, %s4948_s16 }
 0x4e3   : > { %4660 = vmatmul.mubr.msk.f32.gmra.mrb[10].mxu1 %vm3781_vm6, %v3754_v36  ;;  %v2803_v36 = vrot.slane %v8329_v6, 2 }
 0x4e4   : > { %v3241_v47 = vpop.permute.xlu1 %3240  ;;  %v3145_v12 = vpop.permute.xlu0 %3144 }
 0x4e5   : > { %v3689_v46 = vsel %vm3676_vm0, %v3656_v53, %v3241_v47  ;;  %v3657_v2 = vsel %vm3643_vm15, %v3624_v16, %v3145_v12  ;;  %v4845_v47 = vld [vmem:[#allocation3 + $0xa8] sm:$0xff]  ;;  %v2804_v15 = vsel %vm797_vm3, %v2802_v22, %v2803_v36 }
 0x4e6   : > { %2959 = vrot.lane.b32.xlu1 %v8252_v14, %s4945_s11  ;;  %2863 = vrot.lane.b32.xlu0 %v2796_v11, %s4943_s30  ;;  %v9513_v11 = vld [vmem:[#allocation59_spill] sm:$0xff]  ;;  %v3529_v12 = vsel %vm1706_vm5, %v4845_v47, %v7816_v7 }
 0x4e8   : > { %v8261_v19 = vpop.permute.xlu1 %2943  ;;  %v8263_v39 = vpop.permute.xlu0 %2847 }
 0x4ea   : > { %3358 = vrot.lane.b32.xlu1 %v9511_v56, %s4950_s13  ;;  %3258 = vrot.lane.b32.xlu0 %v8267_v21, %s4949_s18 }
 0x4ec   : > { %v3343_v34 = vpop.permute.xlu1 %3342  ;;  %v3243_v59 = vpop.permute.xlu0 %3242 }
 0x4ed   : > { %v3722_v1 = vsel %vm3709_vm1, %v3689_v46, %v3343_v34  ;;  %v3690_v27 = vsel %vm3676_vm0, %v3657_v2, %v3243_v59  ;;  %v8391_v2 = vld [vmem:[#allocation3 + $0x158] sm:$0xff] }
 0x4ee   : > { %3061 = vrot.lane.b32.xlu1 %v9511_v56, %s4947_s12  ;;  %2961 = vrot.lane.b32.xlu0 %v8267_v21, %s4945_s11  ;;  %v3561_v56 = vsel %vm1780_vm7, %v3529_v12, %v8249_v62  ;;  %v9516_v12 = vld [vmem:[#allocation58_spill] sm:$0xff] }
 0x4ef   : > { %v3593_v34 = vsel %vm1854_vm9, %v3561_v56, %v8261_v19 }
 0x4f0   : > { %v3046_v63 = vpop.permute.xlu1 %3045  ;;  %v8283_v5 = vpop.permute.xlu0 %2945 }
 0x4f1   : > { %v3625_v50 = vsel %vm1928_vm11, %v3593_v34, %v3046_v63  ;;  %v4847_v63 = vld [vmem:[#allocation3 + $0xb0] sm:$0xff] }
 0x4f2   : > { %3459 = vrot.lane.b32.xlu1 %v2799_v18, %s4951_s17  ;;  %3360 = vrot.lane.b32.xlu0 %v9512_v32, %s4950_s13 }
 0x4f4   : > { %v3444_v48 = vpop.permute.xlu1 %3443  ;;  %v3345_v54 = vpop.permute.xlu0 %3344 }
 0x4f5   : > { %v3755_v57 = vsel %vm3742_vm4, %v3722_v1, %v3444_v48  ;;  %v3723_v8 = vsel %vm3709_vm1, %v3690_v27, %v3345_v54 }
 0x4f6   : > { %3162 = vrot.lane.b32.xlu1 %v2799_v18, %s4948_s16  ;;  %3063 = vrot.lane.b32.xlu0 %v9512_v32, %s4947_s12  ;;  %v3530_v32 = vsel %vm1706_vm5, %v4847_v63, %v7814_v43 }
 0x4f7   : > { %4662 = vmatprep.mubr.msk.f32.mxu1 %vm3781_vm6, %v3755_v57  ;;  %v3562_v46 = vsel %vm1780_vm7, %v3530_v32, %v8263_v39 }
 0x4f8   : > { %v3147_v20 = vpop.permute.xlu1 %3146  ;;  %v3048_v23 = vpop.permute.xlu0 %3047  ;;  %v3594_v1 = vsel %vm1854_vm9, %v3562_v46, %v8283_v5  ;;  %v8438_v46 = vld [vmem:[#allocation3 + $0x168] sm:$0xff] }
 0x4f9   : > { %v3658_v7 = vsel %vm3643_vm15, %v3625_v50, %v3147_v20  ;;  %v3626_v57 = vsel %vm1928_vm11, %v3594_v1, %v3048_v23 }
 0x4fa   : > { %2865 = vrot.lane.b32.xlu1 %v2799_v18, %s4943_s30  ;;  %3461 = vrot.lane.b32.xlu0 %v2801_v10, %s4951_s17  ;;  %v4846_v18 = vld [vmem:[#allocation3 + $0x148] sm:$0x3] }
 0x4fb   : > { %v2805_v53 = vrot.slane %v4846_v18, 2 }
 0x4fc   : > { %v8311_v55 = vpop.permute.xlu1 %2849  ;;  %v3446_v31 = vpop.permute.xlu0 %3445 }
 0x4fd   : > { %v3756_v3 = vsel %vm3742_vm4, %v3723_v8, %v3446_v31  ;;  %v2806_v13 = vsel %vm797_vm3, %v2803_v36, %v2805_v53  ;;  %v2807_v31 = vrot.slane %v8376_v58, 2 }
 0x4fe   : > { %3260 = vrot.lane.b32.xlu1 %v8314_v37, %s4949_s18  ;;  %3164 = vrot.lane.b32.xlu0 %v2801_v10, %s4948_s16 }
 0x4ff   : > { %4663 = vmatmul.mubr.msk.f32.gmra.mrb[12].mxu1 %vm3781_vm6, %v3756_v3  ;;  %v2808_v3 = vrot.slane %v8391_v2, 2 }
 0x500   : > { %v3245_v0 = vpop.permute.xlu1 %3244  ;;  %v3149_v30 = vpop.permute.xlu0 %3148 }
 0x501   : > { %v3691_v24 = vsel %vm3676_vm0, %v3658_v7, %v3245_v0  ;;  %v3659_v43 = vsel %vm3643_vm15, %v3626_v57, %v3149_v30  ;;  %v4850_v0 = vld [vmem:[#allocation3 + $0xc0] sm:$0xff]  ;;  %v2809_v47 = vsel %vm797_vm3, %v2807_v31, %v2808_v3 }
 0x502   : > { %2963 = vrot.lane.b32.xlu1 %v8314_v37, %s4945_s11  ;;  %2867 = vrot.lane.b32.xlu0 %v2801_v10, %s4943_s30  ;;  %v9515_v10 = vld [vmem:[#allocation61_spill] sm:$0xff]  ;;  %v3531_v30 = vsel %vm1706_vm5, %v4850_v0, %v7824_v49 }
 0x504   : > { %v8323_v61 = vpop.permute.xlu1 %2947  ;;  %v8325_v29 = vpop.permute.xlu0 %2851 }
 0x506   : > { %3362 = vrot.lane.b32.xlu1 %v9513_v11, %s4950_s13  ;;  %3262 = vrot.lane.b32.xlu0 %v8329_v6, %s4949_s18 }
 0x508   : > { %v3347_v41 = vpop.permute.xlu1 %3346  ;;  %v3247_v52 = vpop.permute.xlu0 %3246 }
 0x509   : > { %v3724_v62 = vsel %vm3709_vm1, %v3691_v24, %v3347_v41  ;;  %v3692_v42 = vsel %vm3676_vm0, %v3659_v43, %v3247_v52 }
 0x50a   : > { %3065 = vrot.lane.b32.xlu1 %v9513_v11, %s4947_s12  ;;  %2965 = vrot.lane.b32.xlu0 %v8329_v6, %s4945_s11  ;;  %v3563_v11 = vsel %vm1780_vm7, %v3531_v30, %v8311_v55 }
 0x50b   : > { %v3595_v41 = vsel %vm1854_vm9, %v3563_v11, %v8323_v61 }
 0x50c   : > { %v3050_v59 = vpop.permute.xlu1 %3049  ;;  %v8345_v51 = vpop.permute.xlu0 %2949 }
 0x50d   : > { %v3627_v36 = vsel %vm1928_vm11, %v3595_v41, %v3050_v59  ;;  %v4852_v59 = vld [vmem:[#allocation3 + $0xc8] sm:$0xff] }
 0x50e   : > { %3463 = vrot.lane.b32.xlu1 %v2804_v15, %s4951_s17  ;;  %3364 = vrot.lane.b32.xlu0 %v9514_v17, %s4950_s13 }
 0x510   : > { %v3448_v45 = vpop.permute.xlu1 %3447  ;;  %v3349_v19 = vpop.permute.xlu0 %3348 }
 0x511   : > { %v3757_v60 = vsel %vm3742_vm4, %v3724_v62, %v3448_v45  ;;  %v3725_v39 = vsel %vm3709_vm1, %v3692_v42, %v3349_v19  ;;  %v8453_v42 = vld [vmem:[#allocation3 + $0x170] sm:$0xff] }
 0x512   : > { %3166 = vrot.lane.b32.xlu1 %v2804_v15, %s4948_s16  ;;  %3067 = vrot.lane.b32.xlu0 %v9514_v17, %s4947_s12  ;;  %v3532_v17 = vsel %vm1706_vm5, %v4852_v59, %v7822_v9 }
 0x513   : > { %4665 = vmatprep.mubr.msk.f32.mxu1 %vm3781_vm6, %v3757_v60  ;;  %v3564_v24 = vsel %vm1780_vm7, %v3532_v17, %v8325_v29 }
 0x514   : > { %v3151_v48 = vpop.permute.xlu1 %3150  ;;  %v3052_v54 = vpop.permute.xlu0 %3051  ;;  %v3596_v62 = vsel %vm1854_vm9, %v3564_v24, %v8345_v51 }
 0x515   : > { %v3660_v49 = vsel %vm3643_vm15, %v3627_v36, %v3151_v48  ;;  %v3628_v60 = vsel %vm1928_vm11, %v3596_v62, %v3052_v54  ;;  %v4856_v36 = vld [vmem:[#allocation3 + $0x178] sm:$0x3] }
 0x516   : > { %2869 = vrot.lane.b32.xlu1 %v2804_v15, %s4943_s30  ;;  %3465 = vrot.lane.b32.xlu0 %v2806_v13, %s4951_s17  ;;  %v4851_v15 = vld [vmem:[#allocation3 + $0x160] sm:$0x3] }
 0x517   : > { %v2810_v7 = vrot.slane %v4851_v15, 2 }
 0x518   : > { %v8373_v40 = vpop.permute.xlu1 %2853  ;;  %v3450_v25 = vpop.permute.xlu0 %3449 }
 0x519   : > { %v3758_v5 = vsel %vm3742_vm4, %v3725_v39, %v3450_v25  ;;  %v2811_v18 = vsel %vm797_vm3, %v2808_v3, %v2810_v7 }
 0x51a   : > { %3264 = vrot.lane.b32.xlu1 %v8376_v58, %s4949_s18  ;;  %3168 = vrot.lane.b32.xlu0 %v2806_v13, %s4948_s16 }
 0x51b   : > { %4666 = vmatmul.mubr.msk.f32.gmra.mrb[14].mxu1 %vm3781_vm6, %v3758_v5  ;;  %v2812_v5 = vrot.slane %v8438_v46, 2 }
 0x51c   : > { %v3249_v26 = vpop.permute.xlu1 %3248  ;;  %v3153_v20 = vpop.permute.xlu0 %3152 }
 0x51d   : > { %v3693_v56 = vsel %vm3676_vm0, %v3660_v49, %v3249_v26  ;;  %v3661_v9 = vsel %vm3643_vm15, %v3628_v60, %v3153_v20  ;;  %v2813_v26 = vrot.slane %v8453_v42, 2  ;;  %v4855_v20 = vld [vmem:[#allocation3 + $0xd8] sm:$0xff]  ;;  %v2497_v60 = vld [vmem:[#allocation3 + $0x180] sm:$0xff] }
 0x51e   : > { %2967 = vrot.lane.b32.xlu1 %v8376_v58, %s4945_s11  ;;  %2871 = vrot.lane.b32.xlu0 %v2806_v13, %s4943_s30  ;;  %v9517_v49 = vld [vmem:[#allocation99_spill] sm:$0xff] }
 0x520   : > { %v8385_v23 = vpop.permute.xlu1 %2951  ;;  %v8387_v16 = vpop.permute.xlu0 %2855 }
 0x522   : > { %3366 = vrot.lane.b32.xlu1 %v9515_v10, %s4950_s13  ;;  %3266 = vrot.lane.b32.xlu0 %v8391_v2, %s4949_s18 }
 0x524   : > { %v3351_v27 = vpop.permute.xlu1 %3350  ;;  %v3251_v8 = vpop.permute.xlu0 %3250 }
 0x525   : > { %v3726_v55 = vsel %vm3709_vm1, %v3693_v56, %v3351_v27  ;;  %v3694_v53 = vsel %vm3676_vm0, %v3661_v9, %v3251_v8  ;;  %v8487_v56 = vld [vmem:[%s8884_s5] ss:$0 sm:$0xff] }
 0x526   : > { %3069 = vrot.lane.b32.xlu1 %v9515_v10, %s4947_s12  ;;  %2969 = vrot.lane.b32.xlu0 %v8391_v2, %s4945_s11  ;;  %v3533_v10 = vsel %vm1706_vm5, %v4855_v20, %v7832_v4  ;;  %v2814_v4 = vsel %vm797_vm3, %v2812_v5, %v2813_v26 }
 0x527   : > { %v3565_v27 = vsel %vm1780_vm7, %v3533_v10, %v8373_v40 }
 0x528   : > { %v3054_v52 = vpop.permute.xlu1 %3053  ;;  %v8407_v22 = vpop.permute.xlu0 %2953  ;;  %v3597_v8 = vsel %vm1854_vm9, %v3565_v27, %v8385_v23 }
 0x529   : > { %v3629_v0 = vsel %vm1928_vm11, %v3597_v8, %v3054_v52  ;;  %v4857_v52 = vld [vmem:[#allocation3 + $0xe0] sm:$0xff] }
 0x52a   : > { %3467 = vrot.lane.b32.xlu1 %v2809_v47, %s4951_s17  ;;  %3368 = vrot.lane.b32.xlu0 %v9516_v12, %s4950_s13 }
 0x52c   : > { %v3452_v34 = vpop.permute.xlu1 %3451  ;;  %v3353_v61 = vpop.permute.xlu0 %3352 }
 0x52d   : > { %v3759_v50 = vsel %vm3742_vm4, %v3726_v55, %v3452_v34  ;;  %v3727_v29 = vsel %vm3709_vm1, %v3694_v53, %v3353_v61  ;;  %v8515_v53 = vld [vmem:[#allocation3 + $0x188] sm:$0xff] }
 0x52e   : > { %3170 = vrot.lane.b32.xlu1 %v2809_v47, %s4948_s16  ;;  %3071 = vrot.lane.b32.xlu0 %v9516_v12, %s4947_s12  ;;  %v3534_v12 = vsel %vm1706_vm5, %v4857_v52, %v9517_v49  ;;  %v3113_v52 = vrot.slane %v2497_v60, 2  ;;  %v3114_v49 = vrot.slane %v8515_v53, 2 }
 0x52f   : > { %4668 = vmatprep.mubr.msk.f32.mxu1 %vm3781_vm6, %v3759_v50  ;;  %v3566_v55 = vsel %vm1780_vm7, %v3534_v12, %v8387_v16 }
 0x530   : > { %v3155_v45 = vpop.permute.xlu1 %3154  ;;  %v3056_v19 = vpop.permute.xlu0 %3055  ;;  %v3598_v34 = vsel %vm1854_vm9, %v3566_v55, %v8407_v22  ;;  %v4858_v55 = vld [vmem:[#allocation3 + $0xf0] sm:$0xff] }
 0x531   : > { %v3662_v30 = vsel %vm3643_vm15, %v3629_v0, %v3155_v45  ;;  %v3630_v15 = vsel %vm1928_vm11, %v3598_v34, %v3056_v19  ;;  %v9518_v34 = vld [vmem:[#allocation100_spill] sm:$0xff] }
 0x532   : > { %2873 = vrot.lane.b32.xlu1 %v2809_v47, %s4943_s30  ;;  %3469 = vrot.lane.b32.xlu0 %v2811_v18, %s4951_s17  ;;  %v2815_v47 = vrot.slane %v4856_v36, 2 }
 0x534   : > { %v8435_v63 = vpop.permute.xlu1 %2857  ;;  %v3454_v32 = vpop.permute.xlu0 %3453  ;;  %v2816_v59 = vsel %vm797_vm3, %v2813_v26, %v2815_v47 }
 0x535   : > { %v3760_v51 = vsel %vm3742_vm4, %v3727_v29, %v3454_v32 }
 0x536   : > { %3268 = vrot.lane.b32.xlu1 %v8438_v46, %s4949_s18  ;;  %3172 = vrot.lane.b32.xlu0 %v2811_v18, %s4948_s16 }
 0x537   : > { %4669 = vmatmul.mubr.msk.f32.gmra.mrb[16].mxu1 %vm3781_vm6, %v3760_v51 }
 0x538   : > { %v3253_v1 = vpop.permute.xlu1 %3252  ;;  %v3157_v48 = vpop.permute.xlu0 %3156 }
 0x53a   : > { %v4646_v54 = vpop.f32.mrb[0].mxu1  ;;  %2971 = vrot.lane.b32.xlu1 %v8438_v46, %s4945_s11  ;;  %2875 = vrot.lane.b32.xlu0 %v2811_v18, %s4943_s30 }
 0x53b   : > { %v3944_v57 = vpop.f32.mrb[1].mxu1  ;;  %v3950_v7 = vadd.f32 %v4646_v54, %v8487_v56 }
 0x53c   : > { %v8447_v13 = vpop.permute.xlu1 %2955  ;;  %v8449_v43 = vpop.permute.xlu0 %2859  ;;  %v3945_v17 = vadd.f32 %v8487_v56, %v3944_v57 }
 0x53d   : > { %v4104_v45 = vmul.f32 0.8, %v3950_v7 }
 0x53e   : > { %3370 = vrot.lane.b32.xlu1 %v7624_v28, %s4950_s13  ;;  %3270 = vrot.lane.b32.xlu0 %v8453_v42, %s4949_s18  ;;  %v4103_v18 = vmul.f32 0.8, %v3945_v17 }
 0x53f   : > { %v4136_v54 = vmax.f32 %v3950_v7, %v4104_v45 }
 0x540   : > { %v3355_v39 = vpop.permute.xlu1 %3354  ;;  %v3255_v25 = vpop.permute.xlu0 %3254  ;;  %v4135_v5 = vmax.f32 %v3945_v17, %v4103_v18 }
 0x541   : > { %v8528_v0 = vsel %vm1706_vm5, %v4136_v54, -inf  ;;  %v2500_v54 = vld [vmem:[#allocation3 + $0x198] sm:$0xff] }
 0x542   : > { %3073 = vrot.lane.b32.xlu1 %v7624_v28, %s4947_s12  ;;  %2973 = vrot.lane.b32.xlu0 %v8453_v42, %s4945_s11  ;;  %v3695_v28 = vsel %vm3676_vm0, %v3662_v30, %v3253_v1 }
 0x543   : > { %v3728_v40 = vsel %vm3709_vm1, %v3695_v28, %v3355_v39  ;;  %v3012_v39 = vrot.slane %v2497_v60, 1  ;;  %v8535_v28 = vsel %vm1706_vm5, %v4135_v5, -inf }
 0x544   : > { %v8469_v31 = vpop.permute.xlu1 %3057  ;;  %v8471_v3 = vpop.permute.xlu0 %2957 }
 0x546   : > { %3471 = vrot.lane.b32.xlu1 %v2814_v4, %s4951_s17  ;;  %3372 = vrot.lane.b32.xlu0 %v7621_v35, %s4950_s13 }
 0x548   : > { %v3456_v23 = vpop.permute.xlu1 %3455  ;;  %v3357_v11 = vpop.permute.xlu0 %3356 }
 0x549   : > { %v3761_v41 = vsel %vm3742_vm4, %v3728_v40, %v3456_v23 }
 0x54a   : > { %3174 = vrot.lane.b32.xlu1 %v2814_v4, %s4948_s16  ;;  %3075 = vrot.lane.b32.xlu0 %v7621_v35, %s4947_s12  ;;  %v3663_v35 = vsel %vm3643_vm15, %v3630_v15, %v3157_v48  ;;  %v3535_v15 = vsel %vm1706_vm5, %v4858_v55, %v9518_v34 }
 0x54b   : > { %4671 = vmatprep.mubr.msk.f32.mxu1 %vm3781_vm6, %v3761_v41  ;;  %v3696_v16 = vsel %vm3676_vm0, %v3663_v35, %v3255_v25  ;;  %v3013_v25 = vrot.slane %v8515_v53, 1  ;;  %v3567_v7 = vsel %vm1780_vm7, %v3535_v15, %v8435_v63 }
 0x54c   : > { %v8497_v61 = vpop.permute.xlu1 %3158  ;;  %v8499_v50 = vpop.permute.xlu0 %3059  ;;  %v3729_v22 = vsel %vm3709_vm1, %v3696_v16, %v3357_v11  ;;  %v2499_v11 = vld [vmem:[#allocation3 + $0x190] sm:$0x3] }
 0x54d   : > { %v3014_v30 = vsel %vm598_vm2, %v3012_v39, %v3013_v25  ;;  %v3015_v12 = vrot.slane %v2499_v11, 1 }
 0x54e   : > { %2877 = vrot.lane.b32.xlu1 %v2814_v4, %s4943_s30  ;;  %3473 = vrot.lane.b32.xlu0 %v2816_v59, %s4951_s17 }
 0x550   : > { %v8510_v24 = vpop.permute.xlu1 %2861  ;;  %v3458_v62 = vpop.permute.xlu0 %3457 }
 0x551   : > { %v3762_v19 = vsel %vm3742_vm4, %v3729_v22, %v3458_v62  ;;  %v3115_v22 = vsel %vm797_vm3, %v3113_v52, %v3114_v49  ;;  %v3016_v62 = vsel %vm598_vm2, %v3013_v25, %v3015_v12 }
 0x552   : > { %v4649_v9 = vpop.f32.mrb[2].mxu1  ;;  %3272 = vrot.lane.b32.xlu1 %v2497_v60, %s4949_s18  ;;  %3176 = vrot.lane.b32.xlu0 %v2816_v59, %s4948_s16 }
 0x553   : > { %v3960_v29 = vadd.f32 %v4649_v9, %v8487_v56  ;;  %v3954_v32 = vpop.f32.mrb[3].mxu1  ;;  %4672 = vmatmul.mubr.msk.f32.gmra.mrb[18].mxu1 %vm3781_vm6, %v3762_v19  ;;  %v9519_v9 = vld [vmem:[#allocation60_spill] sm:$0xff] }
 0x554   : > { %v3955_v51 = vadd.f32 %v8487_v56, %v3954_v32  ;;  %v3257_v1 = vpop.permute.xlu1 %3256  ;;  %v3161_v48 = vpop.permute.xlu0 %3160 }
 0x555   : > { %v4106_v57 = vmul.f32 0.8, %v3960_v29 }
 0x556   : > { %v4105_v26 = vmul.f32 0.8, %v3955_v51  ;;  %2975 = vrot.lane.b32.xlu1 %v2497_v60, %s4945_s11  ;;  %2879 = vrot.lane.b32.xlu0 %v2816_v59, %s4943_s30  ;;  %v3599_v59 = vsel %vm1854_vm9, %v3567_v7, %v8447_v13  ;;  %s294_s30 = sand.u32 1, %s4921_s22  }
 0x557   : > { %v4138_v20 = vmax.f32 %v3960_v29, %v4106_v57  ;;  %v3631_v16 = vsel %vm1928_vm11, %v3599_v59, %v8469_v31  ;;  %v3116_v31 = vrot.slane %v2499_v11, 2  ;;  %v2501_v29 = vld [vmem:[#allocation3 + $0x1a0] sm:$0xff]  ;;  %v2502_v57 = vld [vmem:[#allocation3 + $0x1a8] sm:$0x3] }
 0x558   : > { %v4137_v10 = vmax.f32 %v3955_v51, %v4105_v26  ;;  %v8523_v27 = vpop.permute.xlu1 %2959  ;;  %v8525_v8 = vpop.permute.xlu0 %2863  ;;  %v3664_v45 = vsel %vm3643_vm15, %v3631_v16, %v8497_v61  ;;  %v3415_v55 = vrot.slane %v2501_v29, 2  ;;  %v3417_v59 = vrot.slane %v2502_v57, 2 }
 0x559   : > { %v8531_v4 = vsel %vm1706_vm5, %v4138_v20, -inf  ;;  %v3697_v63 = vsel %vm3676_vm0, %v3664_v45, %v3257_v1  ;;  %v3117_v39 = vsel %vm797_vm3, %v3114_v49, %v3116_v31 }
 0x55a   : > { %v4184_v40 = vmax.f32 %v8528_v0, %v8531_v4  ;;  %v8540_v23 = vsel %vm1706_vm5, %v4137_v10, -inf  ;;  %3374 = vrot.lane.b32.xlu1 %v3014_v30, %s4950_s13  ;;  %3274 = vrot.lane.b32.xlu0 %v8515_v53, %s4949_s18  ;;  %v3313_v10 = vrot.slane %v2500_v54, 1 }
 0x55b   : > { %v4169_v41 = vmax.f32 %v8535_v28, %v8540_v23 }
 0x55c   : > { %v3359_v36 = vpop.permute.xlu1 %3358  ;;  %v3259_v47 = vpop.permute.xlu0 %3258 }
 0x55d   : > { %v3730_v13 = vsel %vm3709_vm1, %v3697_v63, %v3359_v36 }
 0x55e   : > { %3077 = vrot.lane.b32.xlu1 %v3014_v30, %s4947_s12  ;;  %2977 = vrot.lane.b32.xlu0 %v8515_v53, %s4945_s11  ;;  %v3536_v53 = vsel %vm1706_vm5, %v8151_v44, %v9519_v9  ;;  %v3316_v30 = vrot.slane %v2502_v57, 1  ;;  %s4398_s11 = sshll.u32 %s294_s30, 1 }
 0x55f   : > { %v3568_v61 = vsel %vm1780_vm7, %v3536_v53, %v8449_v43  ;;  %v3314_v43 = vrot.slane %v2501_v29, 1 }
 0x560   : > { %v8557_v35 = vpop.permute.xlu1 %3061  ;;  %v8559_v17 = vpop.permute.xlu0 %2961  ;;  %v3600_v32 = vsel %vm1854_vm9, %v3568_v61, %v8471_v3 }
 0x561   : > { %v3632_v44 = vsel %vm1928_vm11, %v3600_v32, %v8499_v50  ;;  %v3317_v15 = vsel %vm598_vm2, %v3314_v43, %v3316_v30  ;;  %v3315_v7 = vsel %vm598_vm2, %v3313_v10, %v3314_v43  ;;  %vm4259_vm2 = vcmask 1041409  }
 0x562   : > { %3475 = vrot.lane.b32.xlu1 %v3115_v22, %s4951_s17  ;;  %3376 = vrot.lane.b32.xlu0 %v3016_v62, %s4950_s13  ;;  %v3665_v25 = vsel %vm3643_vm15, %v3632_v44, %v3161_v48 }
 0x563   : > { %v3698_v3 = vsel %vm3676_vm0, %v3665_v25, %v3259_v47  ;;  %v3414_v47 = vrot.slane %v2500_v54, 2 }
 0x564   : > { %v3460_v19 = vpop.permute.xlu1 %3459  ;;  %v3361_v60 = vpop.permute.xlu0 %3360 }
 0x565   : > { %v3763_v18 = vsel %vm3742_vm4, %v3730_v13, %v3460_v19  ;;  %v3731_v11 = vsel %vm3709_vm1, %v3698_v3, %v3361_v60  ;;  %v3418_v60 = vsel %vm797_vm3, %v3415_v55, %v3417_v59 }
 0x566   : > { %3178 = vrot.lane.b32.xlu1 %v3115_v22, %s4948_s16  ;;  %3079 = vrot.lane.b32.xlu0 %v3016_v62, %s4947_s12  ;;  %s4475_s12 = sshll.u32 %s4929_s24, 5  ;;  %s4953_s24 = smov [#allocation4]  }
 0x567   : > { %4674 = vmatprep.mubr.msk.f32.mxu1 %vm3781_vm6, %v3763_v18  ;;  %v3416_v18 = vsel %vm797_vm3, %v3414_v47, %v3415_v55  ;;  %vm4278_vm3 = vcmask 123904   ;;  %s4863_s15 = sshll.u32 %s4953_s24, 4  ;;  %s4864_s15 = int_to_ptr.vmem [resolvable:$false] %s4863_s15 }
 0x568   : > { %v3163_v51 = vpop.permute.xlu1 %3162  ;;  %v8582_v1 = vpop.permute.xlu0 %3063 }
 0x56a   : > { %v4652_v5 = vpop.f32.mrb[4].mxu1  ;;  %3180 = vrot.lane.b32.xlu1 %v3117_v39, %s4948_s16  ;;  %3477 = vrot.lane.b32.xlu0 %v3117_v39, %s4951_s17  ;;  %s296_s16 = scalar_lea.vmem [#allocation4], %s4398_s11 }
 0x56b   : > { %v3970_v26 = vadd.f32 %v4652_v5, %v8487_v56  ;;  %v3964_v20 = vpop.f32.mrb[5].mxu1 }
 0x56c   : > { %v3965_v50 = vadd.f32 %v8487_v56, %v3964_v20  ;;  %v8594_v36 = vpop.permute.xlu1 %2865  ;;  %v3462_v48 = vpop.permute.xlu0 %3461 }
 0x56d   : > { %v4108_v52 = vmul.f32 0.8, %v3970_v26  ;;  %v3764_v49 = vsel %vm3742_vm4, %v3731_v11, %v3462_v48 }
 0x56e   : > { %v4107_v12 = vmul.f32 0.8, %v3965_v50  ;;  %3278 = vrot.lane.b32.xlu1 %v2501_v29, %s4949_s18  ;;  %3276 = vrot.lane.b32.xlu0 %v2500_v54, %s4949_s18  ;;  %s4295_s18 = sshll.u32 %s296_s16, 4  ;;  %s8833_s18 = int_to_ptr.vmem [resolvable:$true] %s4295_s18 }
 0x56f   : > { %v4140_v34 = vmax.f32 %v3970_v26, %v4108_v52  ;;  %4675 = vmatmul.mubr.msk.f32.gmra.mrb[20].mxu1 %vm3781_vm6, %v3764_v49  ;;  %s4859_s14 = scalar_lea.vmem %s8833_s18, 32  ;;  %p4866_p1 = scmp.lt.s32.totalorder %s8833_s18, %s4864_s15 }
 0x570   : > { %v4139_v16 = vmax.f32 %v3965_v50, %v4107_v12  ;;  %v3261_v22 = vpop.permute.xlu1 %3260  ;;  %v3165_v62 = vpop.permute.xlu0 %3164  ;;  %p4860_p12 = scmp.ne.s32.totalorder %s8833_s18, %s4859_s14 }
 0x571   : > { %v4185_v45 = vsel %vm1706_vm5, %v4140_v34, -inf }
 0x572   : > { %v8606_v63 = vmax.f32 %v4184_v40, %v4185_v45  ;;  %v4170_v13 = vsel %vm1706_vm5, %v4139_v16, -inf  ;;  %3380 = vrot.lane.b32.xlu1 %v3317_v15, %s4950_s13  ;;  %3378 = vrot.lane.b32.xlu0 %v3315_v7, %s4950_s13  ;;  %v9520_v40 = vld [vmem:[#allocation113_spill] sm:$0xff]  ;;  %s8831_s13 = scalar_lea.hbm %s8885_s6, %s4475_s12  ;;  %p4861_p13 = pnand %p4860_p12, %p5029_p4 }
 0x573   : > { %v8614_v19 = vmax.f32 %v4169_v41, %v4170_v13  ;;  %v3537_v53 = vsel %vm1706_vm5, %v8190_v33, %v9520_v40  ;;  %v9522_v45 = vld [vmem:[#allocation33_spill] sm:$0xff] }
 0x574   : > { %v2964_v31 = vpop.permute.xlu1 %2963  ;;  %v8618_v9 = vpop.permute.xlu0 %2867  ;;  %v3569_v28 = vsel %vm1780_vm7, %v3537_v53, %v8510_v24  ;;  %v9521_v24 = vld [vmem:[#allocation29_spill] sm:$0xff]  ;;  %v3539_v13 = vsel %vm1706_vm5, %v8252_v14, %v9522_v45  ;;  %p4862_p0 = pneg %p4861_p13 }
 0x575   : > { %v3601_v23 = vsel %vm1854_vm9, %v3569_v28, %v8523_v27  ;;  %v3538_v27 = vsel %vm1706_vm5, %v8205_v38, %v9521_v24 }
 0x576   : > { %3481 = vrot.lane.b32.xlu1 %v3418_v60, %s4951_s17  ;;  %3479 = vrot.lane.b32.xlu0 %v3416_v18, %s4951_s17  ;;  %v3633_v29 = vsel %vm1928_vm11, %v3601_v23, %v8557_v35  ;;  %v3570_v35 = vsel %vm1780_vm7, %v3538_v27, %v8525_v8  ;;  %s4865_s17 = scalar_lea.vmem %s4864_s15, 64 }
 0x577   : > { %v3666_v32 = vsel %vm3643_vm15, %v3633_v29, %v3163_v51  ;;  %v3602_v43 = vsel %vm1854_vm9, %v3570_v35, %v8559_v17  ;;  %p4867_p2 = scmp.lt.s32.totalorder %s4865_s17, %s4859_s14 }
 0x578   : > { %v3363_v0 = vpop.permute.xlu1 %3362  ;;  %v3263_v4 = vpop.permute.xlu0 %3262  ;;  %v3699_v54 = vsel %vm3676_vm0, %v3666_v32, %v3261_v22  ;;  %v3634_v10 = vsel %vm1928_vm11, %v3602_v43, %v8582_v1 }
 0x579   : > { %v3732_v57 = vsel %vm3709_vm1, %v3699_v54, %v3363_v0  ;;  %v3667_v30 = vsel %vm3643_vm15, %v3634_v10, %v3165_v62  ;;  %p4868_p3 = por %p4867_p2, %p4866_p1 }
 0x57a   : > { %v3700_v50 = vsel %vm3676_vm0, %v3667_v30, %v3263_v4 }
 0x57b   : > { %p4869_p5 = pnand %p4868_p3, %p4862_p0 }
 0x57c   : > { %v3066_v41 = vpop.permute.xlu1 %3065  ;;  %v8629_v61 = vpop.permute.xlu0 %2965 }
 0x580   : > { %v3464_v44 = vpop.permute.xlu1 %3463  ;;  %v3365_v33 = vpop.permute.xlu0 %3364 }
 0x581   : > { %v3765_v39 = vsel %vm3742_vm4, %v3732_v57, %v3464_v44  ;;  %v3733_v48 = vsel %vm3709_vm1, %v3700_v50, %v3365_v33  ;;  %v9523_v57 = vld [vmem:[#allocation137_spill] sm:$0xff] }
 0x582   : > { %v4655_v25 = vpop.f32.mrb[6].mxu1  ;;  %4677 = vmatprep.mubr.msk.f32.mxu1 %vm3781_vm6, %v3765_v39 }
 0x583   : > { %v3980_v51 = vadd.f32 %v4655_v25, %v8487_v56  ;;  %v3974_v5 = vpop.f32.mrb[7].mxu1 }
 0x584   : > { %v3975_v3 = vadd.f32 %v8487_v56, %v3974_v5  ;;  %v3167_v26 = vpop.permute.xlu1 %3166  ;;  %v3068_v20 = vpop.permute.xlu0 %3067 }
 0x585   : > { %v4110_v38 = vmul.f32 0.8, %v3980_v51 }
 0x586   : > { %v4109_v11 = vmul.f32 0.8, %v3975_v3 }
 0x587   : > { %v4142_v8 = vmax.f32 %v3980_v51, %v4110_v38 }
 0x588   : > { %v4141_v52 = vmax.f32 %v3975_v3, %v4109_v11  ;;  %v2870_v49 = vpop.permute.xlu1 %2869  ;;  %v3466_v12 = vpop.permute.xlu0 %3465 }
 0x589   : > { %v4187_v17 = vsel %vm1706_vm5, %v4142_v8, -inf  ;;  %v3766_v55 = vsel %vm3742_vm4, %v3733_v48, %v3466_v12  ;;  %v9524_v12 = vld [vmem:[#allocation63_spill] sm:$0xff] }
 0x58a   : > { %v4188_v47 = vmax.f32 %v8606_v63, %v4187_v17  ;;  %v4172_v1 = vsel %vm1706_vm5, %v4141_v52, -inf  ;;  %4678 = vmatmul.mubr.msk.f32.gmra.mrb[22].mxu1 %vm3781_vm6, %v3766_v55  ;;  %v3571_v63 = vsel %vm1780_vm7, %v3539_v13, %v8594_v36  ;;  %v3541_v17 = vsel %vm1706_vm5, %v8314_v37, %v9524_v12 }
 0x58b   : > { %v4173_v34 = vmax.f32 %v8614_v19, %v4172_v1  ;;  %v3603_v60 = vsel %vm1854_vm9, %v3571_v63, %v2964_v31  ;;  %v3573_v55 = vsel %vm1780_vm7, %v3541_v17, %v2870_v49 }
 0x58c   : > { %v3265_v15 = vpop.permute.xlu1 %3264  ;;  %v3169_v7 = vpop.permute.xlu0 %3168  ;;  %v3635_v19 = vsel %vm1928_vm11, %v3603_v60, %v3066_v41  ;;  %v3540_v41 = vsel %vm1706_vm5, %v8267_v21, %v9523_v57 }
 0x58d   : > { %v3668_v4 = vsel %vm3643_vm15, %v3635_v19, %v3167_v26  ;;  %v3572_v33 = vsel %vm1780_vm7, %v3540_v41, %v8618_v9 }
 0x58e   : > { %v3701_v53 = vsel %vm3676_vm0, %v3668_v4, %v3265_v15  ;;  %v3604_v24 = vsel %vm1854_vm9, %v3572_v33, %v8629_v61  ;;  %v9525_v4 = vld [vmem:[#allocation34_spill] sm:$0xff] }
 0x58f   : > { %v3636_v51 = vsel %vm1928_vm11, %v3604_v24, %v3068_v20 }
 0x590   : > { %v2968_v59 = vpop.permute.xlu1 %2967  ;;  %v8658_v16 = vpop.permute.xlu0 %2871  ;;  %v3669_v43 = vsel %vm3643_vm15, %v3636_v51, %v3169_v7 }
 0x594   : > { %v3367_v22 = vpop.permute.xlu1 %3366  ;;  %v3267_v62 = vpop.permute.xlu0 %3266 }
 0x595   : > { %v3734_v14 = vsel %vm3709_vm1, %v3701_v53, %v3367_v22  ;;  %v3702_v26 = vsel %vm3676_vm0, %v3669_v43, %v3267_v62  ;;  %v9526_v43 = vld [vmem:[#allocation65_spill] sm:$0xff] }
 0x598   : > { %v3070_v18 = vpop.permute.xlu1 %3069  ;;  %v8666_v0 = vpop.permute.xlu0 %2969 }
 0x59a   : > { %v4658_v40 = vpop.f32.mrb[8].mxu1 }
 0x59b   : > { %v3990_v28 = vadd.f32 %v4658_v40, %v8487_v56  ;;  %v3984_v23 = vpop.f32.mrb[9].mxu1 }
 0x59c   : > { %v3985_v29 = vadd.f32 %v8487_v56, %v3984_v23  ;;  %v3468_v36 = vpop.permute.xlu1 %3467  ;;  %v3369_v32 = vpop.permute.xlu0 %3368 }
 0x59d   : > { %v4112_v31 = vmul.f32 0.8, %v3990_v28  ;;  %v3767_v54 = vsel %vm3742_vm4, %v3734_v14, %v3468_v36  ;;  %v3735_v10 = vsel %vm3709_vm1, %v3702_v26, %v3369_v32 }
 0x59e   : > { %v4111_v44 = vmul.f32 0.8, %v3985_v29  ;;  %4680 = vmatprep.mubr.msk.f32.mxu1 %vm3781_vm6, %v3767_v54 }
 0x59f   : > { %v4144_v39 = vmax.f32 %v3990_v28, %v4112_v31 }
 0x5a0   : > { %v4143_v27 = vmax.f32 %v3985_v29, %v4111_v44  ;;  %v3171_v25 = vpop.permute.xlu1 %3170  ;;  %v3072_v35 = vpop.permute.xlu0 %3071 }
 0x5a1   : > { %v4189_v5 = vsel %vm1706_vm5, %v4144_v39, -inf }
 0x5a2   : > { %v8686_v21 = vmax.f32 %v4188_v47, %v4189_v5  ;;  %v4174_v3 = vsel %vm1706_vm5, %v4143_v27, -inf  ;;  %v3605_v47 = vsel %vm1854_vm9, %v3573_v55, %v2968_v59 }
 0x5a3   : > { %v8690_v9 = vmax.f32 %v4173_v34, %v4174_v3  ;;  %v3637_v15 = vsel %vm1928_vm11, %v3605_v47, %v3070_v18  ;;  %v3542_v18 = vsel %vm1706_vm5, %v8329_v6, %v9525_v4  ;;  %v9527_v47 = vld [vmem:[#allocation62_spill] sm:$0xff] }
 0x5a4   : > { %v2874_v61 = vpop.permute.xlu1 %2873  ;;  %v3470_v38 = vpop.permute.xlu0 %3469  ;;  %v3670_v7 = vsel %vm3643_vm15, %v3637_v15, %v3171_v25  ;;  %v3574_v53 = vsel %vm1780_vm7, %v3542_v18, %v8658_v16 }
 0x5a5   : > { %v3768_v30 = vsel %vm3742_vm4, %v3735_v10, %v3470_v38  ;;  %v3606_v23 = vsel %vm1854_vm9, %v3574_v53, %v8666_v0 }
 0x5a6   : > { %4681 = vmatmul.mubr.msk.f32.gmra.mrb[24].mxu1 %vm3781_vm6, %v3768_v30  ;;  %v3638_v32 = vsel %vm1928_vm11, %v3606_v23, %v3072_v35  ;;  %v9528_v23 = vld [vmem:[#allocation101_spill] sm:$0xff] }
 0x5a8   : > { %v3269_v20 = vpop.permute.xlu1 %3268  ;;  %v3173_v11 = vpop.permute.xlu0 %3172 }
 0x5a9   : > { %v3703_v62 = vsel %vm3676_vm0, %v3670_v7, %v3269_v20  ;;  %v3671_v54 = vsel %vm3643_vm15, %v3638_v32, %v3173_v11 }
 0x5ac   : > { %v2972_v50 = vpop.permute.xlu1 %2971  ;;  %v8695_v8 = vpop.permute.xlu0 %2875 }
 0x5b0   : > { %v3371_v48 = vpop.permute.xlu1 %3370  ;;  %v3271_v52 = vpop.permute.xlu0 %3270 }
 0x5b1   : > { %v3736_v63 = vsel %vm3709_vm1, %v3703_v62, %v3371_v48  ;;  %v3704_v41 = vsel %vm3676_vm0, %v3671_v54, %v3271_v52 }
 0x5b4   : > { %v3074_v1 = vpop.permute.xlu1 %3073  ;;  %v8702_v34 = vpop.permute.xlu0 %2973 }
 0x5b6   : > { %v4661_v22 = vpop.f32.mrb[10].mxu1 }
 0x5b7   : > { %v4000_v45 = vadd.f32 %v4661_v22, %v8487_v56  ;;  %v3994_v13 = vpop.f32.mrb[11].mxu1 }
 0x5b8   : > { %v3995_v37 = vadd.f32 %v8487_v56, %v3994_v13  ;;  %v3472_v49 = vpop.permute.xlu1 %3471  ;;  %v3373_v60 = vpop.permute.xlu0 %3372 }
 0x5b9   : > { %v4114_v59 = vmul.f32 0.8, %v4000_v45  ;;  %v3769_v19 = vsel %vm3742_vm4, %v3736_v63, %v3472_v49  ;;  %v3737_v44 = vsel %vm3709_vm1, %v3704_v41, %v3373_v60 }
 0x5ba   : > { %v4113_v40 = vmul.f32 0.8, %v3995_v37  ;;  %4683 = vmatprep.mubr.msk.f32.mxu1 %vm3781_vm6, %v3769_v19 }
 0x5bb   : > { %v4146_v28 = vmax.f32 %v4000_v45, %v4114_v59 }
 0x5bc   : > { %v4145_v14 = vmax.f32 %v3995_v37, %v4113_v40  ;;  %v3175_v29 = vpop.permute.xlu1 %3174  ;;  %v3076_v36 = vpop.permute.xlu0 %3075 }
 0x5bd   : > { %v4191_v31 = vsel %vm1706_vm5, %v4146_v28, -inf }
 0x5be   : > { %v4192_v6 = vmax.f32 %v8686_v21, %v4191_v31  ;;  %v4176_v57 = vsel %vm1706_vm5, %v4145_v14, -inf  ;;  %v3543_v21 = vsel %vm1706_vm5, %v8376_v58, %v9526_v43  ;;  %v3546_v14 = vsel %vm1706_vm5, %v8453_v42, %v9528_v23 }
 0x5bf   : > { %v4177_v16 = vmax.f32 %v8690_v9, %v4176_v57  ;;  %v3575_v3 = vsel %vm1780_vm7, %v3543_v21, %v2874_v61 }
 0x5c0   : > { %v2878_v0 = vpop.permute.xlu1 %2877  ;;  %v3474_v33 = vpop.permute.xlu0 %3473  ;;  %v3607_v26 = vsel %vm1854_vm9, %v3575_v3, %v2972_v50 }
 0x5c1   : > { %v3770_v39 = vsel %vm3742_vm4, %v3737_v44, %v3474_v33  ;;  %v3639_v38 = vsel %vm1928_vm11, %v3607_v26, %v3074_v1  ;;  %v3544_v1 = vsel %vm1706_vm5, %v8391_v2, %v9527_v47 }
 0x5c2   : > { %4684 = vmatmul.mubr.msk.f32.gmra.mrb[26].mxu1 %vm3781_vm6, %v3770_v39  ;;  %v3672_v30 = vsel %vm3643_vm15, %v3639_v38, %v3175_v29  ;;  %v3576_v7 = vsel %vm1780_vm7, %v3544_v1, %v8695_v8  ;;  %v9529_v29 = vld [vmem:[#allocation102_spill] sm:$0xff] }
 0x5c3   : > { %v3608_v62 = vsel %vm1854_vm9, %v3576_v7, %v8702_v34 }
 0x5c4   : > { %v3273_v24 = vpop.permute.xlu1 %3272  ;;  %v3177_v27 = vpop.permute.xlu0 %3176  ;;  %v3640_v37 = vsel %vm1928_vm11, %v3608_v62, %v3076_v36  ;;  %v3545_v36 = vsel %vm1706_vm5, %v8438_v46, %v9529_v29 }
 0x5c5   : > { %v3705_v11 = vsel %vm3676_vm0, %v3672_v30, %v3273_v24  ;;  %v3673_v60 = vsel %vm3643_vm15, %v3640_v37, %v3177_v27  ;;  %v3577_v32 = vsel %vm1780_vm7, %v3545_v36, %v2878_v0 }
 0x5c8   : > { %v2976_v25 = vpop.permute.xlu1 %2975  ;;  %v2880_v35 = vpop.permute.xlu0 %2879 }
 0x5c9   : > { %v3578_v31 = vsel %vm1780_vm7, %v3546_v14, %v2880_v35  ;;  %v3609_v54 = vsel %vm1854_vm9, %v3577_v32, %v2976_v25 }
 0x5cc   : > { %v3375_v51 = vpop.permute.xlu1 %3374  ;;  %v3275_v5 = vpop.permute.xlu0 %3274 }
 0x5cd   : > { %v3738_v12 = vsel %vm3709_vm1, %v3705_v11, %v3375_v51  ;;  %v3706_v19 = vsel %vm3676_vm0, %v3673_v60, %v3275_v5 }
 0x5d0   : > { %v3078_v9 = vpop.permute.xlu1 %3077  ;;  %v2978_v10 = vpop.permute.xlu0 %2977 }
 0x5d2   : > { %v4664_v20 = vpop.f32.mrb[12].mxu1 }
 0x5d3   : > { %v4010_v48 = vadd.f32 %v4664_v20, %v8487_v56  ;;  %v4004_v52 = vpop.f32.mrb[13].mxu1 }
 0x5d4   : > { %v4005_v58 = vadd.f32 %v8487_v56, %v4004_v52  ;;  %v3476_v17 = vpop.permute.xlu1 %3475  ;;  %v3377_v61 = vpop.permute.xlu0 %3376 }
 0x5d5   : > { %v4116_v55 = vmul.f32 0.8, %v4010_v48  ;;  %v3771_v50 = vsel %vm3742_vm4, %v3738_v12, %v3476_v17  ;;  %v3739_v8 = vsel %vm3709_vm1, %v3706_v19, %v3377_v61 }
 0x5d6   : > { %v4115_v15 = vmul.f32 0.8, %v4005_v58  ;;  %4686 = vmatprep.mubr.msk.f32.mxu1 %vm3781_vm6, %v3771_v50 }
 0x5d7   : > { %v4148_v22 = vmax.f32 %v4010_v48, %v4116_v55 }
 0x5d8   : > { %v4147_v45 = vmax.f32 %v4005_v58, %v4115_v15  ;;  %v3179_v13 = vpop.permute.xlu1 %3178  ;;  %v3080_v63 = vpop.permute.xlu0 %3079 }
 0x5d9   : > { %v4193_v49 = vsel %vm1706_vm5, %v4148_v22, -inf }
 0x5da   : > { %v4194_v2 = vmax.f32 %v4192_v6, %v4193_v49  ;;  %v4178_v59 = vsel %vm1706_vm5, %v4147_v45, -inf  ;;  %v3610_v6 = vsel %vm1854_vm9, %v3578_v31, %v2978_v10 }
 0x5db   : > { %v4179_v4 = vmax.f32 %v4177_v16, %v4178_v59  ;;  %v3641_v16 = vsel %vm1928_vm11, %v3609_v54, %v3078_v9  ;;  %v3642_v44 = vsel %vm1928_vm11, %v3610_v6, %v3080_v63 }
 0x5dc   : > { %v3181_v18 = vpop.permute.xlu1 %3180  ;;  %v3478_v40 = vpop.permute.xlu0 %3477  ;;  %v3674_v42 = vsel %vm3643_vm15, %v3641_v16, %v3179_v13 }
 0x5dd   : > { %v3772_v34 = vsel %vm3742_vm4, %v3739_v8, %v3478_v40  ;;  %v3675_v33 = vsel %vm3643_vm15, %v3642_v44, %v3181_v18 }
 0x5de   : > { %4687 = vmatmul.mubr.msk.f32.gmra.mrb[28].mxu1 %vm3781_vm6, %v3772_v34 }
 0x5e0   : > { %v3279_v53 = vpop.permute.xlu1 %3278  ;;  %v3277_v28 = vpop.permute.xlu0 %3276 }
 0x5e1   : > { %v3708_v46 = vsel %vm3676_vm0, %v3675_v33, %v3279_v53  ;;  %v3707_v0 = vsel %vm3676_vm0, %v3674_v42, %v3277_v28 }
 0x5e4   : > { %v3381_v57 = vpop.permute.xlu1 %3380  ;;  %v3379_v41 = vpop.permute.xlu0 %3378 }
 0x5e5   : > { %v3741_v39 = vsel %vm3709_vm1, %v3708_v46, %v3381_v57  ;;  %v3740_v24 = vsel %vm3709_vm1, %v3707_v0, %v3379_v41 }
 0x5e8   : > { %v3482_v27 = vpop.permute.xlu1 %3481  ;;  %v3480_v25 = vpop.permute.xlu0 %3479 }
 0x5e9   : > { %v3774_v35 = vsel %vm3742_vm4, %v3741_v39, %v3482_v27  ;;  %v3773_v51 = vsel %vm3742_vm4, %v3740_v24, %v3480_v25 }
 0x5ea   : > { %4689 = vmatprep.mubr.msk.f32.mxu1 %vm3781_vm6, %v3773_v51 }
 0x5eb   : > { %4690 = vmatmul.mubr.msk.f32.gmra.mrb[30].mxu1 %vm3781_vm6, %v3774_v35 }
 0x5ee   : > { %v4667_v5 = vpop.f32.mrb[14].mxu1 }
 0x5ef   : > { %v4020_v43 = vadd.f32 %v4667_v5, %v8487_v56  ;;  %v4014_v21 = vpop.f32.mrb[15].mxu1 }
 0x5f0   : > { %v4015_v3 = vadd.f32 %v8487_v56, %v4014_v21 }
 0x5f1   : > { %v4118_v26 = vmul.f32 0.8, %v4020_v43 }
 0x5f2   : > { %v4117_v9 = vmul.f32 0.8, %v4015_v3 }
 0x5f3   : > { %v4150_v10 = vmax.f32 %v4020_v43, %v4118_v26 }
 0x5f4   : > { %v4149_v38 = vmax.f32 %v4015_v3, %v4117_v9 }
 0x5f5   : > { %v4195_v30 = vsel %vm1706_vm5, %v4150_v10, -inf }
 0x5f6   : > { %v4196_v20 = vmax.f32 %v4194_v2, %v4195_v30  ;;  %v4180_v11 = vsel %vm1706_vm5, %v4149_v38, -inf }
 0x5f7   : > { %v4181_v48 = vmax.f32 %v4179_v4, %v4180_v11 }
 0x5f8   : > { %v4234_v52 = vsel %vm1706_vm5, %v4196_v20, -inf }
 0x5f9   : > { %v4235_v12 = vrot.slane %v4234_v52, 4  ;;  %v4227_v58 = vsel %vm1706_vm5, %v4181_v48, -inf }
 0x5fa   : > { %v4228_v17 = vrot.slane %v4227_v58, 4 }
 0x5fb   : > { %v4236_v61 = vmax.f32 %v4234_v52, %v4235_v12 }
 0x5fc   : > { %v4229_v55 = vmax.f32 %v4227_v58, %v4228_v17 }
 0x5fd   : > { %v4237_v50 = vrot.slane %v4236_v61, 2 }
 0x5fe   : > { %v4230_v47 = vrot.slane %v4229_v55, 2 }
 0x5ff   : > { %v4238_v1 = vmax.f32 %v4236_v61, %v4237_v50 }
 0x600   : > { %v4231_v15 = vmax.f32 %v4229_v55, %v4230_v47 }
 0x601   : > { %v4239_v7 = vrot.slane %v4238_v1, 1 }
 0x602   : > { %v4232_v22 = vrot.slane %v4231_v15, 1 }
 0x603   : > { %v4240_v62 = vmax.f32 %v4238_v1, %v4239_v7 }
 0x604   : > { %v4233_v45 = vmax.f32 %v4231_v15, %v4232_v22 }
 0x606   : > { %v8786_v13 = vsel %vm4259_vm2, %v4240_v62, %v4233_v45 }
 0x60a   : > { %v4670_v63 = vpop.f32.mrb[16].mxu1 }
 0x60b   : > { %v4024_v37 = vpop.f32.mrb[17].mxu1  ;;  %v4030_v49 = vadd.f32 %v4670_v63, %v8487_v56 }
 0x60c   : > { %v4025_v60 = vadd.f32 %v8487_v56, %v4024_v37 }
 0x60d   : > { %v4120_v2 = vmul.f32 0.8, %v4030_v49 }
 0x60e   : > { %v4119_v59 = vmul.f32 0.8, %v4025_v60 }
 0x60f   : > { %v4152_v40 = vmax.f32 %v4030_v49, %v4120_v2 }
 0x610   : > { %v4151_v53 = vmax.f32 %v4025_v60, %v4119_v59 }
 0x611   : > { %v4212_v29 = vsel %vm1706_vm5, %v4152_v40, -inf }
 0x612   : > { %v4197_v32 = vsel %vm1706_vm5, %v4151_v53, -inf }
 0x626   : > { %v4673_v19 = vpop.f32.mrb[18].mxu1 }
 0x627   : > { %v4040_v4 = vadd.f32 %v4673_v19, %v8487_v56  ;;  %v4034_v8 = vpop.f32.mrb[19].mxu1 }
 0x628   : > { %v4035_v18 = vadd.f32 %v8487_v56, %v4034_v8 }
 0x629   : > { %v4122_v34 = vmul.f32 0.8, %v4040_v4 }
 0x62a   : > { %v4121_v28 = vmul.f32 0.8, %v4035_v18 }
 0x62b   : > { %v4154_v23 = vmax.f32 %v4040_v4, %v4122_v34 }
 0x62c   : > { %v4153_v14 = vmax.f32 %v4035_v18, %v4121_v28 }
 0x62d   : > { %v4213_v36 = vsel %vm1706_vm5, %v4154_v23, -inf }
 0x62e   : > { %v4214_v31 = vmax.f32 %v4212_v29, %v4213_v36  ;;  %v4198_v54 = vsel %vm1706_vm5, %v4153_v14, -inf }
 0x62f   : > { %v4199_v6 = vmax.f32 %v4197_v32, %v4198_v54 }
 0x642   : > { %v4676_v57 = vpop.f32.mrb[20].mxu1 }
 0x643   : > { %v4050_v41 = vadd.f32 %v4676_v57, %v8487_v56  ;;  %v4044_v16 = vpop.f32.mrb[21].mxu1 }
 0x644   : > { %v4045_v44 = vadd.f32 %v8487_v56, %v4044_v16 }
 0x645   : > { %v4124_v42 = vmul.f32 0.8, %v4050_v41 }
 0x646   : > { %v4123_v33 = vmul.f32 0.8, %v4045_v44 }
 0x647   : > { %v4156_v46 = vmax.f32 %v4050_v41, %v4124_v42 }
 0x648   : > { %v4155_v0 = vmax.f32 %v4045_v44, %v4123_v33 }
 0x649   : > { %v4215_v39 = vsel %vm1706_vm5, %v4156_v46, -inf }
 0x64a   : > { %v4216_v24 = vmax.f32 %v4214_v31, %v4215_v39  ;;  %v4200_v27 = vsel %vm1706_vm5, %v4155_v0, -inf }
 0x64b   : > { %v4201_v25 = vmax.f32 %v4199_v6, %v4200_v27 }
 0x65d   : > { %v4679_v35 = vpop.f32.mrb[22].mxu1 }
 0x65e   : > { %v4060_v51 = vadd.f32 %v4679_v35, %v8487_v56  ;;  %v4054_v5 = vpop.f32.mrb[23].mxu1 }
 0x65f   : > { %v4055_v43 = vadd.f32 %v8487_v56, %v4054_v5 }
 0x660   : > { %v4126_v21 = vmul.f32 0.8, %v4060_v51 }
 0x661   : > { %v4125_v3 = vmul.f32 0.8, %v4055_v43 }
 0x662   : > { %v4158_v26 = vmax.f32 %v4060_v51, %v4126_v21 }
 0x663   : > { %v4157_v9 = vmax.f32 %v4055_v43, %v4125_v3 }
 0x664   : > { %v4217_v10 = vsel %vm1706_vm5, %v4158_v26, -inf  ;;  %v4268_v26 = vlaneseq }
 0x665   : > { %v4218_v38 = vmax.f32 %v4216_v24, %v4217_v10  ;;  %v4202_v30 = vsel %vm1706_vm5, %v4157_v9, -inf }
 0x666   : > { %v4203_v20 = vmax.f32 %v4201_v25, %v4202_v30 }
 0x679   : > { %v4682_v11 = vpop.f32.mrb[24].mxu1 }
 0x67a   : > { %v4070_v48 = vadd.f32 %v4682_v11, %v8487_v56  ;;  %v4064_v52 = vpop.f32.mrb[25].mxu1  ;;  %v4269_v11 = vshrl.u32 %v4268_v26, 7 }
 0x67b   : > { %v4065_v12 = vadd.f32 %v8487_v56, %v4064_v52 }
 0x67c   : > { %v4128_v58 = vmul.f32 0.8, %v4070_v48 }
 0x67d   : > { %v4127_v17 = vmul.f32 0.8, %v4065_v12 }
 0x67e   : > { %v4160_v61 = vmax.f32 %v4070_v48, %v4128_v58 }
 0x67f   : > { %v4159_v55 = vmax.f32 %v4065_v12, %v4127_v17 }
 0x680   : > { %v4219_v50 = vsel %vm1706_vm5, %v4160_v61, -inf }
 0x681   : > { %v4220_v47 = vmax.f32 %v4218_v38, %v4219_v50  ;;  %v4204_v1 = vsel %vm1706_vm5, %v4159_v55, -inf  ;;  %v9530_v50 = vmov 0.0  }
 0x682   : > { %v4205_v15 = vmax.f32 %v4203_v20, %v4204_v1 }
 0x695   : > { %v4685_v7 = vpop.f32.mrb[26].mxu1 }
 0x696   : > { %v4080_v22 = vadd.f32 %v4685_v7, %v8487_v56  ;;  %v4074_v62 = vpop.f32.mrb[27].mxu1 }
 0x697   : > { %v4075_v45 = vadd.f32 %v8487_v56, %v4074_v62 }
 0x698   : > { %v4130_v63 = vmul.f32 0.8, %v4080_v22 }
 0x699   : > { %v4129_v37 = vmul.f32 0.8, %v4075_v45 }
 0x69a   : > { %v4162_v49 = vmax.f32 %v4080_v22, %v4130_v63 }
 0x69b   : > { %v4161_v60 = vmax.f32 %v4075_v45, %v4129_v37 }
 0x69c   : > { %v4221_v2 = vsel %vm1706_vm5, %v4162_v49, -inf }
 0x69d   : > { %v4222_v59 = vmax.f32 %v4220_v47, %v4221_v2  ;;  %v4206_v19 = vsel %vm1706_vm5, %v4161_v60, -inf }
 0x69e   : > { %v4207_v4 = vmax.f32 %v4205_v15, %v4206_v19 }
 0x6b1   : > { %v4688_v8 = vpop.f32.mrb[28].mxu1 }
 0x6b2   : > { %v4090_v18 = vadd.f32 %v4688_v8, %v8487_v56  ;;  %v4084_v40 = vpop.f32.mrb[29].mxu1 }
 0x6b3   : > { %v4085_v34 = vadd.f32 %v8487_v56, %v4084_v40 }
 0x6b4   : > { %v4132_v53 = vmul.f32 0.8, %v4090_v18 }
 0x6b5   : > { %v4131_v28 = vmul.f32 0.8, %v4085_v34 }
 0x6b6   : > { %v4164_v23 = vmax.f32 %v4090_v18, %v4132_v53 }
 0x6b7   : > { %v4163_v14 = vmax.f32 %v4085_v34, %v4131_v28 }
 0x6b8   : > { %v4223_v29 = vsel %vm1706_vm5, %v4164_v23, -inf }
 0x6b9   : > { %v4224_v36 = vmax.f32 %v4222_v59, %v4223_v29  ;;  %v4208_v32 = vsel %vm1706_vm5, %v4163_v14, -inf }
 0x6ba   : > { %v4209_v31 = vmax.f32 %v4207_v4, %v4208_v32 }
 0x6be   : > { %v4691_v54 = vpop.f32.mrb[30].mxu1 }
 0x6bf   : > { %v4100_v6 = vadd.f32 %v4691_v54, %v8487_v56  ;;  %v4094_v57 = vpop.f32.mrb[31].mxu1 }
 0x6c0   : > { %v4095_v41 = vadd.f32 %v8487_v56, %v4094_v57  ;;  %v4952_v56 = vmov 1934713408  }
 0x6c1   : > { %v4134_v16 = vmul.f32 0.8, %v4100_v6  ;;  %v4266_v3 = vunpack.c.l.s4 %v4952_v56 }
 0x6c2   : > { %v4133_v44 = vmul.f32 0.8, %v4095_v41 }
 0x6c3   : > { %v4166_v42 = vmax.f32 %v4100_v6, %v4134_v16  ;;  %v4267_v20 = vunpack.c.0.s8 %v4266_v3 }
 0x6c4   : > { %v4165_v33 = vmax.f32 %v4095_v41, %v4133_v44 }
 0x6c5   : > { %v4225_v46 = vsel %vm1706_vm5, %v4166_v42, -inf  ;;  %v4270_v58 = vsub.s32 %v4267_v20, %v4269_v11 }
 0x6c6   : > { %v4226_v0 = vmax.f32 %v4224_v36, %v4225_v46  ;;  %v4210_v39 = vsel %vm1706_vm5, %v4165_v33, -inf }
 0x6c7   : > { %v4211_v24 = vmax.f32 %v4209_v31, %v4210_v39 }
 0x6c8   : > { %v4248_v27 = vsel %vm1706_vm5, %v4226_v0, -inf }
 0x6c9   : > { %v4249_v25 = vrot.slane %v4248_v27, 4  ;;  %v4241_v35 = vsel %vm1706_vm5, %v4211_v24, -inf }
 0x6ca   : > { %v4242_v51 = vrot.slane %v4241_v35, 4 }
 0x6cb   : > { %v4250_v5 = vmax.f32 %v4248_v27, %v4249_v25 }
 0x6cc   : > { %v4243_v43 = vmax.f32 %v4241_v35, %v4242_v51 }
 0x6cd   : > { %v4251_v21 = vrot.slane %v4250_v5, 2 }
 0x6ce   : > { %v4244_v9 = vrot.slane %v4243_v43, 2 }
 0x6cf   : > { %v4252_v10 = vmax.f32 %v4250_v5, %v4251_v21 }
 0x6d0   : > { %v4245_v38 = vmax.f32 %v4243_v43, %v4244_v9 }
 0x6d1   : > { %v4253_v30 = vrot.slane %v4252_v10, 1 }
 0x6d2   : > { %v4246_v48 = vrot.slane %v4245_v38, 1 }
 0x6d3   : > { %v4254_v52 = vmax.f32 %v4252_v10, %v4253_v30 }
 0x6d4   : > { %v4247_v12 = vmax.f32 %v4245_v38, %v4246_v48 }
 0x6d6   : > { %v4261_v17 = vsel %vm4259_vm2, %v4254_v52, %v4247_v12 }
 0x6d7   : > { %v4264_v61 = vcombine.low %v8786_v13, %v4261_v17 }
 0x6d9   : > { %v4271_v55 = vrot.slane %v4264_v61, %v4270_v58 }
 0x6db   : > { %v4272_v47 = vcombine.high %v4271_v55, %v9530_v50 }
 0x6dd   : > { %4274 = vrot.lane.b32.xlu0 %v4272_v47, %s4941_s27  ;;  %s4281_s27 = scalar_lea.sflag [#allocation5], %s294_s30 }
 0x74f   : > { %v4275_v1 = vpop.permute.xlu0 %4274 }
 0x750   : > { %v4277_v13 = vsel %vm1706_vm5, %v4271_v55, %v4275_v1 }
 0x751   : > { %4279 = vst.msk [vmem:[%s296_s16] sm:$0x3] %vm4278_vm3, %v4277_v13 }
 0x752   : > { %4872 = shalt.err (!%p4869_p5)
}
 0x753   : > { %s4873_s19 = scalar_lea.hbm %s8831_s13, 32  ;;  %s4877_s11 = scalar_lea.hbm %s8885_s6, 64 }
 0x754   : > { %p4874_p6 = scmp.ne.s32.totalorder %s8831_s13, %s4873_s19  ;;  %p4878_p10 = scmp.lt.u32.totalorder %s8831_s13, %s8885_s6 }
 0x755   : > { %p4879_p11 = scmp.lt.u32.totalorder %s4877_s11, %s4873_s19  ;;  %p4881_p13 = scmp.lt.u32.totalorder %s4873_s19, %s8831_s13 }
 0x756   : > { %p4875_p7 = pnand %p4874_p6, %p5029_p4 }
 0x757   : > { %p4880_p12 = por %p4879_p11, %p4878_p10 }
 0x758   : > { %p4876_p9 = pneg %p4875_p7 }
 0x759   : > { %p4882_p0 = por %p4881_p13, %p4880_p12 }
 0x75b   : > { %p4883_p1 = pnand %p4882_p0, %p4876_p9 }
 0x75d   : > { %4886 = shalt.err (!%p4883_p1)
}
 0x75e   : > { %4716 = dma.vmem_to_hbm [thread:$0]  (%p5029_p4), %s8833_s18, 32, %s8831_s13, %s4281_s27  }
 0x75f PF: > { %p4722_p2 = scmp.ge.s32.totalorder %s4937_s26, 2  ;;  %s4307_s28 = sand.u32 1, %s4917_s21  }
 0x760   : > { %s4308_s8 = scalar_lea.sflag [#allocation5], %s4307_s28 }
 0x761   : > { %p4719_p3 = pnand %p4722_p2, %p5036_p8 }
 0x763   : > { %4912 = dma.done.wait (!%p4719_p3), %s4308_s8, 32  }
 0x764   : > { %4914 = vsyncadd (!%p4719_p3), %s4308_s8, 4294967264  ;;  %s19_s26 = sadd.s32 1, %s4937_s26   ;;  %s9531_s21 = smov %s4921_s22 }
 0x765   : > { %p16_p5 = scmp.ge.s32.totalorder %s19_s26, 4   ;;  %s9532_s22 = smov %s4925_s23 }
 0x766   : > { %s9533_s23 = smov %s5042_s10  ;;  %s9534_s24 = smov %s4933_s25 }
 0x767   : > { %s9535_s25 = smov %s9537_s29  ;;  %18 = sbr.rel (!%p16_p5) target bundleno = 4 (0x4), region = 89 }
 0x76e   :  { %4313 = vsyncpa [#allocation5], 1 }
 0x76f   :  { %4315 = vsyncpa [#allocation5 + $0x1], 1 }

</bundles_post_ra>
